<compile_context>
chip_gen: v7x
topology: tpu7x:2x2x1
jax: 0.10.0
libtpu: 0.0.40
codegen_flags: <defaults>
</compile_context>

<pallas_src>
import math
import numpy as np
import jax
import jax.numpy as jnp
from jax import lax
from jax.experimental import pallas as pl
from jax.experimental.pallas import tpu as pltpu

D_MODEL = 50
HEADS = 2
N_LAYERS = 6
D_FF = 2048
D_K = D_MODEL // HEADS          # 25
EPS = 1e-6
NEG_INF = -1000000000.0

D_PAD = 128                      # padded d_model (lane-dense)
DK_PAD = 128                     # padded per-head dim (lane-dense)

SQRT_D = math.sqrt(D_MODEL)
SCALE = 1.0 / math.sqrt(D_K)


# --------------------------------------------------------------------------
# Kernel
# --------------------------------------------------------------------------
def encoder_kernel(src_ref, pe_ref, maskb_ref,
                   norm_ref, wq_ref, wk_ref, wv_ref, wo_ref,
                   bqkv_ref, bo_ref, w1_ref, b1_ref, w2_ref, b2_ref,
                   fnorm_ref,
                   out_ref, x_scr):
    layer = pl.program_id(0)
    bs, _, seq = maskb_ref.shape
    M, _ = x_scr.shape

    @pl.when(layer == 0)
    def _init():
        # PositionalEncoder: x = x * sqrt(d_model) + pe
        x_scr[...] = src_ref[...] * jnp.float32(SQRT_D) + pe_ref[...]

    x = x_scr[...]                                   # (M, D_PAD); padded lanes stay 0

    lane = lax.broadcasted_iota(jnp.int32, (1, D_PAD), 1)
    lane_mask = (lane < D_MODEL).astype(jnp.float32)  # 1 on the true 50 features

    def layer_norm(v, alpha, bias):
        # torch Norm: alpha*(v-mean)/(std+eps)+bias, unbiased std, statistics
        # over the true D_MODEL features only (padded lanes excluded).
        mean = jnp.sum(v, axis=-1, keepdims=True) * jnp.float32(1.0 / D_MODEL)
        c = (v - mean) * lane_mask
        var = jnp.sum(c * c, axis=-1, keepdims=True) * jnp.float32(1.0 / (D_MODEL - 1))
        inv = pl.reciprocal(jnp.sqrt(var) + jnp.float32(EPS), approx=True)
        return alpha * c * inv + bias

    npar = norm_ref[0]                               # (4, D_PAD): a1, b1, a2, b2
    mask_add = maskb_ref[...]                        # (bs, 1, seq): 0 or -1e9
    bqkv = bqkv_ref[0]                               # (3, HEADS, DK_PAD)

    # ---------------- multi-head self-attention ----------------
    x2 = layer_norm(x, npar[0:1, :], npar[1:2, :])   # (M, D_PAD)

    attn = None
    for h in range(HEADS):                           # HEADS = 2, unrolled
        q = jnp.dot(x2, wq_ref[0, h], preferred_element_type=jnp.float32) + bqkv[0, h:h + 1, :]
        k = jnp.dot(x2, wk_ref[0, h], preferred_element_type=jnp.float32) + bqkv[1, h:h + 1, :]
        v = jnp.dot(x2, wv_ref[0, h], preferred_element_type=jnp.float32) + bqkv[2, h:h + 1, :]
        qh = q.reshape(bs, seq, DK_PAD)
        kh = k.reshape(bs, seq, DK_PAD)
        vh = v.reshape(bs, seq, DK_PAD)

        scores = jnp.einsum('bqd,bkd->bqk', qh, kh,
                            preferred_element_type=jnp.float32) * jnp.float32(SCALE)
        scores = scores + mask_add                   # key-padding mask (additive)
        scores = scores - jnp.max(scores, axis=-1, keepdims=True)
        p = jnp.exp(scores)
        p = p * pl.reciprocal(jnp.sum(p, axis=-1, keepdims=True), approx=True)

        ctx = jnp.einsum('bqk,bkd->bqd', p, vh,
                         preferred_element_type=jnp.float32).reshape(M, DK_PAD)
        contrib = jnp.dot(ctx, wo_ref[0, h], preferred_element_type=jnp.float32)
        attn = contrib if attn is None else attn + contrib

    x = x + attn + bo_ref[0]                         # dropout_1 == identity (eval)

    # ---------------- feed-forward ----------------
    x2 = layer_norm(x, npar[2:3, :], npar[3:4, :])
    h1 = jnp.dot(x2.astype(jnp.bfloat16), w1_ref[0],
                 preferred_element_type=jnp.float32) + b1_ref[0]
    h1 = jnp.maximum(h1, 0.0)
    ff = jnp.dot(h1.astype(jnp.bfloat16), w2_ref[0],
                 preferred_element_type=jnp.float32) + b2_ref[0]
    x = x + ff                                       # dropout_2 == identity (eval)

    x_scr[...] = x
    out_ref[...] = x                                 # keep output buffer initialized

    @pl.when(layer == N_LAYERS - 1)
    def _final():
        fn = fnorm_ref[...]                          # (2, D_PAD): alpha, bias
        out_ref[...] = layer_norm(x, fn[0:1, :], fn[1:2, :])


# --------------------------------------------------------------------------
# Wrapper
# --------------------------------------------------------------------------
def encoder_forward(src, mask, pe, kp):
    bs, seq, d = src.shape
    M = bs * seq  # must be a multiple of 8 (sublane); true for bs=2, seq=8

    # Flatten (bs, seq) -> M and zero-pad the feature dim to D_PAD.
    src_p = jnp.zeros((M, D_PAD), jnp.float32).at[:, :d].set(src.reshape(M, d))
    pe_p = jnp.zeros((seq, D_PAD), jnp.float32).at[:, :d].set(pe)
    pe_p = jnp.broadcast_to(pe_p[None], (bs, seq, D_PAD)).reshape(M, D_PAD)
    mask_bias = jnp.where(mask == 0.0, jnp.float32(NEG_INF),
                          jnp.float32(0.0))[:, None, :]        # (bs, 1, seq)

    grid_spec = pltpu.PrefetchScalarGridSpec(
        num_scalar_prefetch=0,
        grid=(N_LAYERS,),
        in_specs=[
            pl.BlockSpec((M, D_PAD), lambda l: (0, 0)),                       # src (flat, padded)
            pl.BlockSpec((M, D_PAD), lambda l: (0, 0)),                       # pe  (flat, padded)
            pl.BlockSpec((bs, 1, seq), lambda l: (0, 0, 0)),                  # additive key mask
            pl.BlockSpec((1, 4, D_PAD), lambda l: (l, 0, 0)),                 # norm alpha/bias
            pl.BlockSpec((1, HEADS, D_PAD, DK_PAD), lambda l: (l, 0, 0, 0)),  # Wq (per head)
            pl.BlockSpec((1, HEADS, D_PAD, DK_PAD), lambda l: (l, 0, 0, 0)),  # Wk
            pl.BlockSpec((1, HEADS, D_PAD, DK_PAD), lambda l: (l, 0, 0, 0)),  # Wv
            pl.BlockSpec((1, HEADS, DK_PAD, D_PAD), lambda l: (l, 0, 0, 0)),  # Wo
            pl.BlockSpec((1, 3, HEADS, DK_PAD), lambda l: (l, 0, 0, 0)),      # bq, bk, bv
            pl.BlockSpec((1, 1, D_PAD), lambda l: (l, 0, 0)),                 # bo
            pl.BlockSpec((1, D_PAD, D_FF), lambda l: (l, 0, 0)),              # FF W1 (bf16)
            pl.BlockSpec((1, 1, D_FF), lambda l: (l, 0, 0)),                  # FF b1
            pl.BlockSpec((1, D_FF, D_PAD), lambda l: (l, 0, 0)),              # FF W2 (bf16)
            pl.BlockSpec((1, 1, D_PAD), lambda l: (l, 0, 0)),                 # FF b2
            pl.BlockSpec((2, D_PAD), lambda l: (0, 0)),                       # final norm
        ],
        out_specs=pl.BlockSpec((M, D_PAD), lambda l: (0, 0)),
        scratch_shapes=[pltpu.VMEM((M, D_PAD), jnp.float32)],
    )
    out = pl.pallas_call(
        encoder_kernel,
        out_shape=jax.ShapeDtypeStruct((M, D_PAD), jnp.float32),
        grid_spec=grid_spec,
        compiler_params=pltpu.CompilerParams(
            dimension_semantics=("arbitrary",)),
    )(src_p, pe_p, mask_bias,
      kp['norm'], kp['wq'], kp['wk'], kp['wv'], kp['wo'],
      kp['bqkv'], kp['bo'], kp['w1'], kp['b1'], kp['w2'], kp['b2'],
      kp['final_norm'])

    return out[:, :d].reshape(bs, seq, d)


# --------------------------------------------------------------------------
# Parameter construction (torch-equivalent layout) + kernel-layout packing
# --------------------------------------------------------------------------
def make_positional_encoding(seq_len):
    pos = np.arange(seq_len, dtype=np.float64)[:, None]
    i = np.arange(0, D_MODEL, 2, dtype=np.float64)[None, :]
    denom = 10000.0 ** (i / D_MODEL)
    pe = np.zeros((seq_len, D_MODEL), dtype=np.float64)
    pe[:, 0::2] = np.sin(pos / denom)
    pe[:, 1::2] = np.cos(pos / denom)       # same exponent as the torch code
    return jnp.asarray(pe, dtype=jnp.float32)


def init_params(key):
    """Parameters in the original torch layout (Linear weights are (out, in))."""
    ks = jax.random.split(key, 6)

    def unif(k, shape, fan_in):
        b = 1.0 / math.sqrt(fan_in)
        return jax.random.uniform(k, shape, jnp.float32, -b, b)

    norm = jnp.broadcast_to(
        jnp.array([1.0, 0.0, 1.0, 0.0], jnp.float32)[None, :, None],
        (N_LAYERS, 4, D_MODEL))
    return {
        'norm': norm,                                                     # alpha1,bias1,alpha2,bias2
        'attn_w': unif(ks[0], (N_LAYERS, 4, D_MODEL, D_MODEL), D_MODEL),  # Wq,Wk,Wv,Wo (out,in)
        'attn_b': unif(ks[1], (N_LAYERS, 4, D_MODEL), D_MODEL),
        'ff_w1': unif(ks[2], (N_LAYERS, D_FF, D_MODEL), D_MODEL),
        'ff_b1': unif(ks[3], (N_LAYERS, 1, D_FF), D_MODEL),
        'ff_w2': unif(ks[4], (N_LAYERS, D_MODEL, D_FF), D_FF),
        'ff_b2': unif(ks[5], (N_LAYERS, 1, D_MODEL), D_FF),
        'final_norm': jnp.stack(
            [jnp.ones((D_MODEL,), jnp.float32),
             jnp.zeros((D_MODEL,), jnp.float32)], axis=0),
    }


def pack_params(params):
    """Pre-transpose / head-split / zero-pad params into the kernel layout."""
    L, H, D, DK = N_LAYERS, HEADS, D_MODEL, D_K
    aw, ab = params['attn_w'], params['attn_b']

    def qkv_heads(w):       # (L, D_out, D_in) -> (L, H, D_PAD, DK_PAD);  q_h = x @ out[h]
        wt = jnp.transpose(w, (0, 2, 1)).reshape(L, D, H, DK)
        wt = jnp.transpose(wt, (0, 2, 1, 3))                  # (L, H, in, dk)
        return (jnp.zeros((L, H, D_PAD, DK_PAD), jnp.float32)
                .at[:, :, :D, :DK].set(wt))

    def out_heads(w):       # (L, D_out, D_in) -> (L, H, DK_PAD, D_PAD);  o += ctx_h @ out[h]
        wt = jnp.transpose(w, (0, 2, 1)).reshape(L, H, DK, D)  # (L, H, dk, out)
        return (jnp.zeros((L, H, DK_PAD, D_PAD), jnp.float32)
                .at[:, :, :DK, :D].set(wt))

    bqkv = (jnp.zeros((L, 3, H, DK_PAD), jnp.float32)
            .at[:, :, :, :DK].set(ab[:, :3].reshape(L, 3, H, DK)))
    bo = jnp.zeros((L, 1, D_PAD), jnp.float32).at[:, 0, :D].set(ab[:, 3])

    norm_k = jnp.zeros((L, 4, D_PAD), jnp.float32).at[:, :, :D].set(params['norm'])
    fnorm_k = jnp.zeros((2, D_PAD), jnp.float32).at[:, :D].set(params['final_norm'])

    w1 = (jnp.zeros((L, D_PAD, D_FF), jnp.float32)
          .at[:, :D, :].set(jnp.transpose(params['ff_w1'], (0, 2, 1)))
          ).astype(jnp.bfloat16)
    w2 = (jnp.zeros((L, D_FF, D_PAD), jnp.float32)
          .at[:, :, :D].set(jnp.transpose(params['ff_w2'], (0, 2, 1)))
          ).astype(jnp.bfloat16)
    b1 = params['ff_b1']
    b2 = jnp.zeros((L, 1, D_PAD), jnp.float32).at[:, :, :D].set(params['ff_b2'])

    return dict(norm=norm_k,
                wq=qkv_heads(aw[:, 0]), wk=qkv_heads(aw[:, 1]),
                wv=qkv_heads(aw[:, 2]), wo=out_heads(aw[:, 3]),
                bqkv=bqkv, bo=bo, w1=w1, b1=b1, w2=w2, b2=b2,
                final_norm=fnorm_k)


# --------------------------------------------------------------------------
# Pure-JAX reference (mirrors the PyTorch forward in eval mode)
# --------------------------------------------------------------------------
def encoder_reference(src, mask, pe, params):
    x = src * math.sqrt(D_MODEL) + pe[None]
    mask4 = (mask == 0.0)[:, None, None, :]       # (bs, 1, 1, seq)

    def norm(x, a, b):
        mean = x.mean(-1, keepdims=True)
        c = x - mean
        std = jnp.sqrt((c * c).sum(-1, keepdims=True) / (D_MODEL - 1))
        return a * c / (std + EPS) + b

    bs, seq, d = x.shape
    for l in range(N_LAYERS):
        npar = params['norm'][l]
        aw, ab = params['attn_w'][l], params['attn_b'][l]
        x2 = norm(x, npar[0], npar[1])
        q = x2 @ aw[0].T + ab[0]
        k = x2 @ aw[1].T + ab[1]
        v = x2 @ aw[2].T + ab[2]
        sp = lambda t: t.reshape(bs, seq, HEADS, D_K).transpose(0, 2, 1, 3)
        qh, kh, vh = sp(q), sp(k), sp(v)
        scores = jnp.einsum('bhqd,bhkd->bhqk', qh, kh) / math.sqrt(D_K)
        scores = jnp.where(mask4, NEG_INF, scores)
        p = jax.nn.softmax(scores, axis=-1)
        o = jnp.einsum('bhqk,bhkd->bhqd', p, vh).transpose(0, 2, 1, 3)
        o = o.reshape(bs, seq, d)
        x = x + (o @ aw[3].T + ab[3])
        x2 = norm(x, npar[2], npar[3])
        h = jnp.maximum(x2 @ params['ff_w1'][l].T + params['ff_b1'][l][0], 0.0)
        x = x + (h @ params['ff_w2'][l].T + params['ff_b2'][l][0])
    fn = params['final_norm']
    return norm(x, fn[0], fn[1])


if __name__ == "__main__":
    BS, SEQ = 2, 8
    key = jax.random.PRNGKey(0)
    k_src, k_par = jax.random.split(key)

    src = jax.random.normal(k_src, (BS, SEQ, D_MODEL), jnp.float32)
    # Padding mask: batch 1 has its last two key positions masked out.
    mask = jnp.ones((BS, SEQ), jnp.float32).at[1, -2:].set(0.0)
    pe = make_positional_encoding(SEQ)
    params = init_params(k_par)
    kparams = pack_params(params)

    out = encoder_forward(src, mask, pe, kparams)
    out = jax.block_until_ready(out)

    ref = encoder_reference(src, mask, pe, params)
    assert out.shape == (BS, SEQ, D_MODEL)
    assert bool(jnp.all(jnp.isfinite(out)))
    # Tolerance accounts for bf16 FF weights streamed into the MXU (f32 accumulation).
    np_ok = np.allclose(np.asarray(out), np.asarray(ref), rtol=2e-2, atol=2e-2)
    assert np_ok, "Pallas output mismatches JAX reference"

    print("KERNEL_OK")
</pallas_src>

<mosaic_0001>
module attributes {stable_mosaic.version = 11 : i64} {
  func.func @encoder_kernel(%arg0: i32, %arg1: memref<16x128xf32, #tpu.memory_space<vmem>>, %arg2: memref<16x128xf32, #tpu.memory_space<vmem>>, %arg3: memref<2x1x8xf32, #tpu.memory_space<vmem>>, %arg4: memref<1x4x128xf32, #tpu.memory_space<vmem>>, %arg5: memref<1x2x128x128xf32, #tpu.memory_space<vmem>>, %arg6: memref<1x2x128x128xf32, #tpu.memory_space<vmem>>, %arg7: memref<1x2x128x128xf32, #tpu.memory_space<vmem>>, %arg8: memref<1x2x128x128xf32, #tpu.memory_space<vmem>>, %arg9: memref<1x3x2x128xf32, #tpu.memory_space<vmem>>, %arg10: memref<1x1x128xf32, #tpu.memory_space<vmem>>, %arg11: memref<1x128x2048xbf16, #tpu.memory_space<vmem>>, %arg12: memref<1x1x2048xf32, #tpu.memory_space<vmem>>, %arg13: memref<1x2048x128xbf16, #tpu.memory_space<vmem>>, %arg14: memref<1x1x128xf32, #tpu.memory_space<vmem>>, %arg15: memref<2x128xf32, #tpu.memory_space<vmem>>, %arg16: memref<16x128xf32, #tpu.memory_space<vmem>>, %arg17: memref<16x128xf32, #tpu.memory_space<vmem>>) attributes {dimension_semantics = [#tpu.dimension_semantics<arbitrary>], iteration_bounds = array<i64: 6>, scalar_prefetch = 0 : i64, scratch_operands = 1 : i64, tpu.core_type = #tpu.core_type<tc>, window_params = [{pipeline_mode = #tpu.pipeline_mode<synchronous>, transform_indices = @transform_0, window_bounds = array<i64: 16, 128>}, {pipeline_mode = #tpu.pipeline_mode<synchronous>, transform_indices = @transform_1, window_bounds = array<i64: 16, 128>}, {pipeline_mode = #tpu.pipeline_mode<synchronous>, transform_indices = @transform_2, window_bounds = array<i64: 2, 1, 8>}, {transform_indices = @transform_3, window_bounds = array<i64: 1, 4, 128>}, {transform_indices = @transform_4, window_bounds = array<i64: 1, 2, 128, 128>}, {transform_indices = @transform_5, window_bounds = array<i64: 1, 2, 128, 128>}, {transform_indices = @transform_6, window_bounds = array<i64: 1, 2, 128, 128>}, {transform_indices = @transform_7, window_bounds = array<i64: 1, 2, 128, 128>}, {transform_indices = @transform_8, window_bounds = array<i64: 1, 3, 2, 128>}, {transform_indices = @transform_9, window_bounds = array<i64: 1, 1, 128>}, {transform_indices = @transform_10, window_bounds = array<i64: 1, 128, 2048>}, {transform_indices = @transform_11, window_bounds = array<i64: 1, 1, 2048>}, {transform_indices = @transform_12, window_bounds = array<i64: 1, 2048, 128>}, {transform_indices = @transform_13, window_bounds = array<i64: 1, 1, 128>}, {pipeline_mode = #tpu.pipeline_mode<synchronous>, transform_indices = @transform_14, window_bounds = array<i64: 2, 128>}, {pipeline_mode = #tpu.pipeline_mode<synchronous>, transform_indices = @transform_15, window_bounds = array<i64: 16, 128>}]} {
    %c0_i32 = arith.constant 0 : i32
    %0 = arith.cmpi eq, %arg0, %c0_i32 : i32
    %1 = arith.extui %0 : i1 to i32
    %c0_i32_0 = arith.constant 0 : i32
    %2 = arith.cmpi ne, %1, %c0_i32_0 : i32
    scf.if %2 {
      %c0_93 = arith.constant 0 : index
      %c0_94 = arith.constant 0 : index
      %182 = vector.load %arg1[%c0_93, %c0_94] : memref<16x128xf32, #tpu.memory_space<vmem>>, vector<16x128xf32>
      %cst_95 = arith.constant 7.07106781 : f32
      %183 = vector.broadcast %cst_95 : f32 to vector<16x128xf32>
      %184 = arith.mulf %182, %183 : vector<16x128xf32>
      %c0_96 = arith.constant 0 : index
      %c0_97 = arith.constant 0 : index
      %185 = vector.load %arg2[%c0_96, %c0_97] : memref<16x128xf32, #tpu.memory_space<vmem>>, vector<16x128xf32>
      %186 = arith.addf %184, %185 : vector<16x128xf32>
      %c0_98 = arith.constant 0 : index
      %c0_99 = arith.constant 0 : index
      %187 = vector.load %arg17[%c0_98, %c0_99] : memref<16x128xf32, #tpu.memory_space<vmem>>, vector<16x128xf32>
      tpu.vector_store %arg17[%c0_98, %c0_99], %186 {strides = array<i32>} : memref<16x128xf32, #tpu.memory_space<vmem>>, vector<16x128xf32>,
    } else {
    }
    %c0 = arith.constant 0 : index
    %c0_1 = arith.constant 0 : index
    %3 = vector.load %arg17[%c0, %c0_1] : memref<16x128xf32, #tpu.memory_space<vmem>>, vector<16x128xf32>
    %4 = tpu.iota {dimensions = array<i32: 1>} : vector<1x128xi32>
    %c50_i32 = arith.constant 50 : i32
    %5 = vector.broadcast %c50_i32 : i32 to vector<1x128xi32>
    %6 = arith.cmpi slt, %4, %5 : vector<1x128xi32>
    %7 = arith.extui %6 : vector<1x128xi1> to vector<1x128xi32>
    %8 = arith.sitofp %7 : vector<1x128xi32> to vector<1x128xf32>
    %c0_2 = arith.constant 0 : index
    %c0_3 = arith.constant 0 : index
    %c0_4 = arith.constant 0 : index
    %9 = vector.load %arg4[%c0_2, %c0_3, %c0_4] : memref<1x4x128xf32, #tpu.memory_space<vmem>>, vector<1x4x128xf32>
    %10 = vector.shape_cast %9 : vector<1x4x128xf32> to vector<4x128xf32>
    %c0_5 = arith.constant 0 : index
    %c0_6 = arith.constant 0 : index
    %c0_7 = arith.constant 0 : index
    %11 = vector.load %arg3[%c0_5, %c0_6, %c0_7] : memref<2x1x8xf32, #tpu.memory_space<vmem>>, vector<2x1x8xf32>
    %c0_8 = arith.constant 0 : index
    %c0_9 = arith.constant 0 : index
    %c0_10 = arith.constant 0 : index
    %c0_11 = arith.constant 0 : index
    %12 = vector.load %arg9[%c0_8, %c0_9, %c0_10, %c0_11] : memref<1x3x2x128xf32, #tpu.memory_space<vmem>>, vector<1x3x2x128xf32>
    %13 = vector.shape_cast %12 : vector<1x3x2x128xf32> to vector<3x2x128xf32>
    %14 = vector.extract_strided_slice %10 {offsets = [0, 0], sizes = [1, 128], strides = [1, 1]} : vector<4x128xf32> to vector<1x128xf32>
    %15 = vector.extract_strided_slice %10 {offsets = [1, 0], sizes = [1, 128], strides = [1, 1]} : vector<4x128xf32> to vector<1x128xf32>
    %cst = arith.constant dense<0.000000e+00> : vector<16xf32>
    %16 = vector.multi_reduction <add>, %3, %cst [1] : vector<16x128xf32> to vector<16xf32>
    %17 = vector.shape_cast %16 : vector<16xf32> to vector<16x1xf32>
    %cst_12 = arith.constant 2.000000e-02 : f32
    %18 = vector.broadcast %cst_12 : f32 to vector<16x1xf32>
    %19 = arith.mulf %17, %18 : vector<16x1xf32>
    %20 = vector.broadcast %19 : vector<16x1xf32> to vector<16x128xf32>
    %21 = arith.subf %3, %20 : vector<16x128xf32>
    %22 = vector.broadcast %8 : vector<1x128xf32> to vector<16x128xf32>
    %23 = arith.mulf %21, %22 : vector<16x128xf32>
    %24 = arith.mulf %23, %23 : vector<16x128xf32>
    %cst_13 = arith.constant dense<0.000000e+00> : vector<16xf32>
    %25 = vector.multi_reduction <add>, %24, %cst_13 [1] : vector<16x128xf32> to vector<16xf32>
    %26 = vector.shape_cast %25 : vector<16xf32> to vector<16x1xf32>
    %cst_14 = arith.constant 0.0204081628 : f32
    %27 = vector.broadcast %cst_14 : f32 to vector<16x1xf32>
    %28 = arith.mulf %26, %27 : vector<16x1xf32>
    %29 = math.sqrt %28 : vector<16x1xf32>
    %cst_15 = arith.constant 9.99999997E-7 : f32
    %30 = vector.broadcast %cst_15 : f32 to vector<16x1xf32>
    %31 = arith.addf %29, %30 : vector<16x1xf32>
    %32 = tpu.reciprocal %31 {approx = true} : vector<16x1xf32> -> vector<16x1xf32>
    %33 = vector.broadcast %14 : vector<1x128xf32> to vector<16x128xf32>
    %34 = arith.mulf %33, %23 : vector<16x128xf32>
    %35 = vector.broadcast %32 : vector<16x1xf32> to vector<16x128xf32>
    %36 = arith.mulf %34, %35 : vector<16x128xf32>
    %37 = vector.broadcast %15 : vector<1x128xf32> to vector<16x128xf32>
    %38 = arith.addf %36, %37 : vector<16x128xf32>
    %c0_16 = arith.constant 0 : index
    %c0_17 = arith.constant 0 : index
    %c0_18 = arith.constant 0 : index
    %c0_19 = arith.constant 0 : index
    %39 = vector.load %arg5[%c0_16, %c0_17, %c0_18, %c0_19] : memref<1x2x128x128xf32, #tpu.memory_space<vmem>>, vector<1x1x128x128xf32>
    %40 = vector.shape_cast %39 : vector<1x1x128x128xf32> to vector<128x128xf32>
    %cst_20 = arith.constant dense<0.000000e+00> : vector<16x128xf32>
    %41 = tpu.matmul %38, %40, %cst_20 {dimension_numbers = #tpu.dot_dimension_numbers<[1], [0], [0], [1], [0, 0, 1, 1], [], []>} : vector<16x128xf32>, vector<128x128xf32>, vector<16x128xf32> -> vector<16x128xf32>
    %42 = vector.extract_strided_slice %13 {offsets = [0, 0, 0], sizes = [1, 1, 128], strides = [1, 1, 1]} : vector<3x2x128xf32> to vector<1x1x128xf32>
    %43 = vector.shape_cast %42 : vector<1x1x128xf32> to vector<1x128xf32>
    %44 = vector.broadcast %43 : vector<1x128xf32> to vector<16x128xf32>
    %45 = arith.addf %41, %44 : vector<16x128xf32>
    %c0_21 = arith.constant 0 : index
    %c0_22 = arith.constant 0 : index
    %c0_23 = arith.constant 0 : index
    %c0_24 = arith.constant 0 : index
    %46 = vector.load %arg6[%c0_21, %c0_22, %c0_23, %c0_24] : memref<1x2x128x128xf32, #tpu.memory_space<vmem>>, vector<1x1x128x128xf32>
    %47 = vector.shape_cast %46 : vector<1x1x128x128xf32> to vector<128x128xf32>
    %cst_25 = arith.constant dense<0.000000e+00> : vector<16x128xf32>
    %48 = tpu.matmul %38, %47, %cst_25 {dimension_numbers = #tpu.dot_dimension_numbers<[1], [0], [0], [1], [0, 0, 1, 1], [], []>} : vector<16x128xf32>, vector<128x128xf32>, vector<16x128xf32> -> vector<16x128xf32>
    %49 = vector.extract_strided_slice %13 {offsets = [1, 0, 0], sizes = [1, 1, 128], strides = [1, 1, 1]} : vector<3x2x128xf32> to vector<1x1x128xf32>
    %50 = vector.shape_cast %49 : vector<1x1x128xf32> to vector<1x128xf32>
    %51 = vector.broadcast %50 : vector<1x128xf32> to vector<16x128xf32>
    %52 = arith.addf %48, %51 : vector<16x128xf32>
    %c0_26 = arith.constant 0 : index
    %c0_27 = arith.constant 0 : index
    %c0_28 = arith.constant 0 : index
    %c0_29 = arith.constant 0 : index
    %53 = vector.load %arg7[%c0_26, %c0_27, %c0_28, %c0_29] : memref<1x2x128x128xf32, #tpu.memory_space<vmem>>, vector<1x1x128x128xf32>
    %54 = vector.shape_cast %53 : vector<1x1x128x128xf32> to vector<128x128xf32>
    %cst_30 = arith.constant dense<0.000000e+00> : vector<16x128xf32>
    %55 = tpu.matmul %38, %54, %cst_30 {dimension_numbers = #tpu.dot_dimension_numbers<[1], [0], [0], [1], [0, 0, 1, 1], [], []>} : vector<16x128xf32>, vector<128x128xf32>, vector<16x128xf32> -> vector<16x128xf32>
    %56 = vector.extract_strided_slice %13 {offsets = [2, 0, 0], sizes = [1, 1, 128], strides = [1, 1, 1]} : vector<3x2x128xf32> to vector<1x1x128xf32>
    %57 = vector.shape_cast %56 : vector<1x1x128xf32> to vector<1x128xf32>
    %58 = vector.broadcast %57 : vector<1x128xf32> to vector<16x128xf32>
    %59 = arith.addf %55, %58 : vector<16x128xf32>
    %60 = vector.shape_cast %45 : vector<16x128xf32> to vector<2x8x128xf32>
    %61 = vector.shape_cast %52 : vector<16x128xf32> to vector<2x8x128xf32>
    %62 = vector.shape_cast %59 : vector<16x128xf32> to vector<2x8x128xf32>
    "tpu.trace_start"() <{level = 10 : i32, message = "bqd,bkd->bqk"}> : () -> ()
    %cst_31 = arith.constant dense<0.000000e+00> : vector<2x8x8xf32>
    %63 = tpu.matmul %60, %61, %cst_31 {dimension_numbers = #tpu.dot_dimension_numbers<[2], [2], [1], [1], [0, 0, 0, 1, 1, 1], [0], [0]>} : vector<2x8x128xf32>, vector<2x8x128xf32>, vector<2x8x8xf32> -> vector<2x8x8xf32>
    "tpu.trace_stop"() : () -> ()
    %cst_32 = arith.constant 2.000000e-01 : f32
    %64 = vector.broadcast %cst_32 : f32 to vector<2x8x8xf32>
    %65 = arith.mulf %63, %64 : vector<2x8x8xf32>
    %66 = vector.broadcast %11 : vector<2x1x8xf32> to vector<2x8x8xf32>
    %67 = arith.addf %65, %66 : vector<2x8x8xf32>
    %cst_33 = arith.constant dense<0xFF800000> : vector<2x8xf32>
    %68 = vector.multi_reduction <maximumf>, %67, %cst_33 [2] : vector<2x8x8xf32> to vector<2x8xf32>
    %69 = vector.shape_cast %68 : vector<2x8xf32> to vector<2x8x1xf32>
    %70 = vector.broadcast %69 : vector<2x8x1xf32> to vector<2x8x8xf32>
    %71 = arith.subf %67, %70 : vector<2x8x8xf32>
    %72 = math.exp %71 : vector<2x8x8xf32>
    %cst_34 = arith.constant dense<0.000000e+00> : vector<2x8xf32>
    %73 = vector.multi_reduction <add>, %72, %cst_34 [2] : vector<2x8x8xf32> to vector<2x8xf32>
    %74 = vector.shape_cast %73 : vector<2x8xf32> to vector<2x8x1xf32>
    %75 = tpu.reciprocal %74 {approx = true} : vector<2x8x1xf32> -> vector<2x8x1xf32>
    %76 = vector.broadcast %75 : vector<2x8x1xf32> to vector<2x8x8xf32>
    %77 = arith.mulf %72, %76 : vector<2x8x8xf32>
    "tpu.trace_start"() <{level = 10 : i32, message = "bqk,bkd->bqd"}> : () -> ()
    %cst_35 = arith.constant dense<0.000000e+00> : vector<2x8x128xf32>
    %78 = tpu.matmul %77, %62, %cst_35 {dimension_numbers = #tpu.dot_dimension_numbers<[2], [1], [1], [2], [0, 0, 0, 1, 1, 2], [0], [0]>} : vector<2x8x8xf32>, vector<2x8x128xf32>, vector<2x8x128xf32> -> vector<2x8x128xf32>
    "tpu.trace_stop"() : () -> ()
    %79 = vector.shape_cast %78 : vector<2x8x128xf32> to vector<16x128xf32>
    %c0_36 = arith.constant 0 : index
    %c0_37 = arith.constant 0 : index
    %c0_38 = arith.constant 0 : index
    %c0_39 = arith.constant 0 : index
    %80 = vector.load %arg8[%c0_36, %c0_37, %c0_38, %c0_39] : memref<1x2x128x128xf32, #tpu.memory_space<vmem>>, vector<1x1x128x128xf32>
    %81 = vector.shape_cast %80 : vector<1x1x128x128xf32> to vector<128x128xf32>
    %cst_40 = arith.constant dense<0.000000e+00> : vector<16x128xf32>
    %82 = tpu.matmul %79, %81, %cst_40 {dimension_numbers = #tpu.dot_dimension_numbers<[1], [0], [0], [1], [0, 0, 1, 1], [], []>} : vector<16x128xf32>, vector<128x128xf32>, vector<16x128xf32> -> vector<16x128xf32>
    %c0_41 = arith.constant 0 : index
    %c1 = arith.constant 1 : index
    %c0_42 = arith.constant 0 : index
    %c0_43 = arith.constant 0 : index
    %83 = vector.load %arg5[%c0_41, %c1, %c0_42, %c0_43] : memref<1x2x128x128xf32, #tpu.memory_space<vmem>>, vector<1x1x128x128xf32>
    %84 = vector.shape_cast %83 : vector<1x1x128x128xf32> to vector<128x128xf32>
    %cst_44 = arith.constant dense<0.000000e+00> : vector<16x128xf32>
    %85 = tpu.matmul %38, %84, %cst_44 {dimension_numbers = #tpu.dot_dimension_numbers<[1], [0], [0], [1], [0, 0, 1, 1], [], []>} : vector<16x128xf32>, vector<128x128xf32>, vector<16x128xf32> -> vector<16x128xf32>
    %86 = vector.extract_strided_slice %13 {offsets = [0, 1, 0], sizes = [1, 1, 128], strides = [1, 1, 1]} : vector<3x2x128xf32> to vector<1x1x128xf32>
    %87 = vector.shape_cast %86 : vector<1x1x128xf32> to vector<1x128xf32>
    %88 = vector.broadcast %87 : vector<1x128xf32> to vector<16x128xf32>
    %89 = arith.addf %85, %88 : vector<16x128xf32>
    %c0_45 = arith.constant 0 : index
    %c1_46 = arith.constant 1 : index
    %c0_47 = arith.constant 0 : index
    %c0_48 = arith.constant 0 : index
    %90 = vector.load %arg6[%c0_45, %c1_46, %c0_47, %c0_48] : memref<1x2x128x128xf32, #tpu.memory_space<vmem>>, vector<1x1x128x128xf32>
    %91 = vector.shape_cast %90 : vector<1x1x128x128xf32> to vector<128x128xf32>
    %cst_49 = arith.constant dense<0.000000e+00> : vector<16x128xf32>
    %92 = tpu.matmul %38, %91, %cst_49 {dimension_numbers = #tpu.dot_dimension_numbers<[1], [0], [0], [1], [0, 0, 1, 1], [], []>} : vector<16x128xf32>, vector<128x128xf32>, vector<16x128xf32> -> vector<16x128xf32>
    %93 = vector.extract_strided_slice %13 {offsets = [1, 1, 0], sizes = [1, 1, 128], strides = [1, 1, 1]} : vector<3x2x128xf32> to vector<1x1x128xf32>
    %94 = vector.shape_cast %93 : vector<1x1x128xf32> to vector<1x128xf32>
    %95 = vector.broadcast %94 : vector<1x128xf32> to vector<16x128xf32>
    %96 = arith.addf %92, %95 : vector<16x128xf32>
    %c0_50 = arith.constant 0 : index
    %c1_51 = arith.constant 1 : index
    %c0_52 = arith.constant 0 : index
    %c0_53 = arith.constant 0 : index
    %97 = vector.load %arg7[%c0_50, %c1_51, %c0_52, %c0_53] : memref<1x2x128x128xf32, #tpu.memory_space<vmem>>, vector<1x1x128x128xf32>
    %98 = vector.shape_cast %97 : vector<1x1x128x128xf32> to vector<128x128xf32>
    %cst_54 = arith.constant dense<0.000000e+00> : vector<16x128xf32>
    %99 = tpu.matmul %38, %98, %cst_54 {dimension_numbers = #tpu.dot_dimension_numbers<[1], [0], [0], [1], [0, 0, 1, 1], [], []>} : vector<16x128xf32>, vector<128x128xf32>, vector<16x128xf32> -> vector<16x128xf32>
    %100 = vector.extract_strided_slice %13 {offsets = [2, 1, 0], sizes = [1, 1, 128], strides = [1, 1, 1]} : vector<3x2x128xf32> to vector<1x1x128xf32>
    %101 = vector.shape_cast %100 : vector<1x1x128xf32> to vector<1x128xf32>
    %102 = vector.broadcast %101 : vector<1x128xf32> to vector<16x128xf32>
    %103 = arith.addf %99, %102 : vector<16x128xf32>
    %104 = vector.shape_cast %89 : vector<16x128xf32> to vector<2x8x128xf32>
    %105 = vector.shape_cast %96 : vector<16x128xf32> to vector<2x8x128xf32>
    %106 = vector.shape_cast %103 : vector<16x128xf32> to vector<2x8x128xf32>
    "tpu.trace_start"() <{level = 10 : i32, message = "bqd,bkd->bqk"}> : () -> ()
    %cst_55 = arith.constant dense<0.000000e+00> : vector<2x8x8xf32>
    %107 = tpu.matmul %104, %105, %cst_55 {dimension_numbers = #tpu.dot_dimension_numbers<[2], [2], [1], [1], [0, 0, 0, 1, 1, 1], [0], [0]>} : vector<2x8x128xf32>, vector<2x8x128xf32>, vector<2x8x8xf32> -> vector<2x8x8xf32>
    "tpu.trace_stop"() : () -> ()
    %cst_56 = arith.constant 2.000000e-01 : f32
    %108 = vector.broadcast %cst_56 : f32 to vector<2x8x8xf32>
    %109 = arith.mulf %107, %108 : vector<2x8x8xf32>
    %110 = vector.broadcast %11 : vector<2x1x8xf32> to vector<2x8x8xf32>
    %111 = arith.addf %109, %110 : vector<2x8x8xf32>
    %cst_57 = arith.constant dense<0xFF800000> : vector<2x8xf32>
    %112 = vector.multi_reduction <maximumf>, %111, %cst_57 [2] : vector<2x8x8xf32> to vector<2x8xf32>
    %113 = vector.shape_cast %112 : vector<2x8xf32> to vector<2x8x1xf32>
    %114 = vector.broadcast %113 : vector<2x8x1xf32> to vector<2x8x8xf32>
    %115 = arith.subf %111, %114 : vector<2x8x8xf32>
    %116 = math.exp %115 : vector<2x8x8xf32>
    %cst_58 = arith.constant dense<0.000000e+00> : vector<2x8xf32>
    %117 = vector.multi_reduction <add>, %116, %cst_58 [2] : vector<2x8x8xf32> to vector<2x8xf32>
    %118 = vector.shape_cast %117 : vector<2x8xf32> to vector<2x8x1xf32>
    %119 = tpu.reciprocal %118 {approx = true} : vector<2x8x1xf32> -> vector<2x8x1xf32>
    %120 = vector.broadcast %119 : vector<2x8x1xf32> to vector<2x8x8xf32>
    %121 = arith.mulf %116, %120 : vector<2x8x8xf32>
    "tpu.trace_start"() <{level = 10 : i32, message = "bqk,bkd->bqd"}> : () -> ()
    %cst_59 = arith.constant dense<0.000000e+00> : vector<2x8x128xf32>
    %122 = tpu.matmul %121, %106, %cst_59 {dimension_numbers = #tpu.dot_dimension_numbers<[2], [1], [1], [2], [0, 0, 0, 1, 1, 2], [0], [0]>} : vector<2x8x8xf32>, vector<2x8x128xf32>, vector<2x8x128xf32> -> vector<2x8x128xf32>
    "tpu.trace_stop"() : () -> ()
    %123 = vector.shape_cast %122 : vector<2x8x128xf32> to vector<16x128xf32>
    %c0_60 = arith.constant 0 : index
    %c1_61 = arith.constant 1 : index
    %c0_62 = arith.constant 0 : index
    %c0_63 = arith.constant 0 : index
    %124 = vector.load %arg8[%c0_60, %c1_61, %c0_62, %c0_63] : memref<1x2x128x128xf32, #tpu.memory_space<vmem>>, vector<1x1x128x128xf32>
    %125 = vector.shape_cast %124 : vector<1x1x128x128xf32> to vector<128x128xf32>
    %cst_64 = arith.constant dense<0.000000e+00> : vector<16x128xf32>
    %126 = tpu.matmul %123, %125, %cst_64 {dimension_numbers = #tpu.dot_dimension_numbers<[1], [0], [0], [1], [0, 0, 1, 1], [], []>} : vector<16x128xf32>, vector<128x128xf32>, vector<16x128xf32> -> vector<16x128xf32>
    %127 = arith.addf %82, %126 : vector<16x128xf32>
    %128 = arith.addf %3, %127 : vector<16x128xf32>
    %c0_65 = arith.constant 0 : index
    %c0_66 = arith.constant 0 : index
    %c0_67 = arith.constant 0 : index
    %129 = vector.load %arg10[%c0_65, %c0_66, %c0_67] : memref<1x1x128xf32, #tpu.memory_space<vmem>>, vector<1x1x128xf32>
    %130 = vector.shape_cast %129 : vector<1x1x128xf32> to vector<1x128xf32>
    %131 = vector.broadcast %130 : vector<1x128xf32> to vector<16x128xf32>
    %132 = arith.addf %128, %131 : vector<16x128xf32>
    %133 = vector.extract_strided_slice %10 {offsets = [2, 0], sizes = [1, 128], strides = [1, 1]} : vector<4x128xf32> to vector<1x128xf32>
    %134 = vector.extract_strided_slice %10 {offsets = [3, 0], sizes = [1, 128], strides = [1, 1]} : vector<4x128xf32> to vector<1x128xf32>
    %cst_68 = arith.constant dense<0.000000e+00> : vector<16xf32>
    %135 = vector.multi_reduction <add>, %132, %cst_68 [1] : vector<16x128xf32> to vector<16xf32>
    %136 = vector.shape_cast %135 : vector<16xf32> to vector<16x1xf32>
    %cst_69 = arith.constant 2.000000e-02 : f32
    %137 = vector.broadcast %cst_69 : f32 to vector<16x1xf32>
    %138 = arith.mulf %136, %137 : vector<16x1xf32>
    %139 = vector.broadcast %138 : vector<16x1xf32> to vector<16x128xf32>
    %140 = arith.subf %132, %139 : vector<16x128xf32>
    %141 = vector.broadcast %8 : vector<1x128xf32> to vector<16x128xf32>
    %142 = arith.mulf %140, %141 : vector<16x128xf32>
    %143 = arith.mulf %142, %142 : vector<16x128xf32>
    %cst_70 = arith.constant dense<0.000000e+00> : vector<16xf32>
    %144 = vector.multi_reduction <add>, %143, %cst_70 [1] : vector<16x128xf32> to vector<16xf32>
    %145 = vector.shape_cast %144 : vector<16xf32> to vector<16x1xf32>
    %cst_71 = arith.constant 0.0204081628 : f32
    %146 = vector.broadcast %cst_71 : f32 to vector<16x1xf32>
    %147 = arith.mulf %145, %146 : vector<16x1xf32>
    %148 = math.sqrt %147 : vector<16x1xf32>
    %cst_72 = arith.constant 9.99999997E-7 : f32
    %149 = vector.broadcast %cst_72 : f32 to vector<16x1xf32>
    %150 = arith.addf %148, %149 : vector<16x1xf32>
    %151 = tpu.reciprocal %150 {approx = true} : vector<16x1xf32> -> vector<16x1xf32>
    %152 = vector.broadcast %133 : vector<1x128xf32> to vector<16x128xf32>
    %153 = arith.mulf %152, %142 : vector<16x128xf32>
    %154 = vector.broadcast %151 : vector<16x1xf32> to vector<16x128xf32>
    %155 = arith.mulf %153, %154 : vector<16x128xf32>
    %156 = vector.broadcast %134 : vector<1x128xf32> to vector<16x128xf32>
    %157 = arith.addf %155, %156 : vector<16x128xf32>
    %158 = arith.truncf %157 : vector<16x128xf32> to vector<16x128xbf16>
    %c0_73 = arith.constant 0 : index
    %c0_74 = arith.constant 0 : index
    %c0_75 = arith.constant 0 : index
    %159 = vector.load %arg11[%c0_73, %c0_74, %c0_75] : memref<1x128x2048xbf16, #tpu.memory_space<vmem>>, vector<1x128x2048xbf16>
    %160 = vector.shape_cast %159 : vector<1x128x2048xbf16> to vector<128x2048xbf16>
    %cst_76 = arith.constant dense<0.000000e+00> : vector<16x2048xf32>
    %161 = tpu.matmul %158, %160, %cst_76 {dimension_numbers = #tpu.dot_dimension_numbers<[1], [0], [0], [1], [0, 0, 1, 1], [], []>} : vector<16x128xbf16>, vector<128x2048xbf16>, vector<16x2048xf32> -> vector<16x2048xf32>
    %c0_77 = arith.constant 0 : index
    %c0_78 = arith.constant 0 : index
    %c0_79 = arith.constant 0 : index
    %162 = vector.load %arg12[%c0_77, %c0_78, %c0_79] : memref<1x1x2048xf32, #tpu.memory_space<vmem>>, vector<1x1x2048xf32>
    %163 = vector.shape_cast %162 : vector<1x1x2048xf32> to vector<1x2048xf32>
    %164 = vector.broadcast %163 : vector<1x2048xf32> to vector<16x2048xf32>
    %165 = arith.addf %161, %164 : vector<16x2048xf32>
    %cst_80 = arith.constant 0.000000e+00 : f32
    %166 = vector.broadcast %cst_80 : f32 to vector<16x2048xf32>
    %167 = arith.maximumf %165, %166 : vector<16x2048xf32>
    %168 = arith.truncf %167 : vector<16x2048xf32> to vector<16x2048xbf16>
    %c0_81 = arith.constant 0 : index
    %c0_82 = arith.constant 0 : index
    %c0_83 = arith.constant 0 : index
    %169 = vector.load %arg13[%c0_81, %c0_82, %c0_83] : memref<1x2048x128xbf16, #tpu.memory_space<vmem>>, vector<1x2048x128xbf16>
    %170 = vector.shape_cast %169 : vector<1x2048x128xbf16> to vector<2048x128xbf16>
    %cst_84 = arith.constant dense<0.000000e+00> : vector<16x128xf32>
    %171 = tpu.matmul %168, %170, %cst_84 {dimension_numbers = #tpu.dot_dimension_numbers<[1], [0], [0], [1], [0, 0, 1, 1], [], []>} : vector<16x2048xbf16>, vector<2048x128xbf16>, vector<16x128xf32> -> vector<16x128xf32>
    %c0_85 = arith.constant 0 : index
    %c0_86 = arith.constant 0 : index
    %c0_87 = arith.constant 0 : index
    %172 = vector.load %arg14[%c0_85, %c0_86, %c0_87] : memref<1x1x128xf32, #tpu.memory_space<vmem>>, vector<1x1x128xf32>
    %173 = vector.shape_cast %172 : vector<1x1x128xf32> to vector<1x128xf32>
    %174 = vector.broadcast %173 : vector<1x128xf32> to vector<16x128xf32>
    %175 = arith.addf %171, %174 : vector<16x128xf32>
    %176 = arith.addf %132, %175 : vector<16x128xf32>
    %c0_88 = arith.constant 0 : index
    %c0_89 = arith.constant 0 : index
    %177 = vector.load %arg17[%c0_88, %c0_89] : memref<16x128xf32, #tpu.memory_space<vmem>>, vector<16x128xf32>
    tpu.vector_store %arg17[%c0_88, %c0_89], %176 {strides = array<i32>} : memref<16x128xf32, #tpu.memory_space<vmem>>, vector<16x128xf32>,
    %c0_90 = arith.constant 0 : index
    %c0_91 = arith.constant 0 : index
    %178 = vector.load %arg16[%c0_90, %c0_91] : memref<16x128xf32, #tpu.memory_space<vmem>>, vector<16x128xf32>
    tpu.vector_store %arg16[%c0_90, %c0_91], %176 {strides = array<i32>} : memref<16x128xf32, #tpu.memory_space<vmem>>, vector<16x128xf32>,
    %c5_i32 = arith.constant 5 : i32
    %179 = arith.cmpi eq, %arg0, %c5_i32 : i32
    %180 = arith.extui %179 : i1 to i32
    %c0_i32_92 = arith.constant 0 : i32
    %181 = arith.cmpi ne, %180, %c0_i32_92 : i32
    scf.if %181 {
      %c0_93 = arith.constant 0 : index
      %c0_94 = arith.constant 0 : index
      %182 = vector.load %arg15[%c0_93, %c0_94] : memref<2x128xf32, #tpu.memory_space<vmem>>, vector<2x128xf32>
      %183 = vector.extract_strided_slice %182 {offsets = [0, 0], sizes = [1, 128], strides = [1, 1]} : vector<2x128xf32> to vector<1x128xf32>
      %184 = vector.extract_strided_slice %182 {offsets = [1, 0], sizes = [1, 128], strides = [1, 1]} : vector<2x128xf32> to vector<1x128xf32>
      %cst_95 = arith.constant dense<0.000000e+00> : vector<16xf32>
      %185 = vector.multi_reduction <add>, %176, %cst_95 [1] : vector<16x128xf32> to vector<16xf32>
      %186 = vector.shape_cast %185 : vector<16xf32> to vector<16x1xf32>
      %cst_96 = arith.constant 2.000000e-02 : f32
      %187 = vector.broadcast %cst_96 : f32 to vector<16x1xf32>
      %188 = arith.mulf %186, %187 : vector<16x1xf32>
      %189 = vector.broadcast %188 : vector<16x1xf32> to vector<16x128xf32>
      %190 = arith.subf %176, %189 : vector<16x128xf32>
      %191 = vector.broadcast %8 : vector<1x128xf32> to vector<16x128xf32>
      %192 = arith.mulf %190, %191 : vector<16x128xf32>
      %193 = arith.mulf %192, %192 : vector<16x128xf32>
      %cst_97 = arith.constant dense<0.000000e+00> : vector<16xf32>
      %194 = vector.multi_reduction <add>, %193, %cst_97 [1] : vector<16x128xf32> to vector<16xf32>
      %195 = vector.shape_cast %194 : vector<16xf32> to vector<16x1xf32>
      %cst_98 = arith.constant 0.0204081628 : f32
      %196 = vector.broadcast %cst_98 : f32 to vector<16x1xf32>
      %197 = arith.mulf %195, %196 : vector<16x1xf32>
      %198 = math.sqrt %197 : vector<16x1xf32>
      %cst_99 = arith.constant 9.99999997E-7 : f32
      %199 = vector.broadcast %cst_99 : f32 to vector<16x1xf32>
      %200 = arith.addf %198, %199 : vector<16x1xf32>
      %201 = tpu.reciprocal %200 {approx = true} : vector<16x1xf32> -> vector<16x1xf32>
      %202 = vector.broadcast %183 : vector<1x128xf32> to vector<16x128xf32>
      %203 = arith.mulf %202, %192 : vector<16x128xf32>
      %204 = vector.broadcast %201 : vector<16x1xf32> to vector<16x128xf32>
      %205 = arith.mulf %203, %204 : vector<16x128xf32>
      %206 = vector.broadcast %184 : vector<1x128xf32> to vector<16x128xf32>
      %207 = arith.addf %205, %206 : vector<16x128xf32>
      %c0_100 = arith.constant 0 : index
      %c0_101 = arith.constant 0 : index
      %208 = vector.load %arg16[%c0_100, %c0_101] : memref<16x128xf32, #tpu.memory_space<vmem>>, vector<16x128xf32>
      tpu.vector_store %arg16[%c0_100, %c0_101], %207 {strides = array<i32>} : memref<16x128xf32, #tpu.memory_space<vmem>>, vector<16x128xf32>,
    } else {
    }
    return
  }
  func.func @transform_0(%arg0: i32) -> (i32, i32) {
    %c0_i32 = arith.constant 0 : i32
    %c0_i32_0 = arith.constant 0 : i32
    %c0_i32_1 = arith.constant 0 : i32
    return %c0_i32, %c0_i32_0 : i32, i32
  }
  func.func @transform_1(%arg0: i32) -> (i32, i32) {
    %c0_i32 = arith.constant 0 : i32
    %c0_i32_0 = arith.constant 0 : i32
    %c0_i32_1 = arith.constant 0 : i32
    return %c0_i32, %c0_i32_0 : i32, i32
  }
  func.func @transform_2(%arg0: i32) -> (i32, i32, i32) {
    %c0_i32 = arith.constant 0 : i32
    %c0_i32_0 = arith.constant 0 : i32
    %c0_i32_1 = arith.constant 0 : i32
    %c0_i32_2 = arith.constant 0 : i32
    return %c0_i32, %c0_i32_0, %c0_i32_1 : i32, i32, i32
  }
  func.func @transform_3(%arg0: i32) -> (i32, i32, i32) {
    %c0_i32 = arith.constant 0 : i32
    %c0_i32_0 = arith.constant 0 : i32
    %c0_i32_1 = arith.constant 0 : i32
    return %arg0, %c0_i32, %c0_i32_0 : i32, i32, i32
  }
  func.func @transform_4(%arg0: i32) -> (i32, i32, i32, i32) {
    %c0_i32 = arith.constant 0 : i32
    %c0_i32_0 = arith.constant 0 : i32
    %c0_i32_1 = arith.constant 0 : i32
    %c0_i32_2 = arith.constant 0 : i32
    return %arg0, %c0_i32, %c0_i32_0, %c0_i32_1 : i32, i32, i32, i32
  }
  func.func @transform_5(%arg0: i32) -> (i32, i32, i32, i32) {
    %c0_i32 = arith.constant 0 : i32
    %c0_i32_0 = arith.constant 0 : i32
    %c0_i32_1 = arith.constant 0 : i32
    %c0_i32_2 = arith.constant 0 : i32
    return %arg0, %c0_i32, %c0_i32_0, %c0_i32_1 : i32, i32, i32, i32
  }
  func.func @transform_6(%arg0: i32) -> (i32, i32, i32, i32) {
    %c0_i32 = arith.constant 0 : i32
    %c0_i32_0 = arith.constant 0 : i32
    %c0_i32_1 = arith.constant 0 : i32
    %c0_i32_2 = arith.constant 0 : i32
    return %arg0, %c0_i32, %c0_i32_0, %c0_i32_1 : i32, i32, i32, i32
  }
  func.func @transform_7(%arg0: i32) -> (i32, i32, i32, i32) {
    %c0_i32 = arith.constant 0 : i32
    %c0_i32_0 = arith.constant 0 : i32
    %c0_i32_1 = arith.constant 0 : i32
    %c0_i32_2 = arith.constant 0 : i32
    return %arg0, %c0_i32, %c0_i32_0, %c0_i32_1 : i32, i32, i32, i32
  }
  func.func @transform_8(%arg0: i32) -> (i32, i32, i32, i32) {
    %c0_i32 = arith.constant 0 : i32
    %c0_i32_0 = arith.constant 0 : i32
    %c0_i32_1 = arith.constant 0 : i32
    %c0_i32_2 = arith.constant 0 : i32
    return %arg0, %c0_i32, %c0_i32_0, %c0_i32_1 : i32, i32, i32, i32
  }
  func.func @transform_9(%arg0: i32) -> (i32, i32, i32) {
    %c0_i32 = arith.constant 0 : i32
    %c0_i32_0 = arith.constant 0 : i32
    %c0_i32_1 = arith.constant 0 : i32
    return %arg0, %c0_i32, %c0_i32_0 : i32, i32, i32
  }
  func.func @transform_10(%arg0: i32) -> (i32, i32, i32) {
    %c0_i32 = arith.constant 0 : i32
    %c0_i32_0 = arith.constant 0 : i32
    %c0_i32_1 = arith.constant 0 : i32
    return %arg0, %c0_i32, %c0_i32_0 : i32, i32, i32
  }
  func.func @transform_11(%arg0: i32) -> (i32, i32, i32) {
    %c0_i32 = arith.constant 0 : i32
    %c0_i32_0 = arith.constant 0 : i32
    %c0_i32_1 = arith.constant 0 : i32
    return %arg0, %c0_i32, %c0_i32_0 : i32, i32, i32
  }
  func.func @transform_12(%arg0: i32) -> (i32, i32, i32) {
    %c0_i32 = arith.constant 0 : i32
    %c0_i32_0 = arith.constant 0 : i32
    %c0_i32_1 = arith.constant 0 : i32
    return %arg0, %c0_i32, %c0_i32_0 : i32, i32, i32
  }
  func.func @transform_13(%arg0: i32) -> (i32, i32, i32) {
    %c0_i32 = arith.constant 0 : i32
    %c0_i32_0 = arith.constant 0 : i32
    %c0_i32_1 = arith.constant 0 : i32
    return %arg0, %c0_i32, %c0_i32_0 : i32, i32, i32
  }
  func.func @transform_14(%arg0: i32) -> (i32, i32) {
    %c0_i32 = arith.constant 0 : i32
    %c0_i32_0 = arith.constant 0 : i32
    %c0_i32_1 = arith.constant 0 : i32
    return %c0_i32, %c0_i32_0 : i32, i32
  }
  func.func @transform_15(%arg0: i32) -> (i32, i32) {
    %c0_i32 = arith.constant 0 : i32
    %c0_i32_0 = arith.constant 0 : i32
    %c0_i32_1 = arith.constant 0 : i32
    return %c0_i32, %c0_i32_0 : i32, i32
  }
}

</mosaic_0001>

<bundles_post_ra>
// kernel: tpu_custom_call.1
= control target key start
LH: loop header
LB: loop body
LE: loop exit
PB: predicated region body
PF: predicated region fallthrough
CT: control target
= control target key end

     0   :  { %s8984_s0 = inlined_call_operand.hbm [shape: f32[16,128], index: 0, kind: input, shape index: {}]   ;;  %s8985_s1 = inlined_call_operand.hbm [shape: f32[16,128], index: 1, kind: input, shape index: {}]   ;;  %s8986_s2 = inlined_call_operand.hbm [shape: f32[2,1,8], index: 2, kind: input, shape index: {}]   ;;  %s8987_s3 = inlined_call_operand.hbm [shape: f32[6,4,128], index: 3, kind: input, shape index: {}]   ;;  %s8988_s4 = inlined_call_operand.hbm [shape: f32[6,2,128,128], index: 4, kind: input, shape index: {}]   ;;  %s8989_s5 = inlined_call_operand.hbm [shape: f32[6,2,128,128], index: 5, kind: input, shape index: {}]   ;;  %s8990_s6 = inlined_call_operand.hbm [shape: f32[6,2,128,128], index: 6, kind: input, shape index: {}]   ;;  %s8991_s7 = inlined_call_operand.hbm [shape: f32[6,2,128,128], index: 7, kind: input, shape index: {}]   ;;  %s8992_s8 = inlined_call_operand.hbm [shape: f32[6,3,2,128], index: 8, kind: input, shape index: {}]   ;;  %s8993_s9 = inlined_call_operand.hbm [shape: f32[6,1,128], index: 9, kind: input, shape index: {}]   ;;  %s8994_s10 = inlined_call_operand.hbm [shape: bf16[6,128,2048], index: 10, kind: input, shape index: {}]   ;;  %s8995_s11 = inlined_call_operand.hbm [shape: f32[6,1,2048], index: 11, kind: input, shape index: {}]   ;;  %s8996_s12 = inlined_call_operand.hbm [shape: bf16[6,2048,128], index: 12, kind: input, shape index: {}]   ;;  %s8997_s13 = inlined_call_operand.hbm [shape: f32[6,1,128], index: 13, kind: input, shape index: {}]   ;;  %s8998_s14 = inlined_call_operand.hbm [shape: f32[2,128], index: 14, kind: input, shape index: {}]   ;;  %s8999_s15 = inlined_call_operand.hbm [shape: f32[16,128], index: 15, kind: output, shape index: {}]  }
   0x1   :  { %9035 = sst [smem:[#allocation45_spill]] %s8985_s1 }
   0x2   :  { %9036 = sst [smem:[#allocation46_spill]] %s8987_s3 }
   0x3   :  { %9037 = sst [smem:[#allocation47_spill]] %s8989_s5 }
   0x4   :  { %9038 = sst [smem:[#allocation48_spill]] %s8990_s6 }
   0x5   :  { %9039 = sst [smem:[#allocation49_spill]] %s8991_s7 }
   0x6   :  { %9040 = sst [smem:[#allocation50_spill]] %s8992_s8 }
   0x7   :  { %9041 = sst [smem:[#allocation51_spill]] %s8993_s9 }
   0x8   :  { %9042 = sst [smem:[#allocation52_spill]] %s8994_s10 }
   0x9   :  { %9043 = sst [smem:[#allocation53_spill]] %s8996_s12 }
   0xa   :  { %9044 = sst [smem:[#allocation54_spill]] %s8998_s14 }
   0xb   :  { %9045 = sst [smem:[#allocation55_spill]] %s8999_s15 }
   0xc   :  { %20 = vsyncpa [#allocation4], 0 }
   0xd   :  { %21 = vsyncpa [#allocation7], 0 }
   0xe   :  { %22 = vsyncpa [#allocation10], 0 }
   0xf   :  { %24 = vsyncpa [#allocation10 + $0x1], 0 }
  0x10   :  { %25 = vsyncpa [#allocation13], 0 }
  0x11   :  { %27 = vsyncpa [#allocation13 + $0x1], 0 }
  0x12   :  { %28 = vsyncpa [#allocation16], 0 }
  0x13   :  { %30 = vsyncpa [#allocation16 + $0x1], 0 }
  0x14   :  { %31 = vsyncpa [#allocation19], 0 }
  0x15   :  { %33 = vsyncpa [#allocation19 + $0x1], 0 }
  0x16   :  { %34 = vsyncpa [#allocation22], 0 }
  0x17   :  { %36 = vsyncpa [#allocation22 + $0x1], 0 }
  0x18   :  { %37 = vsyncpa [#allocation25], 0 }
  0x19   :  { %39 = vsyncpa [#allocation25 + $0x1], 0 }
  0x1a   :  { %40 = vsyncpa [#allocation5], 0  ;;  %s7709_s18 = smov 0   ;;  %s7711_s19 = smov 0  }
  0x1b   :  { %s7713_s20 = smov 0   ;;  %s7715_s21 = smov 0  }
  0x1c LB: > { %9046 = sst [smem:[#allocation38_spill]] %s7589_s19  ;;  %s7728_s22 = sadd.s32 4294967295, %s7597_s21   ;;  %s7597_s21 = sphi %s7715_s21, %s9099_s21   ;;  %s7593_s20 = sphi %s7713_s20, %s9102_s20   ;;  %s7589_s19 = sphi %s7711_s19, %s9101_s19   ;;  %s7585_s18 = sphi %s7709_s18, %s9100_s18  }
  0x1d   : > { %9047 = sst [smem:[#allocation39_spill]] %s7593_s20  ;;  %s7731_s23 = sadd.s32 1, %s7597_s21  }
  0x1e   : > { %9048 = sst [smem:[#allocation40_spill]] %s7728_s22  ;;  %s113_s24 = ssub.s32 %s7597_s21, %s7731_s23 }
  0x1f   : > { %9049 = sst [smem:[#allocation41_spill]] %s7731_s23  ;;  %s116_s25 = sadd.s32 1, %s7593_s20 }
  0x20   : > { %p114_p0 = scmp.eq.s32.totalorder %s113_s24, 0  ;;  %p123_p1 = scmp.ne.s32.totalorder %s7593_s20, %s7589_s19 }
  0x21   : > { %p124_p2 = scmp.eq.s32.totalorder %s7597_s21, 0  ;;  %p129_p3 = scmp.ne.s32.totalorder %s7589_s19, %s7585_s18 }
  0x22   : > { %s7741_s26 = scalar_select %p114_p0, %s7593_s20, %s116_s25  }
  0x23   : > { %p7743_p4 = por %p124_p2, %p123_p1  ;;  %p9006_p5 = scmp.eq.s32.totalorder %s7728_s22, 0 }
  0x24   : > { %9050 = sst [smem:[#allocation42_spill]] %s7741_s26  ;;  %p5433_p6 = scmp.ge.s32.totalorder %s7597_s21, 1 }
  0x25   : > { %p442_p7 = scmp.lt.s32.totalorder %s7597_s21, 7  ;;  %p7752_p8 = por %p9006_p5, %p129_p3 }
  0x26   : > { %s7599_s30 = smov [#allocation6]   ;;  %p6830_p13 = scmp.lt.s32.totalorder %s7597_s21, 6 }
  0x27   : > { %s9052_s28 = scalar_select %p7752_p8, 1, 0 }
  0x28   : > { %p7757_p10 = pnand %p5433_p6, %p442_p7  ;;  %s467_s16 = sshll.u32 %s7599_s30, 4  ;;  %s468_s16 = int_to_ptr.vmem [resolvable:$true] %s467_s16 }
  0x29   : > { %9053 = sst [smem:[#allocation43_spill]] %s9052_s28  ;;  %s7771_s18 = sand.u32 1, %s7597_s21  }
  0x2a   : > { %s9054_s29 = scalar_select %p7757_p10, 1, 0 }
  0x2b   : > { %p6779_p11 = pneg %p7757_p10  ;;  %p7775_p0 = pnand %p6830_p13, %p7743_p4 }
  0x2c   : > { %9055 = sst [smem:[#allocation44_spill]] %s9054_s29  ;;  %s9058_s1 = sld [smem:[#allocation45_spill]] }
  0x2d   : > { %p7765_p12 = pnand %p6779_p11, %p9006_p5 }
  0x2e   : > { %s9057_s24 = scalar_select %p7775_p0, 1, 0 }
  0x2f   : > { %s9056_s17 = scalar_select %p7765_p12, 1, 0 }
  0x30   : > { %p7787_p2 = pneg %p7765_p12 }
  0x32   : > { %s7059_s23 = scalar_lea.hbm %s9058_s1, 256 }
  0x33   : > { %p7060_p1 = scmp.ne.s32.totalorder %s9058_s1, %s7059_s23  ;;  %p7066_p6 = scmp.lt.u32.totalorder %s7059_s23, %s9058_s1 }
  0x34   : > { %s9059_s28 = scalar_select %p7787_p2, 1, 0 }
  0x35   : > { %p7062_p3 = pnand %p7787_p2, %p7060_p1 }
  0x37   : > { %p7063_p4 = pneg %p7062_p3 }
  0x39   : > { %p7068_p7 = pnand %p7066_p6, %p7063_p4 }
  0x3b   : > { %7071 = shalt.err (!%p7068_p7)
}
  0x3c   : > { %s7072_s26 = scalar_lea.vmem %s468_s16, 256  ;;  %p7080_p5 = scmp.lt.s32.totalorder %s468_s16, %s468_s16 }
  0x3d   : > { %p7073_p11 = scmp.ne.s32.totalorder %s468_s16, %s7072_s26  ;;  %p7081_p8 = scmp.lt.s32.totalorder %s7072_s26, %s7072_s26 }
  0x3f   : > { %p7075_p13 = pnand %p7073_p11, %p7787_p2  ;;  %p7082_p10 = por %p7081_p8, %p7080_p5 }
  0x41   : > { %p7076_p9 = pneg %p7075_p13 }
  0x43   : > { %p7083_p0 = pnand %p7082_p10, %p7076_p9 }
  0x45   : > { %7086 = shalt.err (!%p7083_p0)
}
  0x46   : > { %s9018_s15 = smov 128   ;;  %s9020_s25 = smov 8  }
  0x47   : > { %6785 = dma.hbm_to_vmem [thread:$0]  (!%p7765_p12), %s9058_s1, 256, %s468_s16, [#allocation7], %s9018_s15, %s9018_s15, %s9020_s25  }
  0x48   : > { %s7602_s30 = smov [#allocation26]   ;;  %s9060_s14 = sld [smem:[#allocation54_spill]] }
  0x49   : > { %s494_s27 = sshll.u32 %s7602_s30, 4  ;;  %s495_s27 = int_to_ptr.vmem [resolvable:$true] %s494_s27 }
  0x4e   : > { %s7087_s29 = scalar_lea.hbm %s9060_s14, 32 }
  0x4f   : > { %p7088_p5 = scmp.ne.s32.totalorder %s9060_s14, %s7087_s29  ;;  %p7094_p10 = scmp.lt.u32.totalorder %s7087_s29, %s9060_s14 }
  0x51   : > { %p7090_p8 = pnand %p7088_p5, %p7787_p2 }
  0x53   : > { %p7091_p9 = pneg %p7090_p8 }
  0x55   : > { %p7096_p0 = pnand %p7094_p10, %p7091_p9 }
  0x57   : > { %7099 = shalt.err (!%p7096_p0)
}
  0x58   : > { %s7100_s16 = scalar_lea.vmem %s495_s27, 32  ;;  %p7108_p6 = scmp.lt.s32.totalorder %s495_s27, %s495_s27 }
  0x59   : > { %p7101_p1 = scmp.ne.s32.totalorder %s495_s27, %s7100_s16  ;;  %p7109_p7 = scmp.lt.s32.totalorder %s7100_s16, %s7100_s16 }
  0x5b   : > { %p7103_p3 = pnand %p7101_p1, %p7787_p2  ;;  %p7110_p11 = por %p7109_p7, %p7108_p6 }
  0x5d   : > { %p7104_p4 = pneg %p7103_p3 }
  0x5f   : > { %p7111_p13 = pnand %p7110_p11, %p7104_p4 }
  0x61   : > { %7114 = shalt.err (!%p7111_p13)
}
  0x62   : > { %6791 = dma.hbm_to_vmem [thread:$0]  (!%p7765_p12), %s9060_s14, 32, %s495_s27, [#allocation25]  }
  0x63   : > { %s7825_s6 = sand.u32 1, %s7593_s20   ;;  %s5440_s8 = sshll.u32 %s7597_s21, 6 }
  0x64   : > { %s5439_s22 = sshll.u32 %s7825_s6, 2  ;;  %s9061_s3 = sld [smem:[#allocation46_spill]] }
  0x65   : > { %s7835_s30 = sshll.u32 %s7825_s6, 8  ;;  %s509_s26 = scalar_lea.vmem [#allocation9], %s5439_s22 }
  0x66   : > { %s516_s16 = sshll.u32 %s509_s26, 4  ;;  %s7838_s27 = sshll.u32 %s7597_s21, 12  ;;  %s7840_s16 = int_to_ptr.vmem [resolvable:$true] %s516_s16 }
  0x67   : > { %s9026_s10 = scalar_lea.sflag [#allocation10], %s7771_s18  ;;  %p9062_p8 = scmp.ne.s32.totalorder %s9057_s24, 0 }
  0x69   : > { %p7847_p9 = pneg %p9062_p8 }
  0x6a   : > { %s7832_s23 = scalar_lea.hbm %s9061_s3, %s5440_s8  ;;  %s7120_s22 = scalar_lea.hbm %s9061_s3, 384 }
  0x6b   : > { %s7115_s12 = scalar_lea.hbm %s7832_s23, 64  ;;  %p7121_p1 = scmp.lt.u32.totalorder %s7832_s23, %s9061_s3 }
  0x6c   : > { %p7116_p5 = scmp.ne.s32.totalorder %s7832_s23, %s7115_s12  ;;  %p7122_p3 = scmp.lt.u32.totalorder %s7120_s22, %s7115_s12 }
  0x6d   : > { %s9063_s29 = scalar_select %p7847_p9, 1, 0 }
  0x6e   : > { %p7118_p10 = pnand %p7847_p9, %p7116_p5  ;;  %p7123_p4 = por %p7122_p3, %p7121_p1 }
  0x6f   : > { %p7124_p6 = scmp.lt.u32.totalorder %s7115_s12, %s7832_s23 }
  0x70   : > { %p7119_p0 = pneg %p7118_p10 }
  0x71   : > { %p7125_p7 = por %p7124_p6, %p7123_p4 }
  0x73   : > { %p7126_p11 = pnand %p7125_p7, %p7119_p0 }
  0x75   : > { %7129 = shalt.err (!%p7126_p11)
}
  0x76   : > { %s7130_s25 = scalar_lea.vmem %s7840_s16, 64  ;;  %s7603_s8 = smov [#allocation9]  }
  0x77   : > { %p7131_p13 = scmp.ne.s32.totalorder %s7840_s16, %s7130_s25  ;;  %s7135_s19 = sshll.u32 %s7603_s8, 4  ;;  %s7136_s19 = int_to_ptr.vmem [resolvable:$false] %s7135_s19 }
  0x78   : > { %s7137_s15 = scalar_lea.vmem %s7136_s19, 128  ;;  %p7138_p12 = scmp.lt.s32.totalorder %s7840_s16, %s7136_s19 }
  0x79   : > { %p7133_p5 = pnand %p7131_p13, %p7847_p9  ;;  %p7139_p2 = scmp.lt.s32.totalorder %s7137_s15, %s7130_s25 }
  0x7b   : > { %p7134_p10 = pneg %p7133_p5  ;;  %p7140_p1 = por %p7139_p2, %p7138_p12 }
  0x7d   : > { %p7141_p3 = pnand %p7140_p1, %p7134_p10 }
  0x7f   : > { %7144 = shalt.err (!%p7141_p3)
}
  0x80   : > { %6795 = dma.hbm_to_vmem [thread:$0]  (!%p9062_p8), %s7832_s23, 64, %s7840_s16, %s9026_s10  }
  0x81   : > { %s9064_s5 = sld [smem:[#allocation47_spill]]  ;;  %s548_s25 = scalar_lea.vmem [#allocation12], %s7835_s30 }
  0x82   : > { %s555_s8 = sshll.u32 %s548_s25, 4  ;;  %s9027_s19 = scalar_lea.sflag [#allocation13], %s7771_s18  ;;  %s7879_s8 = int_to_ptr.vmem [resolvable:$true] %s555_s8 }
  0x87   : > { %s7876_s26 = scalar_lea.hbm %s9064_s5, %s7838_s27  ;;  %s7150_s12 = scalar_lea.hbm %s9064_s5, 24576 }
  0x88   : > { %s7145_s15 = scalar_lea.hbm %s7876_s26, 4096  ;;  %p7151_p4 = scmp.lt.u32.totalorder %s7876_s26, %s9064_s5 }
  0x89   : > { %p7146_p12 = scmp.ne.s32.totalorder %s7876_s26, %s7145_s15  ;;  %p7152_p6 = scmp.lt.u32.totalorder %s7150_s12, %s7145_s15 }
  0x8a   : > { %p7154_p11 = scmp.lt.u32.totalorder %s7145_s15, %s7876_s26 }
  0x8b   : > { %p7148_p2 = pnand %p7146_p12, %p7847_p9  ;;  %p7153_p7 = por %p7152_p6, %p7151_p4 }
  0x8d   : > { %p7149_p0 = pneg %p7148_p2  ;;  %p7155_p13 = por %p7154_p11, %p7153_p7 }
  0x8f   : > { %p7156_p5 = pnand %p7155_p13, %p7149_p0 }
  0x91   : > { %7159 = shalt.err (!%p7156_p5)
}
  0x92   : > { %s7160_s25 = scalar_lea.vmem %s7879_s8, 4096  ;;  %s7604_s23 = smov [#allocation12]  }
  0x93   : > { %p7161_p10 = scmp.ne.s32.totalorder %s7879_s8, %s7160_s25  ;;  %s7165_s16 = sshll.u32 %s7604_s23, 4  ;;  %s7166_s16 = int_to_ptr.vmem [resolvable:$false] %s7165_s16 }
  0x94   : > { %s7167_s10 = scalar_lea.vmem %s7166_s16, 8192  ;;  %p7168_p12 = scmp.lt.s32.totalorder %s7879_s8, %s7166_s16 }
  0x95   : > { %p7163_p1 = pnand %p7161_p10, %p7847_p9  ;;  %p7169_p2 = scmp.lt.s32.totalorder %s7167_s10, %s7160_s25 }
  0x97   : > { %p7164_p3 = pneg %p7163_p1  ;;  %p7170_p4 = por %p7169_p2, %p7168_p12 }
  0x99   : > { %p7171_p6 = pnand %p7170_p4, %p7164_p3 }
  0x9b   : > { %7174 = shalt.err (!%p7171_p6)
}
  0x9c   : > { %s9065_s15 = smov 8   ;;  %s9066_s12 = smov 128  }
  0x9d   : > { %6801 = dma.hbm_to_vmem [thread:$0]  (!%p9062_p8), %s7876_s26, 4096, %s7879_s8, %s9027_s19, %s9066_s12, %s9066_s12, %s9065_s15  }
  0x9e   : > { %s9067_s7 = sld [smem:[#allocation49_spill]]  ;;  %s590_s16 = scalar_lea.vmem [#allocation15], %s7835_s30 }
  0x9f   : > { %s597_s10 = sshll.u32 %s590_s16, 4  ;;  %s9028_s1 = scalar_lea.sflag [#allocation16], %s7771_s18  ;;  %s7915_s10 = int_to_ptr.vmem [resolvable:$true] %s597_s10 }
  0xa4   : > { %s7912_s25 = scalar_lea.hbm %s9067_s7, %s7838_s27  ;;  %s7180_s22 = scalar_lea.hbm %s9067_s7, 24576 }
  0xa5   : > { %s7175_s3 = scalar_lea.hbm %s7912_s25, 4096  ;;  %p7181_p13 = scmp.lt.u32.totalorder %s7912_s25, %s9067_s7 }
  0xa6   : > { %p7176_p0 = scmp.ne.s32.totalorder %s7912_s25, %s7175_s3  ;;  %p7182_p5 = scmp.lt.u32.totalorder %s7180_s22, %s7175_s3 }
  0xa7   : > { %p7184_p1 = scmp.lt.u32.totalorder %s7175_s3, %s7912_s25 }
  0xa8   : > { %p7178_p7 = pnand %p7176_p0, %p7847_p9  ;;  %p7183_p10 = por %p7182_p5, %p7181_p13 }
  0xaa   : > { %p7179_p11 = pneg %p7178_p7  ;;  %p7185_p3 = por %p7184_p1, %p7183_p10 }
  0xac   : > { %p7186_p12 = pnand %p7185_p3, %p7179_p11 }
  0xae   : > { %7189 = shalt.err (!%p7186_p12)
}
  0xaf   : > { %s7190_s16 = scalar_lea.vmem %s7915_s10, 4096  ;;  %s7605_s26 = smov [#allocation15]  }
  0xb0   : > { %p7191_p2 = scmp.ne.s32.totalorder %s7915_s10, %s7190_s16  ;;  %s7195_s8 = sshll.u32 %s7605_s26, 4  ;;  %s7196_s8 = int_to_ptr.vmem [resolvable:$false] %s7195_s8 }
  0xb1   : > { %s7197_s19 = scalar_lea.vmem %s7196_s8, 8192  ;;  %p7198_p0 = scmp.lt.s32.totalorder %s7915_s10, %s7196_s8 }
  0xb2   : > { %p7193_p4 = pnand %p7191_p2, %p7847_p9  ;;  %p7199_p7 = scmp.lt.s32.totalorder %s7197_s19, %s7190_s16 }
  0xb4   : > { %p7194_p6 = pneg %p7193_p4  ;;  %p7200_p13 = por %p7199_p7, %p7198_p0 }
  0xb6   : > { %p7201_p5 = pnand %p7200_p13, %p7194_p6 }
  0xb8   : > { %7204 = shalt.err (!%p7201_p5)
}
  0xb9   : > { %6807 = dma.hbm_to_vmem [thread:$0]  (!%p9062_p8), %s7912_s25, 4096, %s7915_s10, %s9028_s1, %s9066_s12, %s9066_s12, %s9065_s15  }
  0xba   : > { %s5454_s3 = sshll.u32 %s7597_s21, 4  ;;  %s9068_s9 = sld [smem:[#allocation51_spill]] }
  0xbb   : > { %s631_s26 = scalar_lea.vmem [#allocation18], %s7825_s6  ;;  %s7956_s7 = scalar_lea.hbm %s8997_s13, %s5454_s3 }
  0xbc   : > { %s638_s8 = sshll.u32 %s631_s26, 4  ;;  %s9031_s25 = scalar_lea.sflag [#allocation19], %s7771_s18  ;;  %s7951_s8 = int_to_ptr.vmem [resolvable:$true] %s638_s8 }
  0xc0   : > { %s7948_s16 = scalar_lea.hbm %s9068_s9, %s5454_s3  ;;  %s7210_s1 = scalar_lea.hbm %s9068_s9, 96 }
  0xc1   : > { %s7205_s10 = scalar_lea.hbm %s7948_s16, 16  ;;  %p7211_p3 = scmp.lt.u32.totalorder %s7948_s16, %s9068_s9 }
  0xc2   : > { %p7206_p11 = scmp.ne.s32.totalorder %s7948_s16, %s7205_s10  ;;  %p7212_p12 = scmp.lt.u32.totalorder %s7210_s1, %s7205_s10 }
  0xc3   : > { %p7214_p4 = scmp.lt.u32.totalorder %s7205_s10, %s7948_s16 }
  0xc4   : > { %p7208_p10 = pnand %p7206_p11, %p7847_p9  ;;  %p7213_p2 = por %p7212_p12, %p7211_p3 }
  0xc6   : > { %p7209_p1 = pneg %p7208_p10  ;;  %p7215_p6 = por %p7214_p4, %p7213_p2 }
  0xc8   : > { %p7216_p0 = pnand %p7215_p6, %p7209_p1 }
  0xca   : > { %7219 = shalt.err (!%p7216_p0)
}
  0xcb   : > { %s7220_s5 = scalar_lea.vmem %s7951_s8, 16  ;;  %s7606_s3 = smov [#allocation18]  }
  0xcc   : > { %p7221_p7 = scmp.ne.s32.totalorder %s7951_s8, %s7220_s5  ;;  %s7225_s26 = sshll.u32 %s7606_s3, 4  ;;  %s7226_s26 = int_to_ptr.vmem [resolvable:$false] %s7225_s26 }
  0xcd   : > { %s7227_s14 = scalar_lea.vmem %s7226_s26, 32  ;;  %p7228_p11 = scmp.lt.s32.totalorder %s7951_s8, %s7226_s26 }
  0xce   : > { %p7223_p13 = pnand %p7221_p7, %p7847_p9  ;;  %p7229_p10 = scmp.lt.s32.totalorder %s7227_s14, %s7220_s5 }
  0xd0   : > { %p7224_p5 = pneg %p7223_p13  ;;  %p7230_p3 = por %p7229_p10, %p7228_p11 }
  0xd2   : > { %p7231_p12 = pnand %p7230_p3, %p7224_p5 }
  0xd4   : > { %7234 = shalt.err (!%p7231_p12)
}
  0xd5   : > { %6813 = dma.hbm_to_vmem [thread:$0]  (!%p9062_p8), %s7948_s16, 16, %s7951_s8, %s9031_s25  }
  0xd6   : > { %s5458_s1 = sshll.u32 %s7825_s6, 4  ;;  %s5818_s20 = sshll.u32 %s7597_s21, 8 }
  0xd7   : > { %s7987_s22 = scalar_lea.hbm %s8995_s11, %s5818_s20  ;;  %s670_s23 = scalar_lea.vmem [#allocation21], %s5458_s1 }
  0xd8   : > { %s678_s5 = sshll.u32 %s670_s23, 4  ;;  %s667_s3 = scalar_lea.sflag [#allocation22], %s7771_s18  ;;  %s679_s5 = int_to_ptr.vmem [resolvable:$true] %s678_s5 }
  0xd9   : > { %s7235_s26 = scalar_lea.hbm %s7987_s22, 256  ;;  %s7240_s14 = scalar_lea.hbm %s8995_s11, 1536 }
  0xda   : > { %p7236_p1 = scmp.ne.s32.totalorder %s7987_s22, %s7235_s26  ;;  %p7241_p6 = scmp.lt.u32.totalorder %s7987_s22, %s8995_s11 }
  0xdb   : > { %p7242_p0 = scmp.lt.u32.totalorder %s7240_s14, %s7235_s26  ;;  %p7244_p13 = scmp.lt.u32.totalorder %s7235_s26, %s7987_s22 }
  0xdc   : > { %p7238_p2 = pnand %p7236_p1, %p7847_p9 }
  0xdd   : > { %p7243_p7 = por %p7242_p0, %p7241_p6 }
  0xde   : > { %p7239_p4 = pneg %p7238_p2 }
  0xdf   : > { %p7245_p5 = por %p7244_p13, %p7243_p7 }
  0xe1   : > { %p7246_p11 = pnand %p7245_p5, %p7239_p4 }
  0xe3   : > { %7249 = shalt.err (!%p7246_p11)
}
  0xe4   : > { %s7250_s1 = scalar_lea.vmem %s679_s5, 256  ;;  %s7607_s10 = smov [#allocation21]  }
  0xe5   : > { %p7251_p10 = scmp.ne.s32.totalorder %s679_s5, %s7250_s1  ;;  %s7255_s23 = sshll.u32 %s7607_s10, 4  ;;  %s7256_s23 = int_to_ptr.vmem [resolvable:$false] %s7255_s23 }
  0xe6   : > { %s7257_s16 = scalar_lea.vmem %s7256_s23, 512  ;;  %p7258_p1 = scmp.lt.s32.totalorder %s679_s5, %s7256_s23 }
  0xe7   : > { %p7253_p3 = pnand %p7251_p10, %p7847_p9  ;;  %p7259_p2 = scmp.lt.s32.totalorder %s7257_s16, %s7250_s1 }
  0xe9   : > { %p7254_p12 = pneg %p7253_p3  ;;  %p7260_p8 = por %p7259_p2, %p7258_p1 }
  0xeb   : > { %p7261_p0 = pnand %p7260_p8, %p7254_p12 }
  0xed   : > { %7264 = shalt.err (!%p7261_p0)
}
  0xee   : > { %p9069_p6 = scmp.ne.s32.totalorder %s9057_s24, 0  ;;  %s7608_s26 = smov [#allocation3]  }
  0xef   : > { %s454_s8 = sshll.u32 %s7608_s26, 4  ;;  %s7609_s14 = smov [#allocation8]   ;;  %s455_s8 = int_to_ptr.vmem [resolvable:$true] %s454_s8 }
  0xf0   : > { %6819 = dma.hbm_to_vmem [thread:$0]  (!%p9069_p6), %s7987_s22, 256, %s679_s5, %s667_s3  }
  0xf1   : > { %s480_s19 = sshll.u32 %s7609_s14, 4  ;;  %s7265_s23 = scalar_lea.hbm %s8984_s0, 256  ;;  %s481_s19 = int_to_ptr.vmem [resolvable:$true] %s480_s19 }
  0xf2   : > { %p7266_p8 = scmp.ne.s32.totalorder %s8984_s0, %s7265_s23  ;;  %p9070_p4 = scmp.ne.s32.totalorder %s9059_s28, 0 }
  0xf3   : > { %p7272_p5 = scmp.lt.u32.totalorder %s7265_s23, %s8984_s0 }
  0xf4   : > { %p7268_p7 = pnand %p7266_p8, %p9070_p4 }
  0xf6   : > { %p7269_p13 = pneg %p7268_p7 }
  0xf8   : > { %p7274_p11 = pnand %p7272_p5, %p7269_p13 }
  0xfa   : > { %7277 = shalt.err (!%p7274_p11)
}
  0xfb   : > { %s7278_s22 = scalar_lea.vmem %s455_s8, 256  ;;  %p7286_p1 = scmp.lt.s32.totalorder %s455_s8, %s455_s8 }
  0xfc   : > { %p7279_p10 = scmp.ne.s32.totalorder %s455_s8, %s7278_s22  ;;  %p7287_p2 = scmp.lt.s32.totalorder %s7278_s22, %s7278_s22 }
  0xfe   : > { %p7281_p3 = pnand %p7279_p10, %p9070_p4  ;;  %p7288_p0 = por %p7287_p2, %p7286_p1 }
 0x100   : > { %p7282_p12 = pneg %p7281_p3 }
 0x102   : > { %p7289_p6 = pnand %p7288_p0, %p7282_p12 }
 0x104   : > { %7292 = shalt.err (!%p7289_p6)
}
 0x105   : > { %p9071_p8 = scmp.ne.s32.totalorder %s9056_s17, 0  ;;  %s7293_s14 = scalar_lea.hbm %s8986_s2, 32 }
 0x106   : > { %p7294_p7 = scmp.ne.s32.totalorder %s8986_s2, %s7293_s14  ;;  %p7300_p5 = scmp.lt.u32.totalorder %s7293_s14, %s8986_s2 }
 0x107   : > { %6782 = dma.hbm_to_vmem [thread:$0]  (!%p9071_p8), %s8984_s0, 256, %s455_s8, [#allocation4], %s9066_s12, %s9066_s12, %s9065_s15  }
 0x108   : > { %p7296_p6 = pnand %p7294_p7, %p9070_p4 }
 0x10a   : > { %p7297_p13 = pneg %p7296_p6 }
 0x10c   : > { %p7302_p11 = pnand %p7300_p5, %p7297_p13 }
 0x10e   : > { %7305 = shalt.err (!%p7302_p11)
}
 0x10f   : > { %s7306_s16 = scalar_lea.vmem %s481_s19, 32  ;;  %p7314_p1 = scmp.lt.s32.totalorder %s481_s19, %s481_s19 }
 0x110   : > { %p7307_p10 = scmp.ne.s32.totalorder %s481_s19, %s7306_s16  ;;  %p7315_p2 = scmp.lt.s32.totalorder %s7306_s16, %s7306_s16 }
 0x112   : > { %p7309_p3 = pnand %p7307_p10, %p9070_p4  ;;  %p7316_p0 = por %p7315_p2, %p7314_p1 }
 0x114   : > { %p7310_p12 = pneg %p7309_p3 }
 0x116   : > { %p7317_p9 = pnand %p7316_p0, %p7310_p12 }
 0x118   : > { %7320 = shalt.err (!%p7317_p9)
}
 0x119   : > { %s7610_s8 = smov 16   ;;  %s7611_s22 = smov 1  }
 0x11a   : > { %6788 = dma.hbm_to_vmem [thread:$0]  (!%p9071_p8), %s8986_s2, 32, %s481_s19, [#allocation7], %s7610_s8, %s7610_s8, %s7611_s22  }
 0x11b   : > { %s8052_s26 = scalar_lea.hbm %s8988_s4, %s7838_s27  ;;  %s527_s14 = scalar_lea.vmem [#allocation11], %s7835_s30 }
 0x11c   : > { %s534_s20 = sshll.u32 %s527_s14, 4  ;;  %s7321_s10 = scalar_lea.hbm %s8052_s26, 4096  ;;  %s8055_s20 = int_to_ptr.vmem [resolvable:$true] %s534_s20 }
 0x11d   : > { %p7322_p9 = scmp.ne.s32.totalorder %s8052_s26, %s7321_s10  ;;  %p9072_p4 = scmp.ne.s32.totalorder %s9063_s29, 0 }
 0x11e   : > { %s7326_s23 = scalar_lea.hbm %s8988_s4, 24576  ;;  %p7327_p8 = scmp.lt.u32.totalorder %s8052_s26, %s8988_s4 }
 0x11f   : > { %p7324_p7 = pnand %p7322_p9, %p9072_p4  ;;  %p7328_p13 = scmp.lt.u32.totalorder %s7326_s23, %s7321_s10 }
 0x120   : > { %p7330_p11 = scmp.lt.u32.totalorder %s7321_s10, %s8052_s26 }
 0x121   : > { %p7325_p6 = pneg %p7324_p7  ;;  %p7329_p5 = por %p7328_p13, %p7327_p8 }
 0x123   : > { %p7331_p10 = por %p7330_p11, %p7329_p5 }
 0x125   : > { %p7332_p3 = pnand %p7331_p10, %p7325_p6 }
 0x127   : > { %7335 = shalt.err (!%p7332_p3)
}
 0x128   : > { %s7336_s8 = scalar_lea.vmem %s8055_s20, 4096  ;;  %s7612_s22 = smov [#allocation11]  }
 0x129   : > { %p7337_p12 = scmp.ne.s32.totalorder %s8055_s20, %s7336_s8  ;;  %s7341_s9 = sshll.u32 %s7612_s22, 4  ;;  %s7342_s9 = int_to_ptr.vmem [resolvable:$false] %s7341_s9 }
 0x12a   : > { %s7343_s25 = scalar_lea.vmem %s7342_s9, 8192  ;;  %p7344_p0 = scmp.lt.s32.totalorder %s8055_s20, %s7342_s9 }
 0x12b   : > { %p7339_p1 = pnand %p7337_p12, %p9072_p4  ;;  %p7345_p9 = scmp.lt.s32.totalorder %s7343_s25, %s7336_s8 }
 0x12d   : > { %p7340_p2 = pneg %p7339_p1  ;;  %p7346_p7 = por %p7345_p9, %p7344_p0 }
 0x12f   : > { %p7347_p8 = pnand %p7346_p7, %p7340_p2 }
 0x131   : > { %7350 = shalt.err (!%p7347_p8)
}
 0x132   : > { %p9073_p6 = scmp.ne.s32.totalorder %s9057_s24, 0  ;;  %s9074_s5 = scalar_lea.sflag [#allocation10], %s7771_s18 }
 0x133   : > { %s9075_s10 = sld [smem:[#allocation48_spill]]  ;;  %s569_s19 = scalar_lea.vmem [#allocation14], %s7835_s30 }
 0x134   : > { %6798 = dma.hbm_to_vmem [thread:$0]  (!%p9073_p6), %s8052_s26, 4096, %s8055_s20, %s9074_s5, %s9066_s12, %s9066_s12, %s9065_s15  }
 0x135   : > { %s576_s23 = sshll.u32 %s569_s19, 4  ;;  %s6734_s1 = smul.u32 6, %s7825_s6  ;;  %s8090_s23 = int_to_ptr.vmem [resolvable:$true] %s576_s23 }
 0x139   : > { %s8087_s17 = scalar_lea.hbm %s9075_s10, %s7838_s27  ;;  %s7356_s8 = scalar_lea.hbm %s9075_s10, 24576 }
 0x13a   : > { %s7351_s16 = scalar_lea.hbm %s8087_s17, 4096  ;;  %p7357_p10 = scmp.lt.u32.totalorder %s8087_s17, %s9075_s10 }
 0x13b   : > { %p7352_p13 = scmp.ne.s32.totalorder %s8087_s17, %s7351_s16  ;;  %p7358_p3 = scmp.lt.u32.totalorder %s7356_s8, %s7351_s16 }
 0x13c   : > { %p7360_p1 = scmp.lt.u32.totalorder %s7351_s16, %s8087_s17 }
 0x13d   : > { %p7354_p5 = pnand %p7352_p13, %p9072_p4  ;;  %p7359_p12 = por %p7358_p3, %p7357_p10 }
 0x13f   : > { %p7355_p11 = pneg %p7354_p5  ;;  %p7361_p2 = por %p7360_p1, %p7359_p12 }
 0x141   : > { %p7362_p0 = pnand %p7361_p2, %p7355_p11 }
 0x143   : > { %7365 = shalt.err (!%p7362_p0)
}
 0x144   : > { %s7366_s30 = scalar_lea.vmem %s8090_s23, 4096  ;;  %s7613_s9 = smov [#allocation14]  }
 0x145   : > { %p7367_p9 = scmp.ne.s32.totalorder %s8090_s23, %s7366_s30  ;;  %s7371_s25 = sshll.u32 %s7613_s9, 4  ;;  %s7372_s25 = int_to_ptr.vmem [resolvable:$false] %s7371_s25 }
 0x146   : > { %s7373_s5 = scalar_lea.vmem %s7372_s25, 8192  ;;  %p7374_p13 = scmp.lt.s32.totalorder %s8090_s23, %s7372_s25 }
 0x147   : > { %p7369_p7 = pnand %p7367_p9, %p9072_p4  ;;  %p7375_p5 = scmp.lt.s32.totalorder %s7373_s5, %s7366_s30 }
 0x149   : > { %p7370_p8 = pneg %p7369_p7  ;;  %p7376_p10 = por %p7375_p5, %p7374_p13 }
 0x14b   : > { %p7377_p3 = pnand %p7376_p10, %p7370_p8 }
 0x14d   : > { %7380 = shalt.err (!%p7377_p3)
}
 0x14e   : > { %s9076_s28 = scalar_lea.sflag [#allocation13], %s7771_s18  ;;  %s6735_s14 = smul.u32 96, %s7597_s21 }
 0x14f   : > { %6804 = dma.hbm_to_vmem [thread:$0]  (!%p9073_p6), %s8087_s17, 4096, %s8090_s23, %s9076_s28, %s9066_s12, %s9066_s12, %s9065_s15  }
 0x150   : > { %s611_s19 = scalar_lea.vmem [#allocation17], %s6734_s1  ;;  %s9077_s8 = sld [smem:[#allocation50_spill]] }
 0x151   : > { %s618_s16 = sshll.u32 %s611_s19, 4  ;;  %s5455_s22 = sshll.u32 %s7825_s6, 10  ;;  %s8127_s16 = int_to_ptr.vmem [resolvable:$true] %s618_s16 }
 0x156   : > { %s8125_s27 = scalar_lea.hbm %s9077_s8, %s6735_s14  ;;  %s7386_s17 = scalar_lea.hbm %s9077_s8, 576 }
 0x157   : > { %s7381_s30 = scalar_lea.hbm %s8125_s27, 96  ;;  %p7387_p2 = scmp.lt.u32.totalorder %s8125_s27, %s9077_s8 }
 0x158   : > { %p7382_p11 = scmp.ne.s32.totalorder %s8125_s27, %s7381_s30  ;;  %p7388_p0 = scmp.lt.u32.totalorder %s7386_s17, %s7381_s30 }
 0x159   : > { %p7390_p7 = scmp.lt.u32.totalorder %s7381_s30, %s8125_s27 }
 0x15a   : > { %p7384_p12 = pnand %p7382_p11, %p9072_p4  ;;  %p7389_p9 = por %p7388_p0, %p7387_p2 }
 0x15c   : > { %p7385_p1 = pneg %p7384_p12  ;;  %p7391_p8 = por %p7390_p7, %p7389_p9 }
 0x15e   : > { %p7392_p13 = pnand %p7391_p8, %p7385_p1 }
 0x160   : > { %7395 = shalt.err (!%p7392_p13)
}
 0x161   : > { %s7396_s9 = scalar_lea.vmem %s8127_s16, 96  ;;  %s7614_s25 = smov [#allocation17]  }
 0x162   : > { %p7397_p5 = scmp.ne.s32.totalorder %s8127_s16, %s7396_s9  ;;  %s7401_s5 = sshll.u32 %s7614_s25, 4  ;;  %s7402_s5 = int_to_ptr.vmem [resolvable:$false] %s7401_s5 }
 0x163   : > { %s7403_s28 = scalar_lea.vmem %s7402_s5, 192  ;;  %p7404_p11 = scmp.lt.s32.totalorder %s8127_s16, %s7402_s5 }
 0x164   : > { %p7399_p10 = pnand %p7397_p5, %p9072_p4  ;;  %p7405_p12 = scmp.lt.s32.totalorder %s7403_s28, %s7396_s9 }
 0x166   : > { %p7400_p3 = pneg %p7399_p10  ;;  %p7406_p2 = por %p7405_p12, %p7404_p11 }
 0x168   : > { %p7407_p0 = pnand %p7406_p2, %p7400_p3 }
 0x16a   : > { %7410 = shalt.err (!%p7407_p0)
}
 0x16b   : > { %s7615_s14 = smov 32   ;;  %s7616_s19 = smov 2  }
 0x16c   : > { %s9078_s26 = scalar_lea.sflag [#allocation16], %s7771_s18  ;;  %s5817_s20 = sshll.u32 %s7597_s21, 14 }
 0x16d   : > { %6810 = dma.hbm_to_vmem [thread:$0]  (!%p9073_p6), %s8125_s27, 96, %s8127_s16, %s9078_s26, %s7615_s14, %s7615_s14, %s7616_s19  }
 0x16e   : > { %s9079_s12 = sld [smem:[#allocation52_spill]]  ;;  %s649_s23 = scalar_lea.vmem [#allocation20], %s5455_s22 }
 0x16f   : > { %s656_s1 = sshll.u32 %s649_s23, 4  ;;  %s8163_s1 = int_to_ptr.vmem [resolvable:$true] %s656_s1 }
 0x174   : > { %s8159_s17 = scalar_lea.hbm %s9079_s12, %s5817_s20  ;;  %s7416_s25 = scalar_lea.hbm %s9079_s12, 98304 }
 0x175   : > { %s7411_s9 = scalar_lea.hbm %s8159_s17, 16384  ;;  %p7417_p8 = scmp.lt.u32.totalorder %s8159_s17, %s9079_s12 }
 0x176   : > { %p7412_p1 = scmp.ne.s32.totalorder %s8159_s17, %s7411_s9  ;;  %p7418_p13 = scmp.lt.u32.totalorder %s7416_s25, %s7411_s9 }
 0x177   : > { %p7420_p10 = scmp.lt.u32.totalorder %s7411_s9, %s8159_s17 }
 0x178   : > { %p7414_p9 = pnand %p7412_p1, %p9072_p4  ;;  %p7419_p5 = por %p7418_p13, %p7417_p8 }
 0x17a   : > { %p7415_p7 = pneg %p7414_p9  ;;  %p7421_p3 = por %p7420_p10, %p7419_p5 }
 0x17c   : > { %p7422_p11 = pnand %p7421_p3, %p7415_p7 }
 0x17e   : > { %7425 = shalt.err (!%p7422_p11)
}
 0x17f   : > { %s7426_s14 = scalar_lea.vmem %s8163_s1, 16384  ;;  %s7617_s19 = smov [#allocation20]  }
 0x180   : > { %p7427_p12 = scmp.ne.s32.totalorder %s8163_s1, %s7426_s14  ;;  %s7431_s26 = sshll.u32 %s7617_s19, 4  ;;  %s7432_s26 = int_to_ptr.vmem [resolvable:$false] %s7431_s26 }
 0x181   : > { %s7433_s30 = scalar_lea.vmem %s7432_s26, 32768  ;;  %p7434_p1 = scmp.lt.s32.totalorder %s8163_s1, %s7432_s26 }
 0x182   : > { %p7429_p2 = pnand %p7427_p12, %p9072_p4  ;;  %p7435_p9 = scmp.lt.s32.totalorder %s7433_s30, %s7426_s14 }
 0x184   : > { %p7430_p0 = pneg %p7429_p2  ;;  %p7436_p8 = por %p7435_p9, %p7434_p1 }
 0x186   : > { %p7437_p13 = pnand %p7436_p8, %p7430_p0 }
 0x188   : > { %7440 = shalt.err (!%p7437_p13)
}
 0x189   : > { %s7618_s15 = smov 1024   ;;  %s7619_s23 = smov 64  }
 0x18a   : > { %s9080_s9 = scalar_lea.sflag [#allocation19], %s7771_s18  ;;  %s9081_s25 = sld [smem:[#allocation53_spill]] }
 0x18b   : > { %6816 = dma.hbm_to_vmem [thread:$0]  (!%p9073_p6), %s8159_s17, 16384, %s8163_s1, %s9080_s9, %s7618_s15, %s7618_s15, %s7619_s23  }
 0x18c   : > { %s689_s28 = scalar_lea.vmem [#allocation23], %s5455_s22 }
 0x18d   : > { %s696_s14 = sshll.u32 %s689_s28, 4  ;;  %s8198_s14 = int_to_ptr.vmem [resolvable:$true] %s696_s14 }
 0x190   : > { %s8194_s5 = scalar_lea.hbm %s9081_s25, %s5817_s20  ;;  %s7446_s1 = scalar_lea.hbm %s9081_s25, 98304 }
 0x191   : > { %s7441_s19 = scalar_lea.hbm %s8194_s5, 16384  ;;  %p7447_p3 = scmp.lt.u32.totalorder %s8194_s5, %s9081_s25 }
 0x192   : > { %p7442_p7 = scmp.ne.s32.totalorder %s8194_s5, %s7441_s19  ;;  %p7448_p11 = scmp.lt.u32.totalorder %s7446_s1, %s7441_s19 }
 0x193   : > { %p7450_p2 = scmp.lt.u32.totalorder %s7441_s19, %s8194_s5 }
 0x194   : > { %p7444_p5 = pnand %p7442_p7, %p9072_p4  ;;  %p7449_p12 = por %p7448_p11, %p7447_p3 }
 0x196   : > { %p7445_p10 = pneg %p7444_p5  ;;  %p7451_p0 = por %p7450_p2, %p7449_p12 }
 0x198   : > { %p7452_p1 = pnand %p7451_p0, %p7445_p10 }
 0x19a   : > { %7455 = shalt.err (!%p7452_p1)
}
 0x19b   : > { %s7456_s22 = scalar_lea.vmem %s8198_s14, 16384  ;;  %s7620_s30 = smov [#allocation23]  }
 0x19c   : > { %p7457_p9 = scmp.ne.s32.totalorder %s8198_s14, %s7456_s22  ;;  %s7461_s15 = sshll.u32 %s7620_s30, 4  ;;  %s7462_s15 = int_to_ptr.vmem [resolvable:$false] %s7461_s15 }
 0x19d   : > { %s7463_s9 = scalar_lea.vmem %s7462_s15, 32768  ;;  %p7464_p7 = scmp.lt.s32.totalorder %s8198_s14, %s7462_s15 }
 0x19e   : > { %p7459_p8 = pnand %p7457_p9, %p9072_p4  ;;  %p7465_p5 = scmp.lt.s32.totalorder %s7463_s9, %s7456_s22 }
 0x1a0   : > { %p7460_p13 = pneg %p7459_p8  ;;  %p7466_p3 = por %p7465_p5, %p7464_p7 }
 0x1a2   : > { %p7467_p11 = pnand %p7466_p3, %p7460_p13 }
 0x1a4   : > { %7470 = shalt.err (!%p7467_p11)
}
 0x1a5   : > { %s7621_s16 = smov 4   ;;  %s709_s27 = scalar_lea.vmem [#allocation24], %s7825_s6 }
 0x1a6   : > { %6822 = dma.hbm_to_vmem [thread:$0]  (!%p9073_p6), %s8194_s5, 16384, %s8198_s14, %s667_s3, %s7619_s23, %s7619_s23, %s7621_s16  }
 0x1a7   : > { %s716_s28 = sshll.u32 %s709_s27, 4  ;;  %s707_s19 = scalar_lea.sflag [#allocation25], %s7771_s18  ;;  %s717_s28 = int_to_ptr.vmem [resolvable:$true] %s716_s28 }
 0x1a8   : > { %s7471_s21 = scalar_lea.hbm %s7956_s7, 16  ;;  %s7476_s20 = scalar_lea.hbm %s8997_s13, 96 }
 0x1a9   : > { %p7472_p10 = scmp.ne.s32.totalorder %s7956_s7, %s7471_s21  ;;  %p7477_p0 = scmp.lt.u32.totalorder %s7956_s7, %s8997_s13 }
 0x1aa   : > { %p7478_p1 = scmp.lt.u32.totalorder %s7476_s20, %s7471_s21  ;;  %p7480_p8 = scmp.lt.u32.totalorder %s7471_s21, %s7956_s7 }
 0x1ab   : > { %p7474_p12 = pnand %p7472_p10, %p9072_p4 }
 0x1ac   : > { %p7479_p9 = por %p7478_p1, %p7477_p0 }
 0x1ad   : > { %p7475_p2 = pneg %p7474_p12 }
 0x1ae   : > { %p7481_p13 = por %p7480_p8, %p7479_p9 }
 0x1b0   : > { %p7482_p7 = pnand %p7481_p13, %p7475_p2 }
 0x1b2   : > { %7485 = shalt.err (!%p7482_p7)
}
 0x1b3   : > { %s7486_s18 = scalar_lea.vmem %s717_s28, 16  ;;  %s7622_s6 = smov [#allocation24]  }
 0x1b4   : > { %p7487_p5 = scmp.ne.s32.totalorder %s717_s28, %s7486_s18  ;;  %s7491_s3 = sshll.u32 %s7622_s6, 4  ;;  %s7492_s3 = int_to_ptr.vmem [resolvable:$false] %s7491_s3 }
 0x1b5   : > { %s7493_s23 = scalar_lea.vmem %s7492_s3, 32  ;;  %p7494_p10 = scmp.lt.s32.totalorder %s717_s28, %s7492_s3 }
 0x1b6   : > { %p7489_p3 = pnand %p7487_p5, %p9072_p4  ;;  %p7495_p12 = scmp.lt.s32.totalorder %s7493_s23, %s7486_s18 }
 0x1b8   : > { %p7490_p11 = pneg %p7489_p3  ;;  %p7496_p6 = por %p7495_p12, %p7494_p10 }
 0x1ba   : > { %p7497_p0 = pnand %p7496_p6, %p7490_p11 }
 0x1bc   : > { %7500 = shalt.err (!%p7497_p0)
}
 0x1bd   : > { %p9082_p1 = scmp.ne.s32.totalorder %s9057_s24, 0  ;;  %s9083_s5 = sld [smem:[#allocation44_spill]] }
 0x1bf   : > { %6825 = dma.hbm_to_vmem [thread:$0]  (!%p9082_p1), %s7956_s7, 16, %s717_s28, %s707_s19  }
 0x1c3   : > { %p9084_p2 = scmp.ne.s32.totalorder %s9083_s5, 0 }
 0x1c4   : > { %s9085_s14 = sld [smem:[#allocation40_spill]] (!%p9084_p2) }
 0x1c5   : > { %725 = sbr.rel (%p9084_p2) target bundleno = 4096 (0x1000), region = 80 }
 0x1ca   : > { %p9086_p9 = scmp.eq.s32.totalorder (!%p9084_p2), %s9085_s14, 0 }
 0x1cc   : > { %7544 = dma.done.wait (%p9086_p9), [#allocation4], 256   ;;  %p9087_p4 = pmov %p9086_p9 }
 0x1ce   : > { %7546 = vsyncadd (%p9087_p4), [#allocation4], 4294967040  ;;  %p9088_p8 = pmov %p9087_p4 }
 0x1cf   : > { %p9089_p13 = pmov %p9087_p4 }
 0x1d0   : > { %7548 = dma.done.wait (%p9088_p8), [#allocation7], 288  }
 0x1d1   : > { %7550 = vsyncadd (%p9089_p13), [#allocation7], 4294967008  ;;  %s9090_s29 = sld [smem:[#allocation38_spill]]  ;;  %s9091_s24 = sld [smem:[#allocation43_spill]] }
 0x1d2   : > { %s8255_s30 = sand.u32 1, %s9085_s14  }
 0x1d3   : > { %s740_s9 = scalar_lea.sflag [#allocation10], %s8255_s30 }
 0x1d7   : > { %s8258_s7 = sand.u32 1, %s9090_s29   ;;  %p9092_p6 = scmp.ne.s32.totalorder %s9091_s24, 0 }
 0x1d8   : > { %s5469_s15 = sshll.u32 %s8258_s7, 2 }
 0x1d9   : > { %s8262_s16 = scalar_lea.vmem [#allocation9], %s5469_s15 }
 0x1da   : > { %7552 = dma.done.wait (%p9092_p6), %s740_s9, 4160  }
 0x1db   : > { %7554 = vsyncadd (%p9092_p6), %s740_s9, 4294963136  ;;  %s5470_s27 = sshll.u32 %s8258_s7, 8  ;;  %s758_s19 = scalar_lea.sflag [#allocation13], %s8255_s30 }
 0x1dc   : > { %s8269_s28 = scalar_lea.vmem [#allocation11], %s5470_s27  ;;  %s8272_s21 = scalar_lea.vmem [#allocation12], %s5470_s27 }
 0x1dd   : > { %7556 = dma.done.wait (%p9092_p6), %s758_s19, 8192  }
 0x1de   : > { %7558 = vsyncadd (%p9092_p6), %s758_s19, 4294959104  ;;  %s8278_s17 = scalar_lea.vmem [#allocation14], %s5470_s27  ;;  %s776_s1 = scalar_lea.sflag [#allocation16], %s8255_s30 }
 0x1df   : > { %s8281_s20 = scalar_lea.vmem [#allocation15], %s5470_s27 }
 0x1e0   : > { %7560 = dma.done.wait (%p9092_p6), %s776_s1, 4192  }
 0x1e1   : > { %7562 = vsyncadd (%p9092_p6), %s776_s1, 4294963104  ;;  %s6736_s26 = smul.u32 6, %s8258_s7  ;;  %s794_s18 = scalar_lea.sflag [#allocation19], %s8255_s30 }
 0x1e2   : > { %s796_s6 = scalar_lea.vmem [#allocation18], %s8258_s7 }
 0x1e3   : > { %s8288_s22 = scalar_lea.vmem [#allocation17], %s6736_s26 }
 0x1e4   : > { %7564 = dma.done.wait (%p9092_p6), %s794_s18, 16400  }
 0x1e5   : > { %7566 = vsyncadd (%p9092_p6), %s794_s18, 4294950896  ;;  %s5474_s3 = sshll.u32 %s8258_s7, 10  ;;  %s5475_s23 = sshll.u32 %s8258_s7, 4 }
 0x1e6   : > { %s8298_s5 = scalar_lea.vmem [#allocation20], %s5474_s3  ;;  %s811_s29 = scalar_lea.sflag [#allocation22], %s8255_s30 }
 0x1e7   : > { %s8301_s15 = scalar_lea.vmem [#allocation21], %s5475_s23 }
 0x1e8   : > { %7568 = dma.done.wait (%p9092_p6), %s811_s29, 16640  }
 0x1e9   : > { %7570 = vsyncadd (%p9092_p6), %s811_s29, 4294950656  ;;  %s8307_s9 = scalar_lea.vmem [#allocation23], %s5474_s3  ;;  %s829_s27 = scalar_lea.sflag [#allocation25], %s8255_s30 }
 0x1ea   : > { %s831_s19 = scalar_lea.vmem [#allocation24], %s8258_s7 }
 0x1eb   : > { %7572 = dma.done.wait (%p9092_p6), %s829_s27, 16  }
 0x1ec   : > { %7574 = vsyncadd (%p9092_p6), %s829_s27, 4294967280  ;;  %p9093_p7 = pmov %p9087_p4 }
 0x1ed   : > { %p9094_p5 = pmov %p9087_p4 }
 0x1ee   : > { %7576 = dma.done.wait (%p9093_p7), [#allocation25], 32  }
 0x1ef   : > { %7578 = vsyncadd (%p9094_p5), [#allocation25], 4294967264  ;;  %p9095_p3 = scmp.ne.s32.totalorder %s9085_s14, 0 }
 0x1f0   : > { %v930_v0 = vld [vmem:[#allocation3] sm:$0xff] (!%p9095_p3)  ;;  %v934_v1 = vld [vmem:[#allocation6] sm:$0xff] (!%p9095_p3)  ;;  %v931_v2 = vld [vmem:[#allocation3 + $0x8] sm:$0xff] (!%p9095_p3) }
 0x1f1   : > { %929 = sbr.rel (%p9095_p3) target bundleno = 504 (0x1f8), region = 144  ;;  %v932_v3 = vmul.f32 (!%p9095_p3), 7.071068, %v930_v0  ;;  %v933_v4 = vmul.f32 (!%p9095_p3), 7.071068, %v931_v2  ;;  %v935_v5 = vld [vmem:[#allocation6 + $0x8] sm:$0xff] (!%p9095_p3) }
 0x1f3   : > { %v936_v6 = vadd.f32 (!%p9095_p3), %v934_v1, %v932_v3  ;;  %v937_v7 = vadd.f32 (!%p9095_p3), %v935_v5, %v933_v4 }
 0x1f5   : > { %938 = vst [vmem:[#allocation2] sm:$0xff] (!%p9095_p3), %v936_v6  ;;  %939 = vst [vmem:[#allocation2 + $0x8] sm:$0xff] (!%p9095_p3), %v937_v7 }
 0x1f8 PF: > { %v942_v10 = vlaneseq  ;;  %v7623_v14 = vmov 0.0   ;;  %v1003_v24 = vld [vmem:[%s8269_s28] sm:$0xff]  ;;  %v1004_v25 = vld [vmem:[%s8269_s28 + $0x8] sm:$0xff]  ;;  %v1005_v30 = vld [vmem:[%s8269_s28 + $0x10] sm:$0xff]  ;;  %vm7624_vm5 = vmmov 0   ;;  %vm1444_vm6 = vcmask 64512  }
 0x1f9   : > { %v6476_v26 = vpack.c.bf16 %v1004_v25, %v1003_v24  ;;  %v1098_v27 = vld [vmem:[%s8272_s21] sm:$0xff]  ;;  %v1099_v28 = vld [vmem:[%s8272_s21 + $0x8] sm:$0xff]  ;;  %v1006_v31 = vld [vmem:[%s8269_s28 + $0x18] sm:$0xff]  ;;  %s9096_s14 = sld [smem:[#allocation40_spill]] }
 0x1fa   : > { %v943_v11 = vand.u32 127, %v942_v10  ;;  %v6508_v29 = vpack.c.bf16 %v1099_v28, %v1098_v27  ;;  %v6480_v32 = vpack.c.bf16 %v1006_v31, %v1005_v30  ;;  %v1100_v33 = vld [vmem:[%s8272_s21 + $0x10] sm:$0xff]  ;;  %v1101_v34 = vld [vmem:[%s8272_s21 + $0x18] sm:$0xff]  ;;  %v1007_v36 = vld [vmem:[%s8269_s28 + $0x20] sm:$0xff]  ;;  %v8371_v25 = vshrl.u32 %v942_v10, 7 }
 0x1fb   : > { %6477 = vmatprep.subr.bf16.mxu0 %v6476_v26  ;;  %v6512_v35 = vpack.c.bf16 %v1101_v34, %v1100_v33  ;;  %v1008_v37 = vld [vmem:[%s8269_s28 + $0x28] sm:$0xff]  ;;  %v1102_v39 = vld [vmem:[%s8272_s21 + $0x20] sm:$0xff]  ;;  %v1009_v42 = vld [vmem:[%s8269_s28 + $0x30] sm:$0xff] }
 0x1fc   : > { %v940_v8 = vld [vmem:[#allocation2] sm:$0xff]  ;;  %v941_v9 = vld [vmem:[#allocation2 + $0x8] sm:$0xff]  ;;  %vm944_vm0 = vcmp.lt.s32.totalorder %v943_v11, 50  ;;  %6479 = vmatpush3.bf16.msra.mxu0 %v6476_v26  ;;  %6509 = vmatprep.subr.bf16.mxu1 %v6508_v29  ;;  %v6484_v38 = vpack.c.bf16 %v1008_v37, %v1007_v36  ;;  %v1010_v43 = vld [vmem:[%s8269_s28 + $0x38] sm:$0xff]  ;;  %v8374_v31 = vsub.s32 0, %v8371_v25 }
 0x1fd   : > { %953 = vadd.xlane.f32.xlu0 %v940_v8  ;;  %v8323_v15 = vsel %vm944_vm0, 1.0, %v7623_v14  ;;  %6511 = vmatpush3.bf16.msra.mxu1 %v6508_v29  ;;  %v1103_v40 = vld [vmem:[%s8272_s21 + $0x28] sm:$0xff]  ;;  %v6488_v44 = vpack.c.bf16 %v1010_v43, %v1009_v42  ;;  %v1104_v45 = vld [vmem:[%s8272_s21 + $0x30] sm:$0xff]  ;;  %v1105_v46 = vld [vmem:[%s8272_s21 + $0x38] sm:$0xff] }
 0x1fe   : > { %6481 = vmatprep.subr.bf16.mxu0 %v6480_v32  ;;  %6513 = vmatprep.subr.bf16.mxu1 %v6512_v35  ;;  %v6516_v41 = vpack.c.bf16 %v1103_v40, %v1102_v39  ;;  %v6520_v47 = vpack.c.bf16 %v1105_v46, %v1104_v45  ;;  %v1011_v48 = vld [vmem:[%s8269_s28 + $0x40] sm:$0xff]  ;;  %v1012_v49 = vld [vmem:[%s8269_s28 + $0x48] sm:$0xff]  ;;  %v1013_v54 = vld [vmem:[%s8269_s28 + $0x50] sm:$0xff] }
 0x1ff   : > { %v6492_v50 = vpack.c.bf16 %v1012_v49, %v1011_v48  ;;  %v1106_v51 = vld [vmem:[%s8272_s21 + $0x40] sm:$0xff]  ;;  %v1107_v52 = vld [vmem:[%s8272_s21 + $0x48] sm:$0xff]  ;;  %v1014_v55 = vld [vmem:[%s8269_s28 + $0x58] sm:$0xff]  ;;  %p5808_p11 = scmp.ne.s32.totalorder %s9096_s14, 5 }
 0x200   : > { %6483 = vmatpush3.bf16.msra.mxu0 %v6480_v32  ;;  %v6524_v53 = vpack.c.bf16 %v1107_v52, %v1106_v51  ;;  %v6496_v56 = vpack.c.bf16 %v1014_v55, %v1013_v54  ;;  %v1108_v57 = vld [vmem:[%s8272_s21 + $0x50] sm:$0xff]  ;;  %v1109_v58 = vld [vmem:[%s8272_s21 + $0x58] sm:$0xff]  ;;  %v1015_v59 = vld [vmem:[%s8269_s28 + $0x60] sm:$0xff] }
 0x201   : > { %955 = vadd.xlane.f32.xlu0 %v941_v9  ;;  %6515 = vmatpush3.bf16.msra.mxu1 %v6512_v35  ;;  %v6528_v60 = vpack.c.bf16 %v1109_v58, %v1108_v57  ;;  %v1016_v61 = vld [vmem:[%s8269_s28 + $0x68] sm:$0xff]  ;;  %v1110_v62 = vld [vmem:[%s8272_s21 + $0x60] sm:$0xff]  ;;  %v1017_v2 = vld [vmem:[%s8269_s28 + $0x70] sm:$0xff]  ;;  %v8379_v35 = vsub.s32 1, %v8371_v25 }
 0x202   : > { %6485 = vmatprep.subr.bf16.mxu0 %v6484_v38  ;;  %6517 = vmatprep.subr.bf16.mxu1 %v6516_v41  ;;  %v1111_v63 = vld [vmem:[%s8272_s21 + $0x68] sm:$0xff]  ;;  %v6500_v0 = vpack.c.bf16 %v1016_v61, %v1015_v59  ;;  %v1018_v3 = vld [vmem:[%s8269_s28 + $0x78] sm:$0xff]  ;;  %v1112_v5 = vld [vmem:[%s8272_s21 + $0x70] sm:$0xff] }
 0x203   : > { %v6532_v1 = vpack.c.bf16 %v1111_v63, %v1110_v62  ;;  %v6504_v4 = vpack.c.bf16 %v1018_v3, %v1017_v2  ;;  %v1113_v6 = vld [vmem:[%s8272_s21 + $0x78] sm:$0xff]  ;;  %v1195_v43 = vld [vmem:[%s8278_s17 + $0x10] sm:$0xff]  ;;  %v1198_v48 = vld [vmem:[%s8278_s17 + $0x28] sm:$0xff] }
 0x204   : > { %6487 = vmatpush3.bf16.msra.mxu0 %v6484_v38  ;;  %v6536_v7 = vpack.c.bf16 %v1113_v6, %v1112_v5  ;;  %v947_v33 = vld [vmem:[%s8262_s16] sm:$0xf]  ;;  %v1199_v49 = vld [vmem:[%s8278_s17 + $0x30] sm:$0xff]  ;;  %v1201_v52 = vld [vmem:[%s8278_s17 + $0x40] sm:$0xff] }
 0x205   : > { %6519 = vmatpush3.bf16.msra.mxu1 %v6516_v41  ;;  %6489 = vmatprep.subr.bf16.mxu0 %v6488_v44  ;;  %v992_v10 = vrot.slane %v947_v33, %v8374_v31  ;;  %v1000_v37 = vrot.slane %v947_v33, %v8379_v35  ;;  %v1203_v55 = vld [vmem:[%s8278_s17 + $0x50] sm:$0xff]  ;;  %v1205_v58 = vld [vmem:[%s8278_s17 + $0x60] sm:$0xff]  ;;  %v1206_v59 = vld [vmem:[%s8278_s17 + $0x68] sm:$0xff] }
 0x206   : > { %6521 = vmatprep.subr.bf16.mxu1 %v6520_v47  ;;  %v1207_v61 = vld [vmem:[%s8278_s17 + $0x70] sm:$0xff]  ;;  %v1208_v62 = vld [vmem:[%s8278_s17 + $0x78] sm:$0xff]  ;;  %v5504_v6 = vld [vmem:[%s8272_s21 + $0xa0] sm:$0xff] }
 0x207   : > { %v6568_v63 = vpack.c.bf16 %v1208_v62, %v1207_v61  ;;  %v5502_v3 = vld [vmem:[%s8272_s21 + $0x90] sm:$0xff] }
 0x208   : > { %6491 = vmatpush3.bf16.msra.mxu0 %v6488_v44  ;;  %v1196_v44 = vld [vmem:[%s8278_s17 + $0x18] sm:$0xff] }
 0x209   : > { %6523 = vmatpush3.bf16.msra.mxu1 %v6520_v47  ;;  %6493 = vmatprep.subr.bf16.mxu0 %v6492_v50  ;;  %v6544_v46 = vpack.c.bf16 %v1196_v44, %v1195_v43  ;;  %v1197_v47 = vld [vmem:[%s8278_s17 + $0x20] sm:$0xff] }
 0x20a   : > { %6525 = vmatprep.subr.bf16.mxu1 %v6524_v53  ;;  %v8445_v44 = vld [vmem:[%s8288_s22 + $0x4] sm:$0x3] }
 0x20c   : > { %6495 = vmatpush3.bf16.msra.mxu0 %v6492_v50  ;;  %v1200_v50 = vld [vmem:[%s8278_s17 + $0x38] sm:$0xff] }
 0x20d   : > { %6527 = vmatpush3.bf16.msra.mxu1 %v6524_v53  ;;  %6497 = vmatprep.subr.bf16.mxu0 %v6496_v56  ;;  %v6552_v51 = vpack.c.bf16 %v1200_v50, %v1199_v49  ;;  %v1202_v53 = vld [vmem:[%s8278_s17 + $0x48] sm:$0xff] }
 0x20e   : > { %6529 = vmatprep.subr.bf16.mxu1 %v6528_v60  ;;  %v6556_v54 = vpack.c.bf16 %v1202_v53, %v1201_v52 }
 0x210   : > { %6499 = vmatpush3.bf16.msra.mxu0 %v6496_v56  ;;  %v1204_v56 = vld [vmem:[%s8278_s17 + $0x58] sm:$0xff] }
 0x211   : > { %6531 = vmatpush3.bf16.msra.mxu1 %v6528_v60  ;;  %6501 = vmatprep.subr.bf16.mxu0 %v6500_v0  ;;  %v6560_v57 = vpack.c.bf16 %v1204_v56, %v1203_v55  ;;  %v6564_v60 = vpack.c.bf16 %v1206_v59, %v1205_v58  ;;  %v8454_v55 = vld [vmem:[#allocation8] ss:$0 sm:$0xff] }
 0x212   : > { %6533 = vmatprep.subr.bf16.mxu1 %v6532_v1 }
 0x214   : > { %6503 = vmatpush3.bf16.msra.mxu0 %v6500_v0  ;;  %v5500_v0 = vld [vmem:[%s8272_s21 + $0x80] sm:$0xff] }
 0x215   : > { %6535 = vmatpush3.bf16.msra.mxu1 %v6532_v1  ;;  %6505 = vmatprep.subr.bf16.mxu0 %v6504_v4  ;;  %v5501_v1 = vld [vmem:[%s8272_s21 + $0x88] sm:$0xff] }
 0x216   : > { %6537 = vmatprep.subr.bf16.mxu1 %v6536_v7  ;;  %v6604_v2 = vpack.c.bf16 %v5501_v1, %v5500_v0 }
 0x218   : > { %6507 = vmatpush3.bf16.msra.mxu0 %v6504_v4  ;;  %v5503_v4 = vld [vmem:[%s8272_s21 + $0x98] sm:$0xff] }
 0x219   : > { %6539 = vmatpush3.bf16.msra.mxu1 %v6536_v7  ;;  %v6608_v5 = vpack.c.bf16 %v5503_v4, %v5502_v3  ;;  %v5505_v7 = vld [vmem:[%s8272_s21 + $0xa8] sm:$0xff] }
 0x21a   : > { %6261 = vmatprep.subr.mxu1 %v7623_v14 }
 0x28a   : > { %v954_v12 = vpop.xlane.xlu0 %953 }
 0x28b   : > { %v957_v13 = vmul.f32 0.02, %v954_v12 }
 0x28d   : > { %v959_v16 = vsub.f32 %v940_v8, %v957_v13  ;;  %v1193_v8 = vld [vmem:[%s8278_s17] sm:$0xff] }
 0x28e   : > { %v956_v17 = vpop.xlane.xlu0 %955 }
 0x28f   : > { %v958_v18 = vmul.f32 0.02, %v956_v17  ;;  %v8326_v19 = vmul.f32 %v8323_v15, %v959_v16 }
 0x291   : > { %v960_v20 = vsub.f32 %v941_v9, %v958_v18  ;;  %v963_v21 = vmul.f32 %v8326_v19, %v8326_v19  ;;  %v1194_v9 = vld [vmem:[%s8278_s17 + $0x8] sm:$0xff]  ;;  %v993_v36 = vmul.f32 %v992_v10, %v8326_v19 }
 0x292   : > { %v6540_v11 = vpack.c.bf16 %v1194_v9, %v1193_v8  ;;  %v6612_v8 = vpack.c.bf16 %v5505_v7, %v5504_v6  ;;  %v5506_v9 = vld [vmem:[%s8272_s21 + $0xb0] sm:$0xff] }
 0x293   : > { %965 = vadd.xlane.f32.xlu1 %v963_v21  ;;  %v8331_v22 = vmul.f32 %v8323_v15, %v960_v20 }
 0x294   : > { %6541 = vmatprep.subr.bf16.mxu0 %v6540_v11 }
 0x295   : > { %v964_v23 = vmul.f32 %v8331_v22, %v8331_v22  ;;  %v994_v40 = vmul.f32 %v992_v10, %v8331_v22  ;;  %v6548_v22 = vpack.c.bf16 %v1198_v48, %v1197_v47 }
 0x297   : > { %967 = vadd.xlane.f32.xlu1 %v964_v23 }
 0x320   : > { %v966_v12 = vpop.xlane.xlu1 %965 }
 0x321   : > { %v969_v13 = vmul.f32 0.020408163, %v966_v12 }
 0x323   : > { %7016 = vrsqrt.f32 %v969_v13  ;;  %vm973_vm1 = vcmp.eq.f32.partialorder %v969_v13, inf  ;;  %v976_v21 = vand.u32 2147483648, %v969_v13  ;;  %vm975_vm2 = vcmp.eq.f32.partialorder %v969_v13, 0.0 }
 0x324   : > { %v968_v16 = vpop.xlane.xlu1 %967 }
 0x325   : > { %v970_v17 = vmul.f32 0.020408163, %v968_v16  ;;  %v5509_v16 = vld [vmem:[%s8272_s21 + $0xc8] sm:$0xff] }
 0x327   : > { %7018 = vrsqrt.f32 %v970_v17  ;;  %vm980_vm3 = vcmp.eq.f32.partialorder %v970_v17, inf  ;;  %v983_v29 = vand.u32 2147483648, %v970_v17  ;;  %vm982_vm4 = vcmp.eq.f32.partialorder %v970_v17, 0.0 }
 0x32d   : > { %v7017_v18 = vpop.eup %7016 }
 0x32e   : > { %v972_v20 = vmul.f32 %v7017_v18, %v969_v13  ;;  %v5510_v18 = vld [vmem:[%s8272_s21 + $0xd0] sm:$0xff] }
 0x330   : > { %v974_v23 = vsel %vm973_vm1, %v969_v13, %v972_v20  ;;  %v5508_v13 = vld [vmem:[%s8272_s21 + $0xc0] sm:$0xff]  ;;  %v5511_v20 = vld [vmem:[%s8272_s21 + $0xd8] sm:$0xff] }
 0x331   : > { %v7019_v24 = vpop.eup %7018  ;;  %v977_v26 = vsel %vm975_vm2, %v976_v21, %v974_v23  ;;  %v6624_v21 = vpack.c.bf16 %v5511_v20, %v5510_v18  ;;  %v5512_v23 = vld [vmem:[%s8272_s21 + $0xe0] sm:$0xff]  ;;  %v5485_v18 = vld [vmem:[%s8269_s28 + $0x88] sm:$0xff] }
 0x332   : > { %v985_v27 = vadd.f32 1e-06, %v977_v26  ;;  %v979_v28 = vmul.f32 %v7019_v24, %v970_v17  ;;  %v5513_v24 = vld [vmem:[%s8272_s21 + $0xe8] sm:$0xff] }
 0x333   : > { %v6628_v26 = vpack.c.bf16 %v5513_v24, %v5512_v23  ;;  %v5486_v24 = vld [vmem:[%s8269_s28 + $0x90] sm:$0xff] }
 0x334   : > { %7020 = vrcp.f32 %v985_v27  ;;  %v981_v30 = vsel %vm980_vm3, %v970_v17, %v979_v28  ;;  %v6620_v17 = vpack.c.bf16 %v5509_v16, %v5508_v13  ;;  %v5514_v27 = vld [vmem:[%s8272_s21 + $0xf0] sm:$0xff]  ;;  %v5515_v28 = vld [vmem:[%s8272_s21 + $0xf8] sm:$0xff] }
 0x335   : > { %v984_v32 = vsel %vm982_vm4, %v983_v29, %v981_v30  ;;  %v6632_v29 = vpack.c.bf16 %v5515_v28, %v5514_v27  ;;  %v951_v30 = vld [vmem:[%s8288_s22 + $0x2] sm:$0x3] }
 0x336   : > { %v986_v34 = vadd.f32 1e-06, %v984_v32  ;;  %v8433_v32 = vld [vmem:[%s8288_s22] sm:$0x3]  ;;  %v1117_v33 = vrot.slane %v951_v30, %v8374_v31  ;;  %v1745_v49 = vrot.slane %v951_v30, %v8379_v35 }
 0x337   : > { %v5488_v30 = vld [vmem:[%s8269_s28 + $0xa0] sm:$0xff] }
 0x338   : > { %7022 = vrcp.f32 %v986_v34 }
 0x33e   : > { %v7021_v38 = vpop.eup %7020 }
 0x33f   : > { %v995_v39 = vmul.f32 %v7021_v38, %v993_v36  ;;  %v1022_v36 = vrot.slane %v8433_v32, %v8374_v31 }
 0x341   : > { %v8384_v41 = vadd.f32 %v1000_v37, %v995_v39 }
 0x342   : > { %v7023_v42 = vpop.eup %7022 }
 0x343   : > { %6188 = vmatprep.mubr.f32.mxu0 %v8384_v41  ;;  %6223 = vmatprep.mubr.f32.mxu1 %v8384_v41  ;;  %v996_v45 = vmul.f32 %v7023_v42, %v994_v40 }
 0x345   : > { %v8390_v19 = vadd.f32 %v1000_v37, %v996_v45  ;;  %v1212_v45 = vrot.slane %v8445_v44, %v8374_v31 }
 0x347   : > { %6189 = vmatmul.mubr.f32.vlgmr.msra.gmra.mrb[0].mxu0 %v8390_v19  ;;  %6224 = vmatmul.mubr.f32.vlgmr.msra.gmra.mrb[0].mxu1 %v8390_v19 }
 0x348   : > { %6543 = vmatpush3.bf16.msra.mxu0 %v6540_v11  ;;  %6258 = vmatprep.mubr.f32.mxu0 %v8384_v41  ;;  %v5507_v11 = vld [vmem:[%s8272_s21 + $0xb8] sm:$0xff] }
 0x349   : > { %6545 = vmatprep.subr.bf16.mxu0 %v6544_v46  ;;  %v6616_v12 = vpack.c.bf16 %v5507_v11, %v5506_v9  ;;  %6263 = vmatprep.mubr.msk.f32.mxu1 %vm7624_vm5, %v7623_v14 }
 0x34c   : > { %6547 = vmatpush3.bf16.msra.mxu0 %v6544_v46 }
 0x34d   : > { %6549 = vmatprep.subr.bf16.mxu0 %v6548_v22 }
 0x350   : > { %6551 = vmatpush3.bf16.msra.mxu0 %v6548_v22 }
 0x351   : > { %6553 = vmatprep.subr.bf16.mxu0 %v6552_v51 }
 0x354   : > { %6555 = vmatpush3.bf16.msra.mxu0 %v6552_v51 }
 0x355   : > { %6557 = vmatprep.subr.bf16.mxu0 %v6556_v54 }
 0x358   : > { %6559 = vmatpush3.bf16.msra.mxu0 %v6556_v54 }
 0x359   : > { %6561 = vmatprep.subr.bf16.mxu0 %v6560_v57 }
 0x35c   : > { %6563 = vmatpush3.bf16.msra.mxu0 %v6560_v57 }
 0x35d   : > { %6565 = vmatprep.subr.bf16.mxu0 %v6564_v60 }
 0x360   : > { %6567 = vmatpush3.bf16.msra.mxu0 %v6564_v60  ;;  %v8457_v60 = vld [vmem:[#allocation8 + $0x1] ss:$0 sm:$0xff] }
 0x361   : > { %6569 = vmatprep.subr.bf16.mxu0 %v6568_v63 }
 0x364   : > { %6571 = vmatpush3.bf16.msra.mxu0 %v6568_v63 }
 0x365   : > { %6605 = vmatprep.subr.bf16.mxu0 %v6604_v2 }
 0x367   : > { %6259 = vmatmul.mubr.f32.vlgmr.msra.gmra.mrb[2].mxu0 %v8390_v19 }
 0x368   : > { %6607 = vmatpush3.bf16.msra.mxu0 %v6604_v2  ;;  %6348 = vmatprep.mubr.f32.mxu0 %v8384_v41 }
 0x369   : > { %6609 = vmatprep.subr.bf16.mxu0 %v6608_v5 }
 0x36c   : > { %6611 = vmatpush3.bf16.msra.mxu0 %v6608_v5 }
 0x36d   : > { %6613 = vmatprep.subr.bf16.mxu0 %v6612_v8 }
 0x370   : > { %6615 = vmatpush3.bf16.msra.mxu0 %v6612_v8 }
 0x371   : > { %6617 = vmatprep.subr.bf16.mxu0 %v6616_v12 }
 0x374   : > { %6619 = vmatpush3.bf16.msra.mxu0 %v6616_v12 }
 0x375   : > { %6621 = vmatprep.subr.bf16.mxu0 %v6620_v17 }
 0x378   : > { %6623 = vmatpush3.bf16.msra.mxu0 %v6620_v17  ;;  %v5484_v17 = vld [vmem:[%s8269_s28 + $0x80] sm:$0xff] }
 0x379   : > { %6625 = vmatprep.subr.bf16.mxu0 %v6624_v21  ;;  %v6572_v23 = vpack.c.bf16 %v5485_v18, %v5484_v17 }
 0x37c   : > { %6627 = vmatpush3.bf16.msra.mxu0 %v6624_v21 }
 0x37d   : > { %6629 = vmatprep.subr.bf16.mxu0 %v6628_v26 }
 0x380   : > { %6631 = vmatpush3.bf16.msra.mxu0 %v6628_v26  ;;  %v5487_v26 = vld [vmem:[%s8269_s28 + $0x98] sm:$0xff] }
 0x381   : > { %6633 = vmatprep.subr.bf16.mxu0 %v6632_v29 }
 0x384   : > { %6635 = vmatpush3.bf16.msra.mxu0 %v6632_v29  ;;  %v6576_v29 = vpack.c.bf16 %v5487_v26, %v5486_v24 }
 0x385   : > { %6386 = vmatprep.subr.mxu0 %v7623_v14 }
 0x387   : > { %6349 = vmatmul.mubr.f32.vlgmr.msra.gmra.mrb[4].mxu0 %v8390_v19 }
 0x388   : > { %6388 = vmatprep.mubr.msk.f32.mxu0 %vm7624_vm5, %v7623_v14 }
 0x41a   : > { %v6190_v34 = vpop.f32.mrb[0].mxu0  ;;  %v6225_v10 = vpop.f32.mrb[0].mxu1 }
 0x41b   : > { %v1089_v37 = vpop.f32.mrb[1].mxu0  ;;  %v1184_v38 = vpop.f32.mrb[1].mxu1  ;;  %v1190_v42 = vadd.f32 %v6225_v10, %v1117_v33  ;;  %v1095_v43 = vadd.f32 %v6190_v34, %v1022_v36  ;;  %v5490_v10 = vld [vmem:[%s8269_s28 + $0xb0] sm:$0xff] }
 0x41c   : > { %v1185_v39 = vadd.f32 %v1184_v38, %v1117_v33  ;;  %v1090_v40 = vadd.f32 %v1089_v37, %v1022_v36  ;;  %v5489_v33 = vld [vmem:[%s8269_s28 + $0xa8] sm:$0xff]  ;;  %v5491_v36 = vld [vmem:[%s8269_s28 + $0xb8] sm:$0xff]  ;;  %v5492_v38 = vld [vmem:[%s8269_s28 + $0xc0] sm:$0xff] }
 0x41d   : > { %v6580_v34 = vpack.c.bf16 %v5489_v33, %v5488_v30  ;;  %v6584_v37 = vpack.c.bf16 %v5491_v36, %v5490_v10 }
 0x41e   : > { %6262 = vmatpush3.xpose.msra.mxu1 %v1185_v39  ;;  %v5493_v39 = vld [vmem:[%s8269_s28 + $0xc8] sm:$0xff] }
 0x41f   : > { %6266 = vmatprep.subr.mxu1 %v7623_v14 }
 0x421   : > { %6264 = vmatmul.mubr.f32.vlgmr.msra.gmra.mrb[2].mxu1 %v1090_v40  ;;  %v6588_v40 = vpack.c.bf16 %v5493_v39, %v5492_v38 }
 0x422   : > { %6267 = vmatpush3.xpose.msra.mxu1 %v1190_v42  ;;  %6268 = vmatprep.mubr.msk.f32.mxu1 %vm7624_vm5, %v7623_v14  ;;  %v5494_v42 = vld [vmem:[%s8269_s28 + $0xd0] sm:$0xff] }
 0x423   : > { %6271 = vmatprep.subr.mxu1 %v7623_v14 }
 0x425   : > { %6269 = vmatmul.mubr.f32.vlgmr.msra.gmra.mrb[4].mxu1 %v1095_v43  ;;  %v5495_v43 = vld [vmem:[%s8269_s28 + $0xd8] sm:$0xff] }
 0x426   : > { %6273 = vmatprep.mubr.msk.f32.mxu1 %vm7624_vm5, %v7623_v14 }
 0x43a   : > { %v6260_v46 = vpop.f32.mrb[2].mxu0 }
 0x43b   : > { %v1285_v47 = vadd.f32 %v6260_v46, %v1212_v45  ;;  %v1279_v48 = vpop.f32.mrb[3].mxu0  ;;  %v5496_v46 = vld [vmem:[%s8269_s28 + $0xe0] sm:$0xff] }
 0x43c   : > { %v1280_v22 = vadd.f32 %v1279_v48, %v1212_v45  ;;  %v6592_v45 = vpack.c.bf16 %v5495_v43, %v5494_v42 }
 0x43e   : > { %6272 = vmatpush3.msra.mxu1 %v1280_v22  ;;  %v5498_v22 = vld [vmem:[%s8269_s28 + $0xf0] sm:$0xff] }
 0x43f   : > { %6276 = vmatprep.subr.mxu1 %v7623_v14 }
 0x45a   : > { %v6350_v50 = vpop.f32.mrb[4].mxu0 }
 0x45b   : > { %v8451_v51 = vadd.f32 %v6350_v50, %v1745_v49  ;;  %v1812_v52 = vpop.f32.mrb[5].mxu0 }
 0x45c   : > { %v1813_v53 = vadd.f32 %v1812_v52, %v1745_v49  ;;  %v5499_v49 = vld [vmem:[%s8269_s28 + $0xf8] sm:$0xff]  ;;  %v5516_v52 = vld [vmem:[%s8278_s17 + $0x80] sm:$0xff] }
 0x45d   : > { %v6600_v50 = vpack.c.bf16 %v5499_v49, %v5498_v22 }
 0x45e   : > { %6387 = vmatpush3.xpose.msra.mxu0 %v1813_v53  ;;  %v5517_v53 = vld [vmem:[%s8278_s17 + $0x88] sm:$0xff] }
 0x45f   : > { %6391 = vmatprep.subr.mxu0 %v7623_v14 }
 0x4f4   : > { %v1354_v54 = vpop.f32.mrb[2].mxu1 }
 0x4f5   : > { %v1428_v56 = vmul.f32 0.2, %v1354_v54  ;;  %v6265_v57 = vpop.f32.mrb[3].mxu1  ;;  %v6636_v54 = vpack.c.bf16 %v5517_v53, %v5516_v52  ;;  %v5534_v53 = vld [vmem:[%s8281_s20 + $0x80] sm:$0xff] }
 0x4f6   : > { %v5519_v57 = vld [vmem:[%s8278_s17 + $0x98] sm:$0xff] }
 0x4f7   : > { %v1442_v58 = vadd.f32 %v8454_v55, %v1428_v56  ;;  %v5518_v56 = vld [vmem:[%s8278_s17 + $0x90] sm:$0xff] }
 0x4f8   : > { %v1424_v59 = vpop.f32.mrb[4].mxu1 }
 0x4f9   : > { %v1429_v61 = vmul.f32 0.2, %v1424_v59  ;;  %v6270_v62 = vpop.f32.mrb[5].mxu1  ;;  %v1445_v63 = vsel %vm1444_vm6, %v1442_v58, -inf  ;;  %v5520_v59 = vld [vmem:[%s8278_s17 + $0xa0] sm:$0xff] }
 0x4fa   : > { %1446 = vmax.xlane.f32.xlu0 %v1445_v63  ;;  %v5522_v63 = vld [vmem:[%s8278_s17 + $0xb0] sm:$0xff] }
 0x4fb   : > { %v1443_v0 = vadd.f32 %v8457_v60, %v1429_v61  ;;  %v5521_v61 = vld [vmem:[%s8278_s17 + $0xa8] sm:$0xff] }
 0x4fc   : > { %v6644_v62 = vpack.c.bf16 %v5521_v61, %v5520_v59  ;;  %v5536_v59 = vld [vmem:[%s8281_s20 + $0x90] sm:$0xff]  ;;  %v5537_v61 = vld [vmem:[%s8281_s20 + $0x98] sm:$0xff] }
 0x4fd   : > { %v1448_v1 = vsel %vm1444_vm6, %v1443_v0, -inf }
 0x4fe   : > { %1449 = vmax.xlane.f32.xlu1 %v1448_v1 }
 0x587   : > { %v1447_v2 = vpop.xlane.xlu0 %1446 }
 0x588   : > { %v1451_v3 = vsub.f32 %v1442_v58, %v1447_v2  ;;  %v6640_v58 = vpack.c.bf16 %v5519_v57, %v5518_v56  ;;  %v5524_v2 = vld [vmem:[%s8278_s17 + $0xc0] sm:$0xff] }
 0x58a   : > { %v1453_v4 = vmul.f32 1.442695, %v1451_v3  ;;  %v5525_v3 = vld [vmem:[%s8278_s17 + $0xc8] sm:$0xff] }
 0x58b   : > { %v1450_v5 = vpop.xlane.xlu1 %1449 }
 0x58c   : > { %7024 = vpow2.f32 %v1453_v4  ;;  %v1452_v6 = vsub.f32 %v1443_v0, %v1450_v5  ;;  %v5523_v0 = vld [vmem:[%s8278_s17 + $0xb8] sm:$0xff]  ;;  %v6652_v4 = vpack.c.bf16 %v5525_v3, %v5524_v2  ;;  %v5526_v5 = vld [vmem:[%s8278_s17 + $0xd0] sm:$0xff]  ;;  %v5539_v2 = vld [vmem:[%s8281_s20 + $0xa8] sm:$0xff] }
 0x58d   : > { %v6648_v1 = vpack.c.bf16 %v5523_v0, %v5522_v63  ;;  %v6672_v0 = vpack.c.bf16 %v5537_v61, %v5536_v59 }
 0x58e   : > { %v1455_v7 = vmul.f32 1.442695, %v1452_v6  ;;  %v5527_v6 = vld [vmem:[%s8278_s17 + $0xd8] sm:$0xff] }
 0x590   : > { %7026 = vpow2.f32 %v1455_v7  ;;  %v5528_v7 = vld [vmem:[%s8278_s17 + $0xe0] sm:$0xff] }
 0x596   : > { %v7025_v8 = vpop.eup %7024 }
 0x597   : > { %v1457_v9 = vsel %vm1444_vm6, %v7025_v8, 0.0 }
 0x598   : > { %1458 = vadd.xlane.f32.xlu0 %v1457_v9 }
 0x59a   : > { %v7027_v11 = vpop.eup %7026 }
 0x59b   : > { %v1460_v12 = vsel %vm1444_vm6, %v7027_v11, 0.0 }
 0x59c   : > { %1461 = vadd.xlane.f32.xlu1 %v1460_v12  ;;  %v5531_v12 = vld [vmem:[%s8278_s17 + $0xf8] sm:$0xff] }
 0x625   : > { %v1459_v13 = vpop.xlane.xlu0 %1458 }
 0x626   : > { %7028 = vrcp.f32 %v1459_v13 }
 0x629   : > { %v1462_v16 = vpop.xlane.xlu1 %1461 }
 0x62a   : > { %7030 = vrcp.f32 %v1462_v16 }
 0x630   : > { %v7029_v20 = vpop.eup %7028 }
 0x631   : > { %v1465_v21 = vmul.f32 %v7029_v20, %v7025_v8  ;;  %v5529_v8 = vld [vmem:[%s8278_s17 + $0xe8] sm:$0xff] }
 0x632   : > { %v6660_v9 = vpack.c.bf16 %v5529_v8, %v5528_v7  ;;  %v5544_v8 = vld [vmem:[%s8281_s20 + $0xd0] sm:$0xff] }
 0x633   : > { %6274 = vmatmul.mubr.msk.f32.vlgmr.msra.gmra.mrb[6].mxu1 %vm1444_vm6, %v1465_v21  ;;  %v1649_v21 = vrot.slane %v8433_v32, %v8379_v35 }
 0x634   : > { %v7031_v27 = vpop.eup %7030  ;;  %6277 = vmatpush3.msra.mxu1 %v1285_v47  ;;  %6278 = vmatprep.mubr.msk.f32.mxu1 %vm7624_vm5, %v7623_v14  ;;  %v5497_v47 = vld [vmem:[%s8269_s28 + $0xe8] sm:$0xff] }
 0x635   : > { %v1466_v28 = vmul.f32 %v7031_v27, %v7027_v11  ;;  %6573 = vmatprep.subr.bf16.mxu1 %v6572_v23  ;;  %v6596_v48 = vpack.c.bf16 %v5497_v47, %v5496_v46  ;;  %v5530_v11 = vld [vmem:[%s8278_s17 + $0xf0] sm:$0xff] }
 0x636   : > { %v6664_v13 = vpack.c.bf16 %v5531_v12, %v5530_v11  ;;  %v5546_v12 = vld [vmem:[%s8281_s20 + $0xe0] sm:$0xff] }
 0x637   : > { %6279 = vmatmul.mubr.msk.f32.vlgmr.msra.gmra.mrb[8].mxu1 %vm1444_vm6, %v1466_v28 }
 0x638   : > { %6575 = vmatpush3.bf16.msra.mxu1 %v6572_v23  ;;  %6313 = vmatprep.mubr.f32.mxu1 %v8384_v41 }
 0x639   : > { %6577 = vmatprep.subr.bf16.mxu1 %v6576_v29 }
 0x63c   : > { %6579 = vmatpush3.bf16.msra.mxu1 %v6576_v29 }
 0x63d   : > { %6581 = vmatprep.subr.bf16.mxu1 %v6580_v34 }
 0x640   : > { %6583 = vmatpush3.bf16.msra.mxu1 %v6580_v34 }
 0x641   : > { %6585 = vmatprep.subr.bf16.mxu1 %v6584_v37 }
 0x644   : > { %6587 = vmatpush3.bf16.msra.mxu1 %v6584_v37 }
 0x645   : > { %6589 = vmatprep.subr.bf16.mxu1 %v6588_v40 }
 0x648   : > { %6591 = vmatpush3.bf16.msra.mxu1 %v6588_v40 }
 0x649   : > { %6593 = vmatprep.subr.bf16.mxu1 %v6592_v45 }
 0x64c   : > { %6595 = vmatpush3.bf16.msra.mxu1 %v6592_v45 }
 0x64d   : > { %6597 = vmatprep.subr.bf16.mxu1 %v6596_v48 }
 0x650   : > { %6599 = vmatpush3.bf16.msra.mxu1 %v6596_v48 }
 0x651   : > { %6601 = vmatprep.subr.bf16.mxu1 %v6600_v50 }
 0x654   : > { %6603 = vmatpush3.bf16.msra.mxu1 %v6600_v50 }
 0x655   : > { %6637 = vmatprep.subr.bf16.mxu1 %v6636_v54 }
 0x657   : > { %6314 = vmatmul.mubr.f32.vlgmr.msra.gmra.mrb[10].mxu1 %v8390_v19 }
 0x658   : > { %6639 = vmatpush3.bf16.msra.mxu1 %v6636_v54  ;;  %6383 = vmatprep.mubr.f32.mxu1 %v8384_v41  ;;  %v6656_v41 = vpack.c.bf16 %v5527_v6, %v5526_v5  ;;  %v5535_v54 = vld [vmem:[%s8281_s20 + $0x88] sm:$0xff]  ;;  %v5541_v5 = vld [vmem:[%s8281_s20 + $0xb8] sm:$0xff]  ;;  %v5542_v6 = vld [vmem:[%s8281_s20 + $0xc0] sm:$0xff] }
 0x659   : > { %6641 = vmatprep.subr.bf16.mxu1 %v6640_v58 }
 0x65c   : > { %6643 = vmatpush3.bf16.msra.mxu1 %v6640_v58  ;;  %v6668_v58 = vpack.c.bf16 %v5535_v54, %v5534_v53 }
 0x65d   : > { %6645 = vmatprep.subr.bf16.mxu1 %v6644_v62 }
 0x660   : > { %6647 = vmatpush3.bf16.msra.mxu1 %v6644_v62 }
 0x661   : > { %6649 = vmatprep.subr.bf16.mxu1 %v6648_v1 }
 0x664   : > { %6651 = vmatpush3.bf16.msra.mxu1 %v6648_v1  ;;  %v5538_v1 = vld [vmem:[%s8281_s20 + $0xa0] sm:$0xff] }
 0x665   : > { %6653 = vmatprep.subr.bf16.mxu1 %v6652_v4  ;;  %v6676_v3 = vpack.c.bf16 %v5539_v2, %v5538_v1 }
 0x668   : > { %6655 = vmatpush3.bf16.msra.mxu1 %v6652_v4  ;;  %v5540_v4 = vld [vmem:[%s8281_s20 + $0xb0] sm:$0xff] }
 0x669   : > { %6657 = vmatprep.subr.bf16.mxu1 %v6656_v41 }
 0x66c   : > { %6659 = vmatpush3.bf16.msra.mxu1 %v6656_v41  ;;  %v5543_v41 = vld [vmem:[%s8281_s20 + $0xc8] sm:$0xff] }
 0x66d   : > { %6661 = vmatprep.subr.bf16.mxu1 %v6660_v9  ;;  %v6684_v7 = vpack.c.bf16 %v5543_v41, %v5542_v6  ;;  %v2466_v6 = vld [vmem:[%s8298_s5 + $0x40] sm:$0xff]  ;;  %v2460_v41 = vld [vmem:[%s8298_s5 + $0x10] sm:$0xff] }
 0x670   : > { %6663 = vmatpush3.bf16.msra.mxu1 %v6660_v9  ;;  %v5545_v9 = vld [vmem:[%s8281_s20 + $0xd8] sm:$0xff] }
 0x671   : > { %6665 = vmatprep.subr.bf16.mxu1 %v6664_v13  ;;  %v6688_v11 = vpack.c.bf16 %v5545_v9, %v5544_v8  ;;  %v2468_v8 = vld [vmem:[%s8298_s5 + $0x50] sm:$0xff] }
 0x674   : > { %6667 = vmatpush3.bf16.msra.mxu1 %v6664_v13  ;;  %v5547_v13 = vld [vmem:[%s8281_s20 + $0xe8] sm:$0xff] }
 0x677   : > { %6384 = vmatmul.mubr.f32.vlgmr.msra.gmra.mrb[12].mxu1 %v8390_v19  ;;  %v1841_v19 = vrot.slane %v8445_v44, %v8379_v35 }
 0x706   : > { %v8504_v16 = vpop.f32.mrb[6].mxu1 }
 0x707   : > { %v6275_v17 = vpop.f32.mrb[7].mxu1 }
 0x708   : > { %v6692_v17 = vpack.c.bf16 %v5547_v13, %v5546_v12  ;;  %v5556_v12 = vcombine.high %v2460_v41, %v2468_v8  ;;  %v2474_v13 = vld [vmem:[%s8298_s5 + $0x80] sm:$0xff] }
 0x70a   : > { %v8506_v18 = vpop.f32.mrb[8].mxu1 }
 0x70b   : > { %v6280_v20 = vpop.f32.mrb[9].mxu1 }
 0x70c   : > { %v5548_v20 = vld [vmem:[%s8281_s20 + $0xf0] sm:$0xff] }
 0x72a   : > { %v6315_v23 = vpop.f32.mrb[10].mxu1 }
 0x72b   : > { %v1716_v24 = vpop.f32.mrb[11].mxu1  ;;  %v1722_v27 = vadd.f32 %v6315_v23, %v1649_v21 }
 0x72c   : > { %v1717_v26 = vadd.f32 %v1716_v24, %v1649_v21  ;;  %v5549_v21 = vld [vmem:[%s8281_s20 + $0xf8] sm:$0xff]  ;;  %v1613_v24 = vld [vmem:[%s8281_s20] sm:$0xff] }
 0x72d   : > { %v6696_v23 = vpack.c.bf16 %v5549_v21, %v5548_v20  ;;  %v2476_v20 = vld [vmem:[%s8298_s5 + $0x90] sm:$0xff] }
 0x72e   : > { %6389 = vmatmul.mubr.f32.vlgmr.msra.gmra.mrb[6].mxu0 %v1717_v26  ;;  %v1614_v26 = vld [vmem:[%s8281_s20 + $0x8] sm:$0xff] }
 0x72f   : > { %6392 = vmatpush3.xpose.msra.mxu0 %v8451_v51  ;;  %6393 = vmatprep.mubr.msk.f32.mxu0 %vm7624_vm5, %v7623_v14 }
 0x730   : > { %6396 = vmatprep.subr.mxu0 %v7623_v14 }
 0x732   : > { %6394 = vmatmul.mubr.f32.vlgmr.msra.gmra.mrb[8].mxu0 %v1722_v27  ;;  %v6700_v27 = vpack.c.bf16 %v1614_v26, %v1613_v24 }
 0x733   : > { %6398 = vmatprep.mubr.msk.f32.mxu0 %vm7624_vm5, %v7623_v14 }
 0x74a   : > { %v6385_v32 = vpop.f32.mrb[12].mxu1 }
 0x74b   : > { %v1914_v28 = vadd.f32 %v6385_v32, %v1841_v19  ;;  %v1908_v29 = vpop.f32.mrb[13].mxu1  ;;  %v1615_v32 = vld [vmem:[%s8281_s20 + $0x10] sm:$0xff] }
 0x74c   : > { %v1909_v30 = vadd.f32 %v1908_v29, %v1841_v19 }
 0x74e   : > { %6397 = vmatpush3.msra.mxu0 %v1909_v30 }
 0x74f   : > { %6401 = vmatprep.subr.mxu0 %v7623_v14 }
 0x801   : > { %v1983_v51 = vpop.f32.mrb[6].mxu0 }
 0x802   : > { %v2057_v33 = vmul.f32 0.2, %v1983_v51  ;;  %v6390_v34 = vpop.f32.mrb[7].mxu0 }
 0x803   : > { %v1618_v34 = vld [vmem:[%s8281_s20 + $0x28] sm:$0xff] }
 0x804   : > { %v2059_v10 = vadd.f32 %v8454_v55, %v2057_v33  ;;  %v1617_v33 = vld [vmem:[%s8281_s20 + $0x20] sm:$0xff] }
 0x805   : > { %v2053_v36 = vpop.f32.mrb[8].mxu0 }
 0x806   : > { %v2058_v37 = vmul.f32 0.2, %v2053_v36  ;;  %v6395_v38 = vpop.f32.mrb[9].mxu0  ;;  %v2061_v39 = vsel %vm1444_vm6, %v2059_v10, -inf  ;;  %v6708_v36 = vpack.c.bf16 %v1618_v34, %v1617_v33 }
 0x807   : > { %2062 = vmax.xlane.f32.xlu0 %v2061_v39  ;;  %v1620_v38 = vld [vmem:[%s8281_s20 + $0x38] sm:$0xff] }
 0x808   : > { %v2060_v44 = vadd.f32 %v8457_v60, %v2058_v37  ;;  %v1619_v37 = vld [vmem:[%s8281_s20 + $0x30] sm:$0xff] }
 0x809   : > { %v6712_v39 = vpack.c.bf16 %v1620_v38, %v1619_v37  ;;  %v2508_v37 = vld [vmem:[%s8298_s5 + $0x190] sm:$0xff] }
 0x80a   : > { %v2064_v40 = vsel %vm1444_vm6, %v2060_v44, -inf }
 0x80b   : > { %2065 = vmax.xlane.f32.xlu1 %v2064_v40  ;;  %v1622_v40 = vld [vmem:[%s8281_s20 + $0x48] sm:$0xff] }
 0x894   : > { %v2063_v42 = vpop.xlane.xlu0 %2062 }
 0x895   : > { %v2067_v43 = vsub.f32 %v2059_v10, %v2063_v42 }
 0x897   : > { %v2069_v45 = vmul.f32 1.442695, %v2067_v43  ;;  %v1623_v43 = vld [vmem:[%s8281_s20 + $0x50] sm:$0xff] }
 0x898   : > { %v2066_v46 = vpop.xlane.xlu1 %2065 }
 0x899   : > { %7032 = vpow2.f32 %v2069_v45  ;;  %v2068_v47 = vsub.f32 %v2060_v44, %v2066_v46  ;;  %v1621_v44 = vld [vmem:[%s8281_s20 + $0x40] sm:$0xff]  ;;  %v1624_v45 = vld [vmem:[%s8281_s20 + $0x58] sm:$0xff] }
 0x89a   : > { %v6716_v42 = vpack.c.bf16 %v1622_v40, %v1621_v44  ;;  %v1625_v46 = vld [vmem:[%s8281_s20 + $0x60] sm:$0xff] }
 0x89b   : > { %v2071_v55 = vmul.f32 1.442695, %v2068_v47  ;;  %v1626_v47 = vld [vmem:[%s8281_s20 + $0x68] sm:$0xff] }
 0x89d   : > { %7034 = vpow2.f32 %v2071_v55  ;;  %v6724_v55 = vpack.c.bf16 %v1626_v47, %v1625_v46  ;;  %v2532_v47 = vld [vmem:[%s8298_s5 + $0x250] sm:$0xff] }
 0x8a3   : > { %v7033_v48 = vpop.eup %7032 }
 0x8a4   : > { %v2073_v22 = vsel %vm1444_vm6, %v7033_v48, 0.0 }
 0x8a5   : > { %2074 = vadd.xlane.f32.xlu0 %v2073_v22  ;;  %v1628_v22 = vld [vmem:[%s8281_s20 + $0x78] sm:$0xff] }
 0x8a7   : > { %v7035_v60 = vpop.eup %7034 }
 0x8a8   : > { %v2076_v49 = vsel %vm1444_vm6, %v7035_v60, 0.0 }
 0x8a9   : > { %2077 = vadd.xlane.f32.xlu1 %v2076_v49 }
 0x932   : > { %v2075_v50 = vpop.xlane.xlu0 %2074 }
 0x933   : > { %7036 = vrcp.f32 %v2075_v50  ;;  %v5550_v50 = vld [vmem:[%s796_s6] ss:$0 sm:$0xff] }
 0x936   : > { %v2078_v52 = vpop.xlane.xlu1 %2077 }
 0x937   : > { %7038 = vrcp.f32 %v2078_v52  ;;  %v7048_v52 = vld [vmem:[#allocation2 + $0x8] sm:$0xff] }
 0x93d   : > { %v7037_v56 = vpop.eup %7036 }
 0x93e   : > { %v2081_v57 = vmul.f32 %v7037_v56, %v7033_v48  ;;  %v1627_v48 = vld [vmem:[%s8281_s20 + $0x70] sm:$0xff]  ;;  %v7049_v56 = vld [vmem:[#allocation2] sm:$0xff] }
 0x940   : > { %6399 = vmatmul.mubr.msk.f32.vlgmr.msra.gmra.mrb[10].mxu0 %vm1444_vm6, %v2081_v57 }
 0x941   : > { %v7039_v62 = vpop.eup %7038  ;;  %6402 = vmatpush3.msra.mxu0 %v1914_v28  ;;  %6403 = vmatprep.mubr.msk.f32.mxu0 %vm7624_vm5, %v7623_v14  ;;  %v6680_v14 = vpack.c.bf16 %v5541_v5, %v5540_v4  ;;  %v1616_v28 = vld [vmem:[%s8281_s20 + $0x18] sm:$0xff] }
 0x942   : > { %v2082_v63 = vmul.f32 %v7039_v62, %v7035_v60  ;;  %6669 = vmatprep.subr.bf16.mxu0 %v6668_v58  ;;  %v6704_v30 = vpack.c.bf16 %v1616_v28, %v1615_v32  ;;  %v6728_v60 = vpack.c.bf16 %v1628_v22, %v1627_v48  ;;  %v2498_v32 = vld [vmem:[%s8298_s5 + $0x140] sm:$0xff]  ;;  %v2492_v28 = vld [vmem:[%s8298_s5 + $0x110] sm:$0xff] }
 0x944   : > { %6404 = vmatmul.mubr.msk.f32.vlgmr.msra.gmra.mrb[12].mxu0 %vm1444_vm6, %v2082_v63 }
 0x945   : > { %6671 = vmatpush3.bf16.msra.mxu0 %v6668_v58 }
 0x946   : > { %6673 = vmatprep.subr.bf16.mxu0 %v6672_v0 }
 0x949   : > { %6675 = vmatpush3.bf16.msra.mxu0 %v6672_v0 }
 0x94a   : > { %6677 = vmatprep.subr.bf16.mxu0 %v6676_v3 }
 0x94d   : > { %6679 = vmatpush3.bf16.msra.mxu0 %v6676_v3 }
 0x94e   : > { %6681 = vmatprep.subr.bf16.mxu0 %v6680_v14 }
 0x951   : > { %6683 = vmatpush3.bf16.msra.mxu0 %v6680_v14  ;;  %v2458_v14 = vld [vmem:[%s8298_s5] sm:$0xff] }
 0x952   : > { %6685 = vmatprep.subr.bf16.mxu0 %v6684_v7  ;;  %v5551_v9 = vcombine.low %v2458_v14, %v2466_v6 }
 0x955   : > { %6687 = vmatpush3.bf16.msra.mxu0 %v6684_v7  ;;  %v5552_v7 = vcombine.high %v2458_v14, %v2466_v6  ;;  %v2570_v14 = vld [vmem:[%s8298_s5 + $0x380] sm:$0xff] }
 0x956   : > { %6689 = vmatprep.subr.bf16.mxu0 %v6688_v11  ;;  %v2578_v6 = vld [vmem:[%s8298_s5 + $0x3c0] sm:$0xff] }
 0x957   : > { %3310 = vmatprep.subr.bf16.mxu1 %v5552_v7  ;;  %v5664_v7 = vcombine.high %v2570_v14, %v2578_v6 }
 0x958   : > { %3311 = vmatpush1.bf16.msra.mxu1 %v5551_v9  ;;  %v5663_v9 = vcombine.low %v2570_v14, %v2578_v6 }
 0x959   : > { %6691 = vmatpush3.bf16.msra.mxu0 %v6688_v11  ;;  %v5555_v11 = vcombine.low %v2460_v41, %v2468_v8  ;;  %v2572_v41 = vld [vmem:[%s8298_s5 + $0x390] sm:$0xff] }
 0x95a   : > { %6693 = vmatprep.subr.bf16.mxu0 %v6692_v17  ;;  %v2580_v8 = vld [vmem:[%s8298_s5 + $0x3d0] sm:$0xff] }
 0x95d   : > { %6695 = vmatpush3.bf16.msra.mxu0 %v6692_v17  ;;  %v2482_v17 = vld [vmem:[%s8298_s5 + $0xc0] sm:$0xff] }
 0x95e   : > { %6697 = vmatprep.subr.bf16.mxu0 %v6696_v23  ;;  %v5568_v21 = vcombine.high %v2474_v13, %v2482_v17  ;;  %v5567_v24 = vcombine.low %v2474_v13, %v2482_v17  ;;  %v8616_v13 = vld [vmem:[%s8298_s5 + $0x8] sm:$0xff] }
 0x95f   : > { %v8619_v17 = vld [vmem:[%s8298_s5 + $0x48] sm:$0xff] }
 0x960   : > { %3312 = vmatprep.subr.bf16.mxu1 %v5568_v21  ;;  %v7625_v21 = vmov 0  }
 0x961   : > { %6699 = vmatpush3.bf16.msra.mxu0 %v6696_v23  ;;  %v2484_v23 = vld [vmem:[%s8298_s5 + $0xd0] sm:$0xff]  ;;  %3313 = vmatpush1.bf16.msra.mxu1 %v5567_v24  ;;  %v5554_v24 = vcombine.high %v8616_v13, %v8619_v17 }
 0x962   : > { %6701 = vmatprep.subr.bf16.mxu0 %v6700_v27  ;;  %v5571_v26 = vcombine.low %v2476_v20, %v2484_v23  ;;  %3342 = vmatprep.mubr.bf16.mxu1 %v7625_v21 }
 0xa13   : > { %v2152_v19 = vpop.f32.mrb[10].mxu0 }
 0xa14   : > { %v6400_v29 = vpop.f32.mrb[11].mxu0  ;;  %6438 = vmatprep.mubr.f32.mxu0 %v2152_v19  ;;  %v2490_v19 = vld [vmem:[%s8298_s5 + $0x100] sm:$0xff] }
 0xa15   : > { %v5584_v29 = vcombine.high %v2490_v19, %v2498_v32 }
 0xa17   : > { %v2225_v51 = vpop.f32.mrb[12].mxu0  ;;  %3314 = vmatprep.subr.bf16.mxu1 %v5584_v29 }
 0xa18   : > { %v6405_v10 = vpop.f32.mrb[13].mxu0  ;;  %6439 = vmatmul.mubr.f32.vlgmr.msra.gmra.mrb[14].mxu0 %v2225_v51  ;;  %v5583_v51 = vcombine.low %v2490_v19, %v2498_v32 }
 0xa19   : > { %6703 = vmatpush3.bf16.msra.mxu0 %v6700_v27  ;;  %6473 = vmatprep.mubr.f32.mxu0 %v8504_v16  ;;  %v6720_v16 = vpack.c.bf16 %v1624_v45, %v1623_v43  ;;  %v5572_v27 = vcombine.high %v2476_v20, %v2484_v23  ;;  %v2506_v10 = vld [vmem:[%s8298_s5 + $0x180] sm:$0xff]  ;;  %v5553_v23 = vcombine.low %v8616_v13, %v8619_v17 }
 0xa1a   : > { %6705 = vmatprep.subr.bf16.mxu0 %v6704_v30  ;;  %3315 = vmatpush1.bf16.msra.mxu1 %v5583_v51  ;;  %v2522_v43 = vld [vmem:[%s8298_s5 + $0x200] sm:$0xff] }
 0xa1b   : > { %v2530_v45 = vld [vmem:[%s8298_s5 + $0x240] sm:$0xff] }
 0xa1c   : > { %v5616_v46 = vcombine.high %v2522_v43, %v2530_v45  ;;  %v8622_v20 = vld [vmem:[%s8298_s5 + $0x20] sm:$0xff] }
 0xa1d   : > { %6707 = vmatpush3.bf16.msra.mxu0 %v6704_v30  ;;  %v2500_v30 = vld [vmem:[%s8298_s5 + $0x150] sm:$0xff] }
 0xa1e   : > { %6709 = vmatprep.subr.bf16.mxu0 %v6708_v36  ;;  %v5587_v33 = vcombine.low %v2492_v28, %v2500_v30  ;;  %v5588_v34 = vcombine.high %v2492_v28, %v2500_v30 }
 0xa21   : > { %6711 = vmatpush3.bf16.msra.mxu0 %v6708_v36  ;;  %v2514_v36 = vld [vmem:[%s8298_s5 + $0x1c0] sm:$0xff] }
 0xa22   : > { %6713 = vmatprep.subr.bf16.mxu0 %v6712_v39  ;;  %v5600_v38 = vcombine.high %v2506_v10, %v2514_v36  ;;  %v5599_v44 = vcombine.low %v2506_v10, %v2514_v36 }
 0xa24   : > { %3316 = vmatprep.subr.bf16.mxu1 %v5600_v38 }
 0xa25   : > { %6715 = vmatpush3.bf16.msra.mxu0 %v6712_v39  ;;  %v2516_v39 = vld [vmem:[%s8298_s5 + $0x1d0] sm:$0xff]  ;;  %3317 = vmatpush1.bf16.msra.mxu1 %v5599_v44 }
 0xa26   : > { %6717 = vmatprep.subr.bf16.mxu0 %v6716_v42  ;;  %v5603_v40 = vcombine.low %v2508_v37, %v2516_v39  ;;  %3318 = vmatprep.subr.bf16.mxu1 %v5616_v46  ;;  %v7050_v46 = vld [vmem:[%s8262_s16] sm:$0xf] }
 0xa29   : > { %6719 = vmatpush3.bf16.msra.mxu0 %v6716_v42  ;;  %v5604_v42 = vcombine.high %v2508_v37, %v2516_v39 }
 0xa2a   : > { %6721 = vmatprep.subr.bf16.mxu0 %v6720_v16 }
 0xa2d   : > { %6723 = vmatpush3.bf16.msra.mxu0 %v6720_v16  ;;  %v2524_v16 = vld [vmem:[%s8298_s5 + $0x210] sm:$0xff] }
 0xa2e   : > { %6725 = vmatprep.subr.bf16.mxu0 %v6724_v55  ;;  %v5619_v48 = vcombine.low %v2524_v16, %v2532_v47  ;;  %v5620_v22 = vcombine.high %v2524_v16, %v2532_v47  ;;  %v8637_v16 = vsub.s32 3, %v8371_v25 }
 0xa31   : > { %6727 = vmatpush3.bf16.msra.mxu0 %v6724_v55  ;;  %v5615_v55 = vcombine.low %v2522_v43, %v2530_v45  ;;  %v8634_v45 = vsub.s32 2, %v8371_v25 }
 0xa32   : > { %6729 = vmatprep.subr.bf16.mxu0 %v6728_v60 }
 0xa33   : > { %3319 = vmatpush1.bf16.msra.mxu1 %v5615_v55  ;;  %v2446_v47 = vrot.slane %v7050_v46, %v8634_v45  ;;  %v2454_v55 = vrot.slane %v7050_v46, %v8637_v16 }
 0xa35   : > { %6731 = vmatpush3.bf16.msra.mxu0 %v6728_v60  ;;  %v2538_v60 = vld [vmem:[%s8298_s5 + $0x280] sm:$0xff] }
 0xa36   : > { %3396 = vmatprep.subr.bf16.mxu0 %v5556_v12  ;;  %v5668_v12 = vcombine.high %v2572_v41, %v2580_v8 }
 0xa38   : > { %6474 = vmatmul.mubr.f32.vlgmr.msra.gmra.mrb[14].mxu0 %v8506_v18 }
 0xa39   : > { %3397 = vmatpush1.bf16.msra.mxu0 %v5555_v11  ;;  %v5667_v11 = vcombine.low %v2572_v41, %v2580_v8  ;;  %3428 = vmatprep.mubr.bf16.mxu0 %v7625_v21  ;;  %v2515_v8 = vld [vmem:[%s8298_s5 + $0x1c8] sm:$0xff] }
 0xa3a   : > { %3398 = vmatprep.subr.bf16.mxu0 %v5572_v27 }
 0xa3d   : > { %3399 = vmatpush1.bf16.msra.mxu0 %v5571_v26  ;;  %v2470_v26 = vld [vmem:[%s8298_s5 + $0x60] sm:$0xff] }
 0xa3e   : > { %3400 = vmatprep.subr.bf16.mxu0 %v5588_v34  ;;  %v5559_v27 = vcombine.low %v8622_v20, %v2470_v26  ;;  %v5560_v19 = vcombine.high %v8622_v20, %v2470_v26  ;;  %v2526_v26 = vld [vmem:[%s8298_s5 + $0x220] sm:$0xff] }
 0xa41   : > { %3401 = vmatpush1.bf16.msra.mxu0 %v5587_v33 }
 0xa42   : > { %3402 = vmatprep.subr.bf16.mxu0 %v5604_v42 }
 0xa45   : > { %3403 = vmatpush1.bf16.msra.mxu0 %v5603_v40 }
 0xa46   : > { %3404 = vmatprep.subr.bf16.mxu0 %v5620_v22 }
 0xa49   : > { %3405 = vmatpush1.bf16.msra.mxu0 %v5619_v48 }
 0xb0b   : > { %v6475_v49 = vpop.f32.mrb[14].mxu0 }
 0xb0c   : > { %v2397_v53 = vadd.f32 %v7048_v52, %v6475_v49  ;;  %v2387_v54 = vpop.f32.mrb[15].mxu0  ;;  %v2546_v49 = vld [vmem:[%s8298_s5 + $0x2c0] sm:$0xff] }
 0xb0d   : > { %v2396_v57 = vadd.f32 %v7049_v56, %v2387_v54  ;;  %v5632_v52 = vcombine.high %v2538_v60, %v2546_v49  ;;  %v5631_v54 = vcombine.low %v2538_v60, %v2546_v49 }
 0xb0e   : > { %v8565_v58 = vadd.f32 %v5550_v50, %v2397_v53  ;;  %v2548_v53 = vld [vmem:[%s8298_s5 + $0x2d0] sm:$0xff] }
 0xb0f   : > { %v8567_v59 = vadd.f32 %v5550_v50, %v2396_v57  ;;  %v2540_v50 = vld [vmem:[%s8298_s5 + $0x290] sm:$0xff]  ;;  %3320 = vmatprep.subr.bf16.mxu1 %v5632_v52 }
 0xb10   : > { %2409 = vadd.xlane.f32.xlu1 %v8565_v58  ;;  %v5635_v56 = vcombine.low %v2540_v50, %v2548_v53  ;;  %v5636_v57 = vcombine.high %v2540_v50, %v2548_v53  ;;  %3321 = vmatpush1.bf16.msra.mxu1 %v5631_v54  ;;  %v2475_v53 = vld [vmem:[%s8298_s5 + $0x88] sm:$0xff] }
 0xb11   : > { %2407 = vadd.xlane.f32.xlu0 %v8567_v59 }
 0xb12   : > { %3406 = vmatprep.subr.bf16.mxu0 %v5636_v57  ;;  %v2478_v57 = vld [vmem:[%s8298_s5 + $0xa0] sm:$0xff] }
 0xb13   : > { %3407 = vmatpush1.bf16.msra.mxu0 %v5635_v56  ;;  %v2483_v56 = vld [vmem:[%s8298_s5 + $0xc8] sm:$0xff] }
 0xb9d   : > { %v2410_v18 = vpop.xlane.xlu1 %2409 }
 0xb9e   : > { %v2412_v61 = vmul.f32 0.02, %v2410_v18  ;;  %v2408_v62 = vpop.xlane.xlu0 %2407  ;;  %v2554_v18 = vld [vmem:[%s8298_s5 + $0x300] sm:$0xff] }
 0xb9f   : > { %v2411_v63 = vmul.f32 0.02, %v2408_v62  ;;  %v2556_v62 = vld [vmem:[%s8298_s5 + $0x310] sm:$0xff] }
 0xba0   : > { %v2414_v0 = vsub.f32 %v8565_v58, %v2412_v61  ;;  %v2562_v61 = vld [vmem:[%s8298_s5 + $0x340] sm:$0xff] }
 0xba1   : > { %v2413_v1 = vsub.f32 %v8567_v59, %v2411_v63  ;;  %v5648_v63 = vcombine.high %v2554_v18, %v2562_v61 }
 0xba2   : > { %v8574_v2 = vmul.f32 %v8323_v15, %v2414_v0  ;;  %v2564_v0 = vld [vmem:[%s8298_s5 + $0x350] sm:$0xff] }
 0xba3   : > { %v8577_v3 = vmul.f32 %v8323_v15, %v2413_v1  ;;  %v5647_v1 = vcombine.low %v2554_v18, %v2562_v61  ;;  %3322 = vmatprep.subr.bf16.mxu1 %v5648_v63  ;;  %v2486_v18 = vld [vmem:[%s8298_s5 + $0xe0] sm:$0xff]  ;;  %v5570_v63 = vcombine.high %v2475_v53, %v2483_v56 }
 0xba4   : > { %v2418_v4 = vmul.f32 %v8574_v2, %v8574_v2  ;;  %v2448_v48 = vmul.f32 %v2446_v47, %v8574_v2  ;;  %v5576_v2 = vcombine.high %v2478_v57, %v2486_v18  ;;  %v5575_v14 = vcombine.low %v2478_v57, %v2486_v18  ;;  %v2469_v57 = vld [vmem:[%s8298_s5 + $0x58] sm:$0xff]  ;;  %v2464_v18 = vld [vmem:[%s8298_s5 + $0x30] sm:$0xff] }
 0xba5   : > { %v2417_v5 = vmul.f32 %v8577_v3, %v8577_v3  ;;  %3323 = vmatpush1.bf16.msra.mxu1 %v5647_v1  ;;  %v2447_v60 = vmul.f32 %v2446_v47, %v8577_v3  ;;  %v2499_v1 = vld [vmem:[%s8298_s5 + $0x148] sm:$0xff]  ;;  %v2494_v3 = vld [vmem:[%s8298_s5 + $0x120] sm:$0xff] }
 0xba6   : > { %2421 = vadd.xlane.f32.xlu1 %v2418_v4  ;;  %v5651_v4 = vcombine.low %v2556_v62, %v2564_v0  ;;  %3324 = vmatprep.subr.bf16.mxu1 %v5664_v7  ;;  %v2507_v7 = vld [vmem:[%s8298_s5 + $0x188] sm:$0xff] }
 0xba7   : > { %2419 = vadd.xlane.f32.xlu0 %v2417_v5  ;;  %v5652_v5 = vcombine.high %v2556_v62, %v2564_v0  ;;  %v2491_v0 = vld [vmem:[%s8298_s5 + $0x108] sm:$0xff]  ;;  %v5602_v17 = vcombine.high %v2507_v7, %v2515_v8 }
 0xba8   : > { %v5586_v6 = vcombine.high %v2491_v0, %v2499_v1 }
 0xba9   : > { %3408 = vmatprep.subr.bf16.mxu0 %v5652_v5  ;;  %3325 = vmatpush1.bf16.msra.mxu1 %v5663_v9  ;;  %v5569_v5 = vcombine.low %v2475_v53, %v2483_v56  ;;  %v2510_v9 = vld [vmem:[%s8298_s5 + $0x1a0] sm:$0xff]  ;;  %v2461_v56 = vld [vmem:[%s8298_s5 + $0x18] sm:$0xff] }
 0xbaa   : > { %3409 = vmatpush1.bf16.msra.mxu0 %v5651_v4  ;;  %3353 = vmatprep.subr.bf16.mxu1 %v5554_v24  ;;  %v2502_v4 = vld [vmem:[%s8298_s5 + $0x160] sm:$0xff]  ;;  %v2531_v24 = vld [vmem:[%s8298_s5 + $0x248] sm:$0xff] }
 0xbab   : > { %3410 = vmatprep.subr.bf16.mxu0 %v5668_v12  ;;  %v5592_v41 = vcombine.high %v2494_v3, %v2502_v4  ;;  %v5585_v12 = vcombine.low %v2491_v0, %v2499_v1  ;;  %v5591_v13 = vcombine.low %v2494_v3, %v2502_v4  ;;  %v5558_v0 = vcombine.high %v2461_v56, %v2469_v57  ;;  %v2477_v3 = vld [vmem:[%s8298_s5 + $0x98] sm:$0xff] }
 0xbac   : > { %v2485_v4 = vld [vmem:[%s8298_s5 + $0xd8] sm:$0xff] }
 0xbae   : > { %3411 = vmatpush1.bf16.msra.mxu0 %v5667_v11  ;;  %v2518_v11 = vld [vmem:[%s8298_s5 + $0x1e0] sm:$0xff] }
 0xbaf   : > { %3482 = vmatprep.subr.bf16.mxu0 %v5560_v19  ;;  %v5608_v20 = vcombine.high %v2510_v9, %v2518_v11  ;;  %v5601_v19 = vcombine.low %v2507_v7, %v2515_v8  ;;  %v5574_v7 = vcombine.high %v2477_v3, %v2485_v4 }
 0xc33   : > { %v2422_v32 = vpop.xlane.xlu1 %2421 }
 0xc34   : > { %v2424_v28 = vmul.f32 0.020408163, %v2422_v32  ;;  %v2420_v29 = vpop.xlane.xlu0 %2419  ;;  %v5607_v32 = vcombine.low %v2510_v9, %v2518_v11  ;;  %v2493_v9 = vld [vmem:[%s8298_s5 + $0x118] sm:$0xff] }
 0xc35   : > { %v2423_v30 = vmul.f32 0.020408163, %v2420_v29  ;;  %v2501_v11 = vld [vmem:[%s8298_s5 + $0x158] sm:$0xff] }
 0xc36   : > { %7040 = vrsqrt.f32 %v2424_v28  ;;  %vm2434_vm7 = vcmp.eq.f32.partialorder %v2424_v28, inf  ;;  %v2437_v10 = vand.u32 2147483648, %v2424_v28  ;;  %vm2436_vm8 = vcmp.eq.f32.partialorder %v2424_v28, 0.0 }
 0xc37   : > { %7042 = vrsqrt.f32 %v2423_v30  ;;  %vm2427_vm9 = vcmp.eq.f32.partialorder %v2423_v30, inf  ;;  %v2430_v38 = vand.u32 2147483648, %v2423_v30  ;;  %vm2429_vm10 = vcmp.eq.f32.partialorder %v2423_v30, 0.0 }
 0xc40   : > { %v7041_v51 = vpop.eup %7040 }
 0xc41   : > { %v7043_v33 = vpop.eup %7042  ;;  %v2433_v34 = vmul.f32 %v7041_v51, %v2424_v28  ;;  %v2547_v51 = vld [vmem:[%s8298_s5 + $0x2c8] sm:$0xff] }
 0xc42   : > { %v2426_v36 = vmul.f32 %v7043_v33, %v2423_v30  ;;  %v2542_v33 = vld [vmem:[%s8298_s5 + $0x2a0] sm:$0xff] }
 0xc43   : > { %v2435_v37 = vsel %vm2434_vm7, %v2424_v28, %v2433_v34  ;;  %v2550_v34 = vld [vmem:[%s8298_s5 + $0x2e0] sm:$0xff] }
 0xc44   : > { %v2438_v39 = vsel %vm2436_vm8, %v2437_v10, %v2435_v37  ;;  %v2428_v44 = vsel %vm2427_vm9, %v2423_v30, %v2426_v36  ;;  %v2539_v30 = vld [vmem:[%s8298_s5 + $0x288] sm:$0xff]  ;;  %v5639_v46 = vcombine.low %v2542_v33, %v2550_v34 }
 0xc45   : > { %v2440_v40 = vadd.f32 1e-06, %v2438_v39  ;;  %v2431_v42 = vsel %vm2429_vm10, %v2430_v38, %v2428_v44  ;;  %v5634_v37 = vcombine.high %v2539_v30, %v2547_v51  ;;  %v5640_v38 = vcombine.high %v2542_v33, %v2550_v34  ;;  %v2555_v39 = vld [vmem:[%s8298_s5 + $0x308] sm:$0xff]  ;;  %v2525_v33 = vld [vmem:[%s8298_s5 + $0x218] sm:$0xff] }
 0xc46   : > { %v2439_v43 = vadd.f32 1e-06, %v2431_v42  ;;  %v2563_v44 = vld [vmem:[%s8298_s5 + $0x348] sm:$0xff]  ;;  %v2566_v42 = vld [vmem:[%s8298_s5 + $0x360] sm:$0xff]  ;;  %v2533_v34 = vld [vmem:[%s8298_s5 + $0x258] sm:$0xff] }
 0xc47   : > { %7044 = vrcp.f32 %v2440_v40  ;;  %v2558_v40 = vld [vmem:[%s8298_s5 + $0x320] sm:$0xff]  ;;  %v5650_v47 = vcombine.high %v2555_v39, %v2563_v44 }
 0xc48   : > { %7046 = vrcp.f32 %v2439_v43  ;;  %v5633_v43 = vcombine.low %v2539_v30, %v2547_v51 }
 0xc51   : > { %v7045_v22 = vpop.eup %7044 }
 0xc52   : > { %v7047_v49 = vpop.eup %7046  ;;  %v2450_v50 = vmul.f32 %v7045_v22, %v2448_v48  ;;  %v2571_v48 = vld [vmem:[%s8298_s5 + $0x388] sm:$0xff] }
 0xc53   : > { %v2449_v52 = vmul.f32 %v7047_v49, %v2447_v60  ;;  %v2579_v22 = vld [vmem:[%s8298_s5 + $0x3c8] sm:$0xff]  ;;  %v2574_v60 = vld [vmem:[%s8298_s5 + $0x3a0] sm:$0xff] }
 0xc54   : > { %v2456_v54 = vadd.f32 %v2454_v55, %v2450_v50  ;;  %v2582_v49 = vld [vmem:[%s8298_s5 + $0x3e0] sm:$0xff]  ;;  %v5649_v50 = vcombine.low %v2555_v39, %v2563_v44  ;;  %v5666_v53 = vcombine.high %v2571_v48, %v2579_v22  ;;  %v5622_v39 = vcombine.high %v2525_v33, %v2533_v34 }
 0xc55   : > { %v2455_v61 = vadd.f32 %v2454_v55, %v2449_v52  ;;  %v5656_v55 = vcombine.high %v2558_v40, %v2566_v42  ;;  %v5655_v52 = vcombine.low %v2558_v40, %v2566_v42  ;;  %v2541_v40 = vld [vmem:[%s8298_s5 + $0x298] sm:$0xff] }
 0xc56   : > { %v2549_v42 = vld [vmem:[%s8298_s5 + $0x2d8] sm:$0xff] }
 0xc57   : > { %v8648_v62 = vpack.c.bf16 %v2456_v54, %v2455_v61  ;;  %v5672_v54 = vcombine.high %v2574_v60, %v2582_v49  ;;  %v2472_v61 = vld [vmem:[%s8298_s5 + $0x70] sm:$0xff] }
 0xc58   : > { %v5564_v1 = vcombine.high %v2464_v18, %v2472_v61 }
 0xc59   : > { %3343 = vmatmul.mubr.bf16.vlgmr.msra.gmra.mrb[16].mxu1 %v8648_v62  ;;  %3429 = vmatmul.mubr.bf16.vlgmr.msra.gmra.mrb[16].mxu0 %v8648_v62 }
 0xc5a   : > { %3354 = vmatpush1.bf16.msra.mxu1 %v5553_v23  ;;  %3483 = vmatpush1.bf16.msra.mxu0 %v5559_v27  ;;  %v2523_v23 = vld [vmem:[%s8298_s5 + $0x208] sm:$0xff]  ;;  %v2534_v27 = vld [vmem:[%s8298_s5 + $0x260] sm:$0xff] }
 0xc5b   : > { %3355 = vmatprep.subr.bf16.mxu1 %v5570_v63  ;;  %3484 = vmatprep.subr.bf16.mxu0 %v5576_v2  ;;  %v5618_v28 = vcombine.high %v2523_v23, %v2531_v24  ;;  %v5624_v29 = vcombine.high %v2526_v26, %v2534_v27  ;;  %v5617_v10 = vcombine.low %v2523_v23, %v2531_v24 }
 0xc5c   : > { %3385 = vmatprep.mubr.bf16.mxu1 %v7625_v21  ;;  %3514 = vmatprep.mubr.bf16.mxu0 %v7625_v21  ;;  %v5623_v36 = vcombine.low %v2526_v26, %v2534_v27  ;;  %v5665_v63 = vcombine.low %v2571_v48, %v2579_v22  ;;  %v5671_v2 = vcombine.low %v2574_v60, %v2582_v49  ;;  %v2509_v26 = vld [vmem:[%s8298_s5 + $0x198] sm:$0xff] }
 0xc5d   : > { %v5590_v23 = vcombine.high %v2493_v9, %v2501_v11  ;;  %v2517_v27 = vld [vmem:[%s8298_s5 + $0x1d8] sm:$0xff]  ;;  %v5638_v48 = vcombine.high %v2541_v40, %v2549_v42 }
 0xc5e   : > { %3356 = vmatpush1.bf16.msra.mxu1 %v5569_v5  ;;  %3485 = vmatpush1.bf16.msra.mxu0 %v5575_v14  ;;  %v2480_v5 = vld [vmem:[%s8298_s5 + $0xb0] sm:$0xff]  ;;  %v5606_v30 = vcombine.high %v2509_v26, %v2517_v27  ;;  %v2557_v60 = vld [vmem:[%s8298_s5 + $0x318] sm:$0xff] }
 0xc5f   : > { %3357 = vmatprep.subr.bf16.mxu1 %v5586_v6  ;;  %3486 = vmatprep.subr.bf16.mxu0 %v5592_v41  ;;  %v2488_v14 = vld [vmem:[%s8298_s5 + $0xf0] sm:$0xff]  ;;  %v5557_v6 = vcombine.low %v2461_v56, %v2469_v57  ;;  %v5563_v41 = vcombine.low %v2464_v18, %v2472_v61  ;;  %v2565_v49 = vld [vmem:[%s8298_s5 + $0x358] sm:$0xff] }
 0xc60   : > { %v5580_v8 = vcombine.high %v2480_v5, %v2488_v14  ;;  %v5654_v56 = vcombine.high %v2557_v60, %v2565_v49  ;;  %v2573_v18 = vld [vmem:[%s8298_s5 + $0x398] sm:$0xff] }
 0xc61   : > { %v2581_v61 = vld [vmem:[%s8298_s5 + $0x3d8] sm:$0xff] }
 0xc62   : > { %3358 = vmatpush1.bf16.msra.mxu1 %v5585_v12  ;;  %3487 = vmatpush1.bf16.msra.mxu0 %v5591_v13  ;;  %v2496_v12 = vld [vmem:[%s8298_s5 + $0x130] sm:$0xff] }
 0xc63   : > { %3359 = vmatprep.subr.bf16.mxu1 %v5602_v17  ;;  %3488 = vmatprep.subr.bf16.mxu0 %v5608_v20  ;;  %v2504_v13 = vld [vmem:[%s8298_s5 + $0x170] sm:$0xff]  ;;  %v5573_v17 = vcombine.low %v2477_v3, %v2485_v4  ;;  %v5579_v20 = vcombine.low %v2480_v5, %v2488_v14  ;;  %v5670_v3 = vcombine.high %v2573_v18, %v2581_v61  ;;  %v2463_v5 = vld [vmem:[%s8298_s5 + $0x28] sm:$0xff] }
 0xc64   : > { %v5596_v24 = vcombine.high %v2496_v12, %v2504_v13  ;;  %v2471_v14 = vld [vmem:[%s8298_s5 + $0x68] sm:$0xff] }
 0xc66   : > { %3360 = vmatpush1.bf16.msra.mxu1 %v5601_v19  ;;  %3489 = vmatpush1.bf16.msra.mxu0 %v5607_v32  ;;  %v2512_v19 = vld [vmem:[%s8298_s5 + $0x1b0] sm:$0xff] }
 0xc67   : > { %3361 = vmatprep.subr.bf16.mxu1 %v5618_v28  ;;  %3490 = vmatprep.subr.bf16.mxu0 %v5624_v29  ;;  %v2520_v32 = vld [vmem:[%s8298_s5 + $0x1f0] sm:$0xff]  ;;  %v5589_v28 = vcombine.low %v2493_v9, %v2501_v11  ;;  %v5595_v29 = vcombine.low %v2496_v12, %v2504_v13  ;;  %v2479_v9 = vld [vmem:[%s8298_s5 + $0xa8] sm:$0xff]  ;;  %v5561_v12 = vcombine.low %v2463_v5, %v2471_v14 }
 0xc68   : > { %v5612_v51 = vcombine.high %v2512_v19, %v2520_v32  ;;  %v2487_v11 = vld [vmem:[%s8298_s5 + $0xe8] sm:$0xff] }
 0xc69   : > { %v5578_v13 = vcombine.high %v2479_v9, %v2487_v11 }
 0xc6a   : > { %3362 = vmatpush1.bf16.msra.mxu1 %v5617_v10  ;;  %3491 = vmatpush1.bf16.msra.mxu0 %v5623_v36  ;;  %v2528_v10 = vld [vmem:[%s8298_s5 + $0x230] sm:$0xff] }
 0xc6b   : > { %3363 = vmatprep.subr.bf16.mxu1 %v5634_v37  ;;  %3492 = vmatprep.subr.bf16.mxu0 %v5640_v38  ;;  %v2536_v36 = vld [vmem:[%s8298_s5 + $0x270] sm:$0xff]  ;;  %v5605_v37 = vcombine.low %v2509_v26, %v2517_v27  ;;  %v5611_v38 = vcombine.low %v2512_v19, %v2520_v32  ;;  %v5577_v26 = vcombine.low %v2479_v9, %v2487_v11  ;;  %v6891_v19 = vld [vmem:[%s8307_s9 + $0x8] sm:$0xff]  }
 0xc6c   : > { %v5628_v44 = vcombine.high %v2528_v10, %v2536_v36  ;;  %v2511_v32 = vld [vmem:[%s8298_s5 + $0x1a8] sm:$0xff] }
 0xc6e   : > { %3364 = vmatpush1.bf16.msra.mxu1 %v5633_v43  ;;  %3493 = vmatpush1.bf16.msra.mxu0 %v5639_v46  ;;  %v2544_v43 = vld [vmem:[%s8298_s5 + $0x2b0] sm:$0xff] }
 0xc6f   : > { %3365 = vmatprep.subr.bf16.mxu1 %v5650_v47  ;;  %3494 = vmatprep.subr.bf16.mxu0 %v5656_v55  ;;  %v2552_v46 = vld [vmem:[%s8298_s5 + $0x2f0] sm:$0xff]  ;;  %v5621_v47 = vcombine.low %v2525_v33, %v2533_v34  ;;  %v5627_v55 = vcombine.low %v2528_v10, %v2536_v36  ;;  %v2527_v34 = vld [vmem:[%s8298_s5 + $0x228] sm:$0xff]  ;;  %v6894_v36 = vld [vmem:[%s8307_s9 + $0x58] sm:$0xff]  }
 0xc70   : > { %v5644_v22 = vcombine.high %v2544_v43, %v2552_v46  ;;  %v6893_v33 = vld [vmem:[%s8307_s9 + $0x10] sm:$0xff]   ;;  %v2535_v10 = vld [vmem:[%s8298_s5 + $0x268] sm:$0xff] }
 0xc72   : > { %3366 = vmatpush1.bf16.msra.mxu1 %v5649_v50  ;;  %3495 = vmatpush1.bf16.msra.mxu0 %v5655_v52  ;;  %v2560_v50 = vld [vmem:[%s8298_s5 + $0x330] sm:$0xff] }
 0xc73   : > { %3367 = vmatprep.subr.bf16.mxu1 %v5666_v53  ;;  %3496 = vmatprep.subr.bf16.mxu0 %v5672_v54  ;;  %v2568_v52 = vld [vmem:[%s8298_s5 + $0x370] sm:$0xff]  ;;  %v5637_v53 = vcombine.low %v2541_v40, %v2549_v42  ;;  %v5643_v54 = vcombine.low %v2544_v43, %v2552_v46  ;;  %v2551_v40 = vld [vmem:[%s8298_s5 + $0x2e8] sm:$0xff]  ;;  %v6896_v42 = vld [vmem:[%s8307_s9 + $0x60] sm:$0xff]   ;;  %v5625_v43 = vcombine.low %v2527_v34, %v2535_v10 }
 0xc74   : > { %v5660_v57 = vcombine.high %v2560_v50, %v2568_v52 }
 0xc76   : > { %3368 = vmatpush1.bf16.msra.mxu1 %v5665_v63  ;;  %3497 = vmatpush1.bf16.msra.mxu0 %v5671_v2  ;;  %v2576_v63 = vld [vmem:[%s8298_s5 + $0x3b0] sm:$0xff] }
 0xc77   : > { %3439 = vmatprep.subr.bf16.mxu1 %v5558_v0  ;;  %3568 = vmatprep.subr.bf16.mxu0 %v5564_v1  ;;  %v2584_v2 = vld [vmem:[%s8298_s5 + $0x3f0] sm:$0xff]  ;;  %v5653_v0 = vcombine.low %v2557_v60, %v2565_v49  ;;  %v5659_v1 = vcombine.low %v2560_v50, %v2568_v52  ;;  %v6899_v50 = vld [vmem:[%s8307_s9 + $0x28] sm:$0xff]  }
 0xc78   : > { %v5676_v4 = vcombine.high %v2576_v63, %v2584_v2  ;;  %v2575_v52 = vld [vmem:[%s8298_s5 + $0x3a8] sm:$0xff] }
 0xc79   : > { %3386 = vmatmul.mubr.bf16.vlgmr.msra.gmra.mrb[20].mxu1 %v8648_v62  ;;  %3515 = vmatmul.mubr.bf16.vlgmr.msra.gmra.mrb[20].mxu0 %v8648_v62 }
 0xc7a   : > { %3440 = vmatpush1.bf16.msra.mxu1 %v5557_v6  ;;  %3569 = vmatpush1.bf16.msra.mxu0 %v5563_v41  ;;  %v5669_v6 = vcombine.low %v2573_v18, %v2581_v61  ;;  %v5675_v41 = vcombine.low %v2576_v63, %v2584_v2  ;;  %v6901_v18 = vld [vmem:[%s8307_s9 + $0x30] sm:$0xff]   ;;  %v2465_v61 = vld [vmem:[%s8298_s5 + $0x38] sm:$0xff] }
 0xc7b   : > { %3441 = vmatprep.subr.bf16.mxu1 %v5574_v7  ;;  %3570 = vmatprep.subr.bf16.mxu0 %v5580_v8  ;;  %v5562_v7 = vcombine.high %v2463_v5, %v2471_v14  ;;  %v6888_v8 = vld [vmem:[%s8307_s9 + $0x40] sm:$0xff]   ;;  %v2473_v63 = vld [vmem:[%s8298_s5 + $0x78] sm:$0xff] }
 0xc7c   : > { %3471 = vmatprep.mubr.bf16.mxu1 %v7625_v21  ;;  %3600 = vmatprep.mubr.bf16.mxu0 %v7625_v21  ;;  %v6902_v2 = vld [vmem:[%s8307_s9 + $0x78] sm:$0xff]   ;;  %v6905_v14 = vld [vmem:[%s8307_s9 + $0x140] sm:$0xff]  }
 0xc7d   : > { %v2489_v5 = vld [vmem:[%s8298_s5 + $0xf8] sm:$0xff] }
 0xc7e   : > { %3442 = vmatpush1.bf16.msra.mxu1 %v5573_v17  ;;  %3571 = vmatpush1.bf16.msra.mxu0 %v5579_v20  ;;  %v6889_v17 = vld [vmem:[%s8307_s9] sm:$0xff]   ;;  %v2495_v20 = vld [vmem:[%s8298_s5 + $0x128] sm:$0xff] }
 0xc7f   : > { %3443 = vmatprep.subr.bf16.mxu1 %v5590_v23  ;;  %3572 = vmatprep.subr.bf16.mxu0 %v5596_v24  ;;  %v2503_v23 = vld [vmem:[%s8298_s5 + $0x168] sm:$0xff] }
 0xc80   : > { %v6890_v24 = vld [vmem:[%s8307_s9 + $0x48] sm:$0xff]   ;;  %v5594_v27 = vcombine.high %v2495_v20, %v2503_v23 }
 0xc82   : > { %3444 = vmatpush1.bf16.msra.mxu1 %v5589_v28  ;;  %3573 = vmatpush1.bf16.msra.mxu0 %v5595_v29  ;;  %v2519_v28 = vld [vmem:[%s8298_s5 + $0x1e8] sm:$0xff]  ;;  %v6892_v29 = vld [vmem:[%s8307_s9 + $0x50] sm:$0xff]  }
 0xc83   : > { %3445 = vmatprep.subr.bf16.mxu1 %v5606_v30  ;;  %3574 = vmatprep.subr.bf16.mxu0 %v5612_v51  ;;  %v5593_v30 = vcombine.low %v2495_v20, %v2503_v23  ;;  %v5610_v51 = vcombine.high %v2511_v32, %v2519_v28  ;;  %v2529_v23 = vld [vmem:[%s8298_s5 + $0x238] sm:$0xff] }
 0xc86   : > { %3446 = vmatpush1.bf16.msra.mxu1 %v5605_v37  ;;  %3575 = vmatpush1.bf16.msra.mxu0 %v5611_v38  ;;  %v5609_v37 = vcombine.low %v2511_v32, %v2519_v28  ;;  %v5626_v38 = vcombine.high %v2527_v34, %v2535_v10  ;;  %v2577_v34 = vld [vmem:[%s8298_s5 + $0x3b8] sm:$0xff] }
 0xc87   : > { %3447 = vmatprep.subr.bf16.mxu1 %v5622_v39  ;;  %3576 = vmatprep.subr.bf16.mxu0 %v5628_v44  ;;  %v6895_v39 = vld [vmem:[%s8307_s9 + $0x18] sm:$0xff]   ;;  %v2543_v44 = vld [vmem:[%s8298_s5 + $0x2a8] sm:$0xff] }
 0xc88   : > { %v5642_v46 = vcombine.high %v2543_v44, %v2551_v40  ;;  %v5641_v60 = vcombine.low %v2543_v44, %v2551_v40  ;;  %v2585_v10 = vld [vmem:[%s8298_s5 + $0x3f8] sm:$0xff]  ;;  %v6906_v44 = vld [vmem:[%s8307_s9 + $0x80] sm:$0xff]   ;;  %v6908_v40 = vld [vmem:[%s8307_s9 + $0xc8] sm:$0xff]  }
 0xc8a   : > { %3448 = vmatpush1.bf16.msra.mxu1 %v5621_v47  ;;  %3577 = vmatpush1.bf16.msra.mxu0 %v5627_v55  ;;  %v6897_v47 = vld [vmem:[%s8307_s9 + $0x20] sm:$0xff]   ;;  %v2559_v55 = vld [vmem:[%s8298_s5 + $0x328] sm:$0xff] }
 0xc8b   : > { %3449 = vmatprep.subr.bf16.mxu1 %v5638_v48  ;;  %3578 = vmatprep.subr.bf16.mxu0 %v5644_v22  ;;  %v2567_v48 = vld [vmem:[%s8298_s5 + $0x368] sm:$0xff] }
 0xc8c   : > { %v6898_v22 = vld [vmem:[%s8307_s9 + $0x68] sm:$0xff]   ;;  %v5658_v49 = vcombine.high %v2559_v55, %v2567_v48 }
 0xc8e   : > { %3450 = vmatpush1.bf16.msra.mxu1 %v5637_v53  ;;  %3579 = vmatpush1.bf16.msra.mxu0 %v5643_v54  ;;  %v2583_v53 = vld [vmem:[%s8298_s5 + $0x3e8] sm:$0xff]  ;;  %v6900_v54 = vld [vmem:[%s8307_s9 + $0x70] sm:$0xff]  }
 0xc8f   : > { %3451 = vmatprep.subr.bf16.mxu1 %v5654_v56  ;;  %3580 = vmatprep.subr.bf16.mxu0 %v5660_v57  ;;  %v5657_v56 = vcombine.low %v2559_v55, %v2567_v48  ;;  %v5674_v57 = vcombine.high %v2575_v52, %v2583_v53  ;;  %v6918_v55 = vld [vmem:[%s8307_s9 + $0x98] sm:$0xff]   ;;  %v6920_v48 = vld [vmem:[%s8307_s9 + $0xe0] sm:$0xff]  }
 0xc92   : > { %3452 = vmatpush1.bf16.msra.mxu1 %v5653_v0  ;;  %3581 = vmatpush1.bf16.msra.mxu0 %v5659_v1  ;;  %v5673_v0 = vcombine.low %v2575_v52, %v2583_v53  ;;  %v5566_v1 = vcombine.high %v2465_v61, %v2473_v63  ;;  %v6932_v52 = vld [vmem:[%s8307_s9 + $0xf8] sm:$0xff]  }
 0xc93   : > { %3453 = vmatprep.subr.bf16.mxu1 %v5670_v3  ;;  %3582 = vmatprep.subr.bf16.mxu0 %v5676_v4  ;;  %v6903_v3 = vld [vmem:[%s8307_s9 + $0x38] sm:$0xff]  }
 0xc94   : > { %v2481_v4 = vld [vmem:[%s8298_s5 + $0xb8] sm:$0xff] }
 0xc95   : > { %v5581_v9 = vcombine.low %v2481_v4, %v2489_v5  ;;  %v6934_v53 = vld [vmem:[%s8307_s9 + $0xb8] sm:$0xff]  }
 0xc96   : > { %3454 = vmatpush1.bf16.msra.mxu1 %v5669_v6  ;;  %3583 = vmatpush1.bf16.msra.mxu0 %v5675_v41  ;;  %v5565_v6 = vcombine.low %v2465_v61, %v2473_v63  ;;  %v5582_v41 = vcombine.high %v2481_v4, %v2489_v5 }
 0xc97   : > { %3525 = vmatprep.subr.bf16.mxu1 %v5562_v7  ;;  %5980 = vmatprep.subr.bf16.mxu0 %v6888_v8  ;;  %v2497_v7 = vld [vmem:[%s8298_s5 + $0x138] sm:$0xff] }
 0xc98   : > { %v2505_v8 = vld [vmem:[%s8298_s5 + $0x178] sm:$0xff] }
 0xc99   : > { %3472 = vmatmul.mubr.bf16.vlgmr.msra.gmra.mrb[24].mxu1 %v8648_v62  ;;  %3601 = vmatmul.mubr.bf16.vlgmr.msra.gmra.mrb[24].mxu0 %v8648_v62  ;;  %v5598_v11 = vcombine.high %v2497_v7, %v2505_v8 }
 0xc9a   : > { %3526 = vmatpush1.bf16.msra.mxu1 %v5561_v12  ;;  %3557 = vmatprep.mubr.bf16.mxu1 %v7625_v21  ;;  %v2513_v12 = vld [vmem:[%s8298_s5 + $0x1b8] sm:$0xff] }
 0xc9b   : > { %3527 = vmatprep.subr.bf16.mxu1 %v5578_v13  ;;  %5981 = vmatpush3.bf16.msra.mxu0 %v6889_v17  ;;  %v2521_v13 = vld [vmem:[%s8298_s5 + $0x1f8] sm:$0xff]  ;;  %v5597_v17 = vcombine.low %v2497_v7, %v2505_v8 }
 0xc9c   : > { %5982 = vmatprep.subr.bf16.mxu0 %v6890_v24  ;;  %v5614_v20 = vcombine.high %v2513_v12, %v2521_v13  ;;  %v2537_v24 = vld [vmem:[%s8298_s5 + $0x278] sm:$0xff] }
 0xc9d   : > { %v5629_v32 = vcombine.low %v2529_v23, %v2537_v24 }
 0xc9e   : > { %3528 = vmatpush1.bf16.msra.mxu1 %v5577_v26  ;;  %v5613_v26 = vcombine.low %v2513_v12, %v2521_v13 }
 0xc9f   : > { %3529 = vmatprep.subr.bf16.mxu1 %v5594_v27  ;;  %5983 = vmatpush3.bf16.msra.mxu0 %v6891_v19  ;;  %v5630_v27 = vcombine.high %v2529_v23, %v2537_v24  ;;  %v2553_v19 = vld [vmem:[%s8298_s5 + $0x2f8] sm:$0xff] }
 0xca0   : > { %5984 = vmatprep.subr.bf16.mxu0 %v6892_v29  ;;  %v2561_v29 = vld [vmem:[%s8298_s5 + $0x338] sm:$0xff] }
 0xca2   : > { %3530 = vmatpush1.bf16.msra.mxu1 %v5593_v30  ;;  %v2569_v30 = vld [vmem:[%s8298_s5 + $0x378] sm:$0xff] }
 0xca3   : > { %3531 = vmatprep.subr.bf16.mxu1 %v5610_v51  ;;  %5985 = vmatpush3.bf16.msra.mxu0 %v6893_v33  ;;  %v5662_v33 = vcombine.high %v2561_v29, %v2569_v30 }
 0xca4   : > { %5986 = vmatprep.subr.bf16.mxu0 %v6894_v36  ;;  %v5661_v36 = vcombine.low %v2561_v29, %v2569_v30 }
 0xca6   : > { %3532 = vmatpush1.bf16.msra.mxu1 %v5609_v37  ;;  %v5678_v37 = vcombine.high %v2577_v34, %v2585_v10 }
 0xca7   : > { %3533 = vmatprep.subr.bf16.mxu1 %v5626_v38  ;;  %5987 = vmatpush3.bf16.msra.mxu0 %v6895_v39  ;;  %v5677_v38 = vcombine.low %v2577_v34, %v2585_v10  ;;  %v6904_v39 = vld [vmem:[%s8307_s9 + $0xc0] sm:$0xff]  }
 0xca8   : > { %5988 = vmatprep.subr.bf16.mxu0 %v6896_v42  ;;  %v6910_v42 = vld [vmem:[%s8307_s9 + $0x88] sm:$0xff]   ;;  %v6907_v10 = vld [vmem:[%s8307_s9 + $0x100] sm:$0xff]  }
 0xcaa   : > { %3534 = vmatpush1.bf16.msra.mxu1 %v5625_v43  ;;  %v6912_v43 = vld [vmem:[%s8307_s9 + $0xd0] sm:$0xff]  }
 0xcab   : > { %3535 = vmatprep.subr.bf16.mxu1 %v5642_v46  ;;  %5989 = vmatpush3.bf16.msra.mxu0 %v6897_v47  ;;  %v6914_v46 = vld [vmem:[%s8307_s9 + $0x90] sm:$0xff]   ;;  %v6916_v47 = vld [vmem:[%s8307_s9 + $0xd8] sm:$0xff]  }
 0xcac   : > { %5990 = vmatprep.subr.bf16.mxu0 %v6898_v22  ;;  %v6924_v22 = vld [vmem:[%s8307_s9 + $0xe8] sm:$0xff]  }
 0xcae   : > { %3536 = vmatpush1.bf16.msra.mxu1 %v5641_v60  ;;  %v6926_v60 = vld [vmem:[%s8307_s9 + $0xa8] sm:$0xff]  }
 0xcaf   : > { %3537 = vmatprep.subr.bf16.mxu1 %v5658_v49  ;;  %5991 = vmatpush3.bf16.msra.mxu0 %v6899_v50  ;;  %v6928_v49 = vld [vmem:[%s8307_s9 + $0xf0] sm:$0xff]  }
 0xcb0   : > { %5992 = vmatprep.subr.bf16.mxu0 %v6900_v54  ;;  %v6930_v50 = vld [vmem:[%s8307_s9 + $0xb0] sm:$0xff]   ;;  %v6936_v54 = vld [vmem:[%s8307_s9 + $0x1c0] sm:$0xff]  }
 0xcb2   : > { %3538 = vmatpush1.bf16.msra.mxu1 %v5657_v56  ;;  %v2608_v56 = vsub.s32 4, %v8371_v25 }
 0xcb3   : > { %3539 = vmatprep.subr.bf16.mxu1 %v5674_v57  ;;  %5993 = vmatpush3.bf16.msra.mxu0 %v6901_v18  ;;  %v8788_v57 = vld [vmem:[%s8301_s15] sm:$0xff]  ;;  %v2612_v18 = vsub.s32 5, %v8371_v25 }
 0xcb4   : > { %5994 = vmatprep.subr.bf16.mxu0 %v6902_v2  ;;  %v2593_v61 = vrot.slane %v8788_v57, %v8374_v31  ;;  %v2609_v63 = vrot.slane %v8788_v57, %v2608_v56  ;;  %v2597_v2 = vrot.slane %v8788_v57, %v8379_v35 }
 0xcb6   : > { %3540 = vmatpush1.bf16.msra.mxu1 %v5673_v0  ;;  %v2613_v0 = vrot.slane %v8788_v57, %v2612_v18 }
 0xcb7   : > { %3611 = vmatprep.subr.bf16.mxu1 %v5566_v1  ;;  %5995 = vmatpush3.bf16.msra.mxu0 %v6903_v3 }
 0xcb8   : > { %6024 = vmatprep.subr.bf16.mxu0 %v6905_v14 }
 0xcb9   : > { %3558 = vmatmul.mubr.bf16.vlgmr.msra.gmra.mrb[28].mxu1 %v8648_v62 }
 0xcba   : > { %3612 = vmatpush1.bf16.msra.mxu1 %v5565_v6  ;;  %3643 = vmatprep.mubr.bf16.mxu1 %v7625_v21  ;;  %v2545_v21 = vld [vmem:[%s8298_s5 + $0x2b8] sm:$0xff] }
 0xcbb   : > { %3613 = vmatprep.subr.bf16.mxu1 %v5582_v41  ;;  %v5646_v28 = vcombine.high %v2545_v21, %v2553_v19  ;;  %v5645_v51 = vcombine.low %v2545_v21, %v2553_v19 }
 0xcbe   : > { %3614 = vmatpush1.bf16.msra.mxu1 %v5581_v9 }
 0xcbf   : > { %3615 = vmatprep.subr.bf16.mxu1 %v5598_v11 }
 0xcc2   : > { %3616 = vmatpush1.bf16.msra.mxu1 %v5597_v17 }
 0xcc3   : > { %3617 = vmatprep.subr.bf16.mxu1 %v5614_v20 }
 0xcc6   : > { %3618 = vmatpush1.bf16.msra.mxu1 %v5613_v26 }
 0xcc7   : > { %3619 = vmatprep.subr.bf16.mxu1 %v5630_v27 }
 0xcca   : > { %3620 = vmatpush1.bf16.msra.mxu1 %v5629_v32 }
 0xccb   : > { %3621 = vmatprep.subr.bf16.mxu1 %v5646_v28 }
 0xcce   : > { %3622 = vmatpush1.bf16.msra.mxu1 %v5645_v51 }
 0xccf   : > { %3623 = vmatprep.subr.bf16.mxu1 %v5662_v33 }
 0xcd2   : > { %3624 = vmatpush1.bf16.msra.mxu1 %v5661_v36  ;;  %v6909_v36 = vld [vmem:[%s8307_s9 + $0x148] sm:$0xff]  }
 0xcd3   : > { %3625 = vmatprep.subr.bf16.mxu1 %v5678_v37  ;;  %v6911_v37 = vld [vmem:[%s8307_s9 + $0x108] sm:$0xff]  }
 0xcd6   : > { %3626 = vmatpush1.bf16.msra.mxu1 %v5677_v38  ;;  %v6913_v38 = vld [vmem:[%s8307_s9 + $0x150] sm:$0xff]  }
 0xcd7   : > { %6002 = vmatprep.subr.bf16.mxu1 %v6904_v39  ;;  %v6915_v39 = vld [vmem:[%s8307_s9 + $0x110] sm:$0xff]  }
 0xcd9   : > { %3644 = vmatmul.mubr.bf16.vlgmr.msra.gmra.mrb[32].mxu1 %v8648_v62  ;;  %v6922_v62 = vld [vmem:[%s8307_s9 + $0xa0] sm:$0xff]  }
 0xcda   : > { %6003 = vmatpush3.bf16.msra.mxu1 %v6906_v44  ;;  %v6917_v44 = vld [vmem:[%s8307_s9 + $0x158] sm:$0xff]  }
 0xcdb   : > { %6004 = vmatprep.subr.bf16.mxu1 %v6908_v40  ;;  %v6919_v40 = vld [vmem:[%s8307_s9 + $0x118] sm:$0xff]  }
 0xcde   : > { %6005 = vmatpush3.bf16.msra.mxu1 %v6910_v42  ;;  %v6921_v42 = vld [vmem:[%s8307_s9 + $0x160] sm:$0xff]  }
 0xcdf   : > { %6006 = vmatprep.subr.bf16.mxu1 %v6912_v43  ;;  %v6923_v43 = vld [vmem:[%s8307_s9 + $0x120] sm:$0xff]  }
 0xce2   : > { %6007 = vmatpush3.bf16.msra.mxu1 %v6914_v46  ;;  %v6925_v46 = vld [vmem:[%s8307_s9 + $0x168] sm:$0xff]  }
 0xce3   : > { %6008 = vmatprep.subr.bf16.mxu1 %v6916_v47  ;;  %v8814_v47 = vld [vmem:[%s8301_s15 + $0x8] sm:$0xff] }
 0xce6   : > { %6009 = vmatpush3.bf16.msra.mxu1 %v6918_v55  ;;  %v6927_v55 = vld [vmem:[%s8307_s9 + $0x128] sm:$0xff]  }
 0xce7   : > { %6010 = vmatprep.subr.bf16.mxu1 %v6920_v48  ;;  %v2601_v48 = vrot.slane %v8788_v57, %v8634_v45 }
 0xcea   : > { %6011 = vmatpush3.bf16.msra.mxu1 %v6922_v62  ;;  %v2625_v62 = vrot.slane %v8814_v47, %v8374_v31 }
 0xceb   : > { %6012 = vmatprep.subr.bf16.mxu1 %v6924_v22  ;;  %v6929_v22 = vld [vmem:[%s8307_s9 + $0x170] sm:$0xff]  }
 0xcee   : > { %6013 = vmatpush3.bf16.msra.mxu1 %v6926_v60  ;;  %v2605_v60 = vrot.slane %v8788_v57, %v8637_v16 }
 0xcef   : > { %6014 = vmatprep.subr.bf16.mxu1 %v6928_v49  ;;  %v2629_v49 = vrot.slane %v8814_v47, %v8379_v35 }
 0xcf2   : > { %6015 = vmatpush3.bf16.msra.mxu1 %v6930_v50 }
 0xcf3   : > { %6016 = vmatprep.subr.bf16.mxu1 %v6932_v52 }
 0xcf6   : > { %6017 = vmatpush3.bf16.msra.mxu1 %v6934_v53  ;;  %v6931_v53 = vld [vmem:[%s8307_s9 + $0x130] sm:$0xff]  }
 0xcf7   : > { %6046 = vmatprep.subr.bf16.mxu1 %v6936_v54 }
 0xd2c   : > { %v3344_v1 = vpop.f32.mrb[16].mxu1  ;;  %v3430_v3 = vpop.f32.mrb[16].mxu0 }
 0xd2d   : > { %v3345_v4 = vadd.f32 %v3344_v1, %v2593_v61  ;;  %v3431_v5 = vadd.f32 %v3430_v3, %v2609_v63  ;;  %v3346_v14 = vpop.f32.mrb[17].mxu1  ;;  %v3432_v6 = vpop.f32.mrb[17].mxu0 }
 0xd2e   : > { %v3347_v41 = vadd.f32 %v3346_v14, %v2597_v2  ;;  %v3433_v7 = vadd.f32 %v3432_v6, %v2613_v0  ;;  %v3348_v8 = vpop.f32.mrb[18].mxu1  ;;  %v3434_v9 = vpop.f32.mrb[18].mxu0 }
 0xd2f   : > { %v3349_v11 = vadd.f32 %v3348_v8, %v2593_v61  ;;  %v3435_v12 = vadd.f32 %v3434_v9, %v2609_v63  ;;  %v3350_v13 = vpop.f32.mrb[19].mxu1  ;;  %v3436_v17 = vpop.f32.mrb[19].mxu0  ;;  %v3654_v24 = vmax.f32 %v3345_v4, 0.0  ;;  %v3658_v26 = vmax.f32 %v3431_v5, 0.0 }
 0xd30   : > { %v3351_v20 = vadd.f32 %v3350_v13, %v2597_v2  ;;  %v3437_v23 = vadd.f32 %v3436_v17, %v2613_v0  ;;  %v3655_v19 = vmax.f32 %v3347_v41, 0.0  ;;  %v3659_v32 = vmax.f32 %v3433_v7, 0.0  ;;  %v6933_v0 = vld [vmem:[%s8307_s9 + $0x178] sm:$0xff]  }
 0xd31   : > { %v3670_v27 = vmax.f32 %v3349_v11, 0.0  ;;  %v3674_v21 = vmax.f32 %v3435_v12, 0.0  ;;  %v6935_v11 = vld [vmem:[%s8307_s9 + $0x138] sm:$0xff]  }
 0xd32   : > { %v3671_v28 = vmax.f32 %v3351_v20, 0.0  ;;  %v3675_v29 = vmax.f32 %v3437_v23, 0.0  ;;  %v6937_v23 = vld [vmem:[%s8307_s9 + $0x240] sm:$0xff]  }
 0xd33   : > { %v3686_v30 = vpack.c.bf16 %v3670_v27, %v3654_v24  ;;  %v8801_v51 = vpack.c.bf16 %v3674_v21, %v3658_v26 }
 0xd34   : > { %v3687_v33 = vpack.c.bf16 %v3671_v28, %v3655_v19  ;;  %v3691_v34 = vpack.c.bf16 %v3675_v29, %v3659_v32 }
 0xd36   : > { %4765 = vmatprep.mubr.bf16.mxu0 %v3687_v33  ;;  %v6939_v33 = vld [vmem:[%s8307_s9 + $0x200] sm:$0xff]  }
 0xd37   : > { %4766 = vmatmul.mubr.bf16.vlgmr.msra.gmra.mrb[28].mxu0 %v3686_v30  ;;  %v6938_v30 = vld [vmem:[%s8307_s9 + $0x180] sm:$0xff]  }
 0xd38   : > { %6025 = vmatpush3.bf16.msra.mxu0 %v6907_v10  ;;  %4847 = vmatprep.mubr.bf16.mxu0 %v3691_v34  ;;  %v6940_v34 = vld [vmem:[%s8307_s9 + $0x1c8] sm:$0xff]  }
 0xd39   : > { %6026 = vmatprep.subr.bf16.mxu0 %v6909_v36  ;;  %v6941_v10 = vld [vmem:[%s8307_s9 + $0x248] sm:$0xff]  }
 0xd3a   : > { %v6942_v36 = vld [vmem:[%s8307_s9 + $0x188] sm:$0xff]  }
 0xd3c   : > { %6027 = vmatpush3.bf16.msra.mxu0 %v6911_v37  ;;  %v6943_v37 = vld [vmem:[%s8307_s9 + $0x208] sm:$0xff]  }
 0xd3d   : > { %6028 = vmatprep.subr.bf16.mxu0 %v6913_v38  ;;  %v6944_v38 = vld [vmem:[%s8307_s9 + $0x1d0] sm:$0xff]  }
 0xd40   : > { %6029 = vmatpush3.bf16.msra.mxu0 %v6915_v39  ;;  %v6945_v39 = vld [vmem:[%s8307_s9 + $0x250] sm:$0xff]  }
 0xd41   : > { %6030 = vmatprep.subr.bf16.mxu0 %v6917_v44  ;;  %v6946_v44 = vld [vmem:[%s8307_s9 + $0x190] sm:$0xff]  }
 0xd44   : > { %6031 = vmatpush3.bf16.msra.mxu0 %v6919_v40  ;;  %v6948_v40 = vld [vmem:[%s8307_s9 + $0x1d8] sm:$0xff]  }
 0xd45   : > { %6032 = vmatprep.subr.bf16.mxu0 %v6921_v42  ;;  %v6949_v42 = vld [vmem:[%s8307_s9 + $0x258] sm:$0xff]  }
 0xd48   : > { %6033 = vmatpush3.bf16.msra.mxu0 %v6923_v43  ;;  %v6950_v43 = vld [vmem:[%s8307_s9 + $0x198] sm:$0xff]  }
 0xd49   : > { %6034 = vmatprep.subr.bf16.mxu0 %v6925_v46  ;;  %v6951_v46 = vld [vmem:[%s8307_s9 + $0x218] sm:$0xff]  }
 0xd4c   : > { %v3387_v50 = vpop.f32.mrb[20].mxu1  ;;  %v3516_v52 = vpop.f32.mrb[20].mxu0  ;;  %6035 = vmatpush3.bf16.msra.mxu0 %v6927_v55  ;;  %v6952_v55 = vld [vmem:[%s8307_s9 + $0x1e0] sm:$0xff]  }
 0xd4d   : > { %v3388_v54 = vadd.f32 %v3387_v50, %v2601_v48  ;;  %v3517_v61 = vadd.f32 %v3516_v52, %v2625_v62  ;;  %v3389_v63 = vpop.f32.mrb[21].mxu1  ;;  %v3518_v2 = vpop.f32.mrb[21].mxu0  ;;  %6036 = vmatprep.subr.bf16.mxu0 %v6929_v22  ;;  %v6955_v22 = vld [vmem:[%s8307_s9 + $0x220] sm:$0xff]   ;;  %v2616_v50 = vsub.s32 6, %v8371_v25  ;;  %v2620_v52 = vsub.s32 7, %v8371_v25 }
 0xd4e   : > { %v3390_v1 = vadd.f32 %v3389_v63, %v2605_v60  ;;  %v3519_v3 = vadd.f32 %v3518_v2, %v2629_v49  ;;  %v3391_v4 = vpop.f32.mrb[22].mxu1  ;;  %v3520_v5 = vpop.f32.mrb[22].mxu0  ;;  %v2641_v63 = vrot.slane %v8814_v47, %v2608_v56  ;;  %v6960_v2 = vld [vmem:[%s8307_s9 + $0x1f0] sm:$0xff]  }
 0xd4f   : > { %v3392_v14 = vadd.f32 %v3391_v4, %v2601_v48  ;;  %v3521_v6 = vadd.f32 %v3520_v5, %v2625_v62  ;;  %v3393_v41 = vpop.f32.mrb[23].mxu1  ;;  %v3522_v7 = vpop.f32.mrb[23].mxu0  ;;  %v3656_v12 = vmax.f32 %v3388_v54, 0.0  ;;  %v3662_v13 = vmax.f32 %v3517_v61, 0.0  ;;  %v6953_v48 = vld [vmem:[%s8307_s9 + $0x260] sm:$0xff]   ;;  %v6959_v54 = vld [vmem:[%s8307_s9 + $0x228] sm:$0xff]  }
 0xd50   : > { %v3394_v8 = vadd.f32 %v3393_v41, %v2605_v60  ;;  %v3523_v9 = vadd.f32 %v3522_v7, %v2629_v49  ;;  %6037 = vmatpush3.bf16.msra.mxu0 %v6931_v53  ;;  %v3657_v24 = vmax.f32 %v3390_v1, 0.0  ;;  %v3663_v26 = vmax.f32 %v3519_v3, 0.0  ;;  %v6954_v62 = vld [vmem:[%s8307_s9 + $0x1a0] sm:$0xff]   ;;  %v6956_v60 = vld [vmem:[%s8307_s9 + $0x1e8] sm:$0xff]  }
 0xd51   : > { %v3672_v17 = vmax.f32 %v3392_v14, 0.0  ;;  %v3678_v20 = vmax.f32 %v3521_v6, 0.0  ;;  %6038 = vmatprep.subr.bf16.mxu0 %v6933_v0  ;;  %v6957_v49 = vld [vmem:[%s8307_s9 + $0x268] sm:$0xff]   ;;  %v2617_v61 = vrot.slane %v8788_v57, %v2616_v50  ;;  %v6961_v0 = vld [vmem:[%s8307_s9 + $0x270] sm:$0xff]   ;;  %v2621_v1 = vrot.slane %v8788_v57, %v2620_v52  ;;  %v6965_v57 = vld [vmem:[%s8307_s9 + $0x278] sm:$0xff]  }
 0xd52   : > { %v3673_v27 = vmax.f32 %v3394_v8, 0.0  ;;  %v3679_v21 = vmax.f32 %v3523_v9, 0.0  ;;  %v6958_v53 = vld [vmem:[%s8307_s9 + $0x1a8] sm:$0xff]   ;;  %v2645_v3 = vrot.slane %v8814_v47, %v2612_v18  ;;  %v6962_v14 = vld [vmem:[%s8307_s9 + $0x1b0] sm:$0xff]   ;;  %v6964_v9 = vld [vmem:[%s8307_s9 + $0x1f8] sm:$0xff]  }
 0xd53   : > { %v3688_v19 = vpack.c.bf16 %v3672_v17, %v3656_v12  ;;  %v8830_v32 = vpack.c.bf16 %v3678_v20, %v3662_v13  ;;  %v6963_v6 = vld [vmem:[%s8307_s9 + $0x230] sm:$0xff]  }
 0xd54   : > { %v3689_v28 = vpack.c.bf16 %v3673_v27, %v3657_v24  ;;  %v3695_v29 = vpack.c.bf16 %v3679_v21, %v3663_v26  ;;  %6039 = vmatpush3.bf16.msra.mxu0 %v6935_v11  ;;  %v6966_v21 = vld [vmem:[%s8307_s9 + $0x1b8] sm:$0xff]  }
 0xd55   : > { %6068 = vmatprep.subr.bf16.mxu0 %v6937_v23 }
 0xd56   : > { %4806 = vmatprep.mubr.bf16.mxu1 %v3689_v28 }
 0xd57   : > { %4807 = vmatmul.mubr.bf16.vlgmr.msra.gmra.mrb[36].mxu1 %v3688_v19  ;;  %4848 = vmatmul.mubr.bf16.vlgmr.msra.gmra.mrb[32].mxu0 %v8801_v51  ;;  %v6947_v51 = vld [vmem:[%s8307_s9 + $0x210] sm:$0xff]   ;;  %v6967_v19 = vld [vmem:[%s8307_s9 + $0x238] sm:$0xff]  }
 0xd58   : > { %6047 = vmatpush3.bf16.msra.mxu1 %v6938_v30  ;;  %6069 = vmatpush3.bf16.msra.mxu0 %v6939_v33 }
 0xd59   : > { %4929 = vmatprep.mubr.bf16.mxu0 %v3695_v29  ;;  %6048 = vmatprep.subr.bf16.mxu1 %v6940_v34  ;;  %v6968_v34 = vld [vmem:[%s8307_s9 + $0x2c0] sm:$0xff]  }
 0xd5a   : > { %6070 = vmatprep.subr.bf16.mxu0 %v6941_v10  ;;  %v6969_v10 = vld [vmem:[%s8307_s9 + $0x340] sm:$0xff]  }
 0xd5c   : > { %6049 = vmatpush3.bf16.msra.mxu1 %v6942_v36  ;;  %6071 = vmatpush3.bf16.msra.mxu0 %v6943_v37 }
 0xd5d   : > { %6050 = vmatprep.subr.bf16.mxu1 %v6944_v38  ;;  %6072 = vmatprep.subr.bf16.mxu0 %v6945_v39 }
 0xd60   : > { %6051 = vmatpush3.bf16.msra.mxu1 %v6946_v44  ;;  %6073 = vmatpush3.bf16.msra.mxu0 %v6947_v51 }
 0xd61   : > { %6052 = vmatprep.subr.bf16.mxu1 %v6948_v40  ;;  %6074 = vmatprep.subr.bf16.mxu0 %v6949_v42 }
 0xd64   : > { %6053 = vmatpush3.bf16.msra.mxu1 %v6950_v43  ;;  %6075 = vmatpush3.bf16.msra.mxu0 %v6951_v46  ;;  %v6970_v43 = vld [vmem:[%s8307_s9 + $0x280] sm:$0xff]  }
 0xd65   : > { %6054 = vmatprep.subr.bf16.mxu1 %v6952_v55  ;;  %6076 = vmatprep.subr.bf16.mxu0 %v6953_v48  ;;  %v6971_v46 = vld [vmem:[%s8307_s9 + $0x300] sm:$0xff]   ;;  %v6972_v55 = vld [vmem:[%s8307_s9 + $0x2c8] sm:$0xff]  }
 0xd66   : > { %v6973_v48 = vld [vmem:[%s8307_s9 + $0x348] sm:$0xff]  }
 0xd68   : > { %6055 = vmatpush3.bf16.msra.mxu1 %v6954_v62  ;;  %6077 = vmatpush3.bf16.msra.mxu0 %v6955_v22  ;;  %v6974_v62 = vld [vmem:[%s8307_s9 + $0x288] sm:$0xff]  }
 0xd69   : > { %6056 = vmatprep.subr.bf16.mxu1 %v6956_v60  ;;  %6078 = vmatprep.subr.bf16.mxu0 %v6957_v49  ;;  %v6975_v22 = vld [vmem:[%s8307_s9 + $0x308] sm:$0xff]   ;;  %v6976_v60 = vld [vmem:[%s8307_s9 + $0x2d0] sm:$0xff]  }
 0xd6a   : > { %v6977_v49 = vld [vmem:[%s8307_s9 + $0x350] sm:$0xff]  }
 0xd6c   : > { %v3473_v4 = vpop.f32.mrb[24].mxu1  ;;  %v3602_v5 = vpop.f32.mrb[24].mxu0  ;;  %6057 = vmatpush3.bf16.msra.mxu1 %v6958_v53  ;;  %6079 = vmatpush3.bf16.msra.mxu0 %v6959_v54  ;;  %v6978_v53 = vld [vmem:[%s8307_s9 + $0x290] sm:$0xff]   ;;  %v6980_v54 = vld [vmem:[%s8307_s9 + $0x2d8] sm:$0xff]  }
 0xd6d   : > { %v3474_v41 = vadd.f32 %v3473_v4, %v2617_v61  ;;  %v3603_v56 = vadd.f32 %v3602_v5, %v2641_v63  ;;  %v3475_v7 = vpop.f32.mrb[25].mxu1  ;;  %v3604_v8 = vpop.f32.mrb[25].mxu0  ;;  %6058 = vmatprep.subr.bf16.mxu1 %v6960_v2  ;;  %6080 = vmatprep.subr.bf16.mxu0 %v6961_v0  ;;  %v6983_v2 = vld [vmem:[%s8307_s9 + $0x318] sm:$0xff]   ;;  %v6984_v0 = vld [vmem:[%s8307_s9 + $0x2e0] sm:$0xff]   ;;  %v6988_v5 = vld [vmem:[%s8307_s9 + $0x2e8] sm:$0xff]  }
 0xd6e   : > { %v3476_v11 = vadd.f32 %v3475_v7, %v2621_v1  ;;  %v3605_v12 = vadd.f32 %v3604_v8, %v2645_v3  ;;  %v3477_v13 = vpop.f32.mrb[26].mxu1  ;;  %v3606_v18 = vpop.f32.mrb[26].mxu0  ;;  %v6987_v4 = vld [vmem:[%s8307_s9 + $0x320] sm:$0xff]   ;;  %v6992_v7 = vld [vmem:[%s8307_s9 + $0x2f0] sm:$0xff]  }
 0xd6f   : > { %v3478_v17 = vadd.f32 %v3477_v13, %v2617_v61  ;;  %v3607_v20 = vadd.f32 %v3606_v18, %v2641_v63  ;;  %v3479_v23 = vpop.f32.mrb[27].mxu1  ;;  %v3608_v24 = vpop.f32.mrb[27].mxu0  ;;  %v3660_v28 = vmax.f32 %v3474_v41, 0.0  ;;  %v3666_v29 = vmax.f32 %v3603_v56, 0.0  ;;  %v6981_v61 = vld [vmem:[%s8307_s9 + $0x358] sm:$0xff]   ;;  %v6991_v41 = vld [vmem:[%s8307_s9 + $0x328] sm:$0xff]  }
 0xd70   : > { %v3480_v26 = vadd.f32 %v3479_v23, %v2621_v1  ;;  %v3609_v27 = vadd.f32 %v3608_v24, %v2645_v3  ;;  %6059 = vmatpush3.bf16.msra.mxu1 %v6962_v14  ;;  %6081 = vmatpush3.bf16.msra.mxu0 %v6963_v6  ;;  %v3661_v36 = vmax.f32 %v3476_v11, 0.0  ;;  %v3667_v37 = vmax.f32 %v3605_v12, 0.0  ;;  %v6982_v63 = vld [vmem:[%s8307_s9 + $0x298] sm:$0xff]   ;;  %v6985_v1 = vld [vmem:[%s8307_s9 + $0x360] sm:$0xff]   ;;  %v6989_v14 = vld [vmem:[%s8307_s9 + $0x368] sm:$0xff]  }
 0xd71   : > { %v3676_v30 = vmax.f32 %v3478_v17, 0.0  ;;  %v3682_v33 = vmax.f32 %v3607_v20, 0.0  ;;  %6060 = vmatprep.subr.bf16.mxu1 %v6964_v9  ;;  %6082 = vmatprep.subr.bf16.mxu0 %v6965_v57  ;;  %v6986_v3 = vld [vmem:[%s8307_s9 + $0x2a0] sm:$0xff]   ;;  %v6990_v6 = vld [vmem:[%s8307_s9 + $0x2a8] sm:$0xff]   ;;  %v2633_v56 = vrot.slane %v8814_v47, %v8634_v45  ;;  %v6993_v8 = vld [vmem:[%s8307_s9 + $0x370] sm:$0xff]   ;;  %v2637_v9 = vrot.slane %v8814_v47, %v8637_v16 }
 0xd72   : > { %v3677_v38 = vmax.f32 %v3480_v26, 0.0  ;;  %v3683_v39 = vmax.f32 %v3609_v27, 0.0  ;;  %v6994_v11 = vld [vmem:[%s8307_s9 + $0x2b0] sm:$0xff]   ;;  %v6996_v17 = vld [vmem:[%s8307_s9 + $0x2f8] sm:$0xff]  }
 0xd73   : > { %v3692_v44 = vpack.c.bf16 %v3676_v30, %v3660_v28  ;;  %v8879_v51 = vpack.c.bf16 %v3682_v33, %v3666_v29  ;;  %v6995_v12 = vld [vmem:[%s8307_s9 + $0x330] sm:$0xff]   ;;  %v6997_v20 = vld [vmem:[%s8307_s9 + $0x378] sm:$0xff]   ;;  %v7000_v29 = vld [vmem:[%s8307_s9 + $0x3c0] sm:$0xff]  }
 0xd74   : > { %v3693_v40 = vpack.c.bf16 %v3677_v38, %v3661_v36  ;;  %v3699_v42 = vpack.c.bf16 %v3683_v39, %v3667_v37  ;;  %6061 = vmatpush3.bf16.msra.mxu1 %v6966_v21  ;;  %6083 = vmatpush3.bf16.msra.mxu0 %v6967_v19  ;;  %v6998_v16 = vld [vmem:[%s8307_s9 + $0x2b8] sm:$0xff]   ;;  %v7001_v36 = vld [vmem:[%s8307_s9 + $0x380] sm:$0xff]   ;;  %v7002_v37 = vld [vmem:[%s8307_s9 + $0x3c8] sm:$0xff]  }
 0xd75   : > { %6090 = vmatprep.subr.bf16.mxu1 %v6968_v34  ;;  %6112 = vmatprep.subr.bf16.mxu0 %v6969_v10  ;;  %v6999_v21 = vld [vmem:[%s8307_s9 + $0x338] sm:$0xff]   ;;  %v7003_v38 = vld [vmem:[%s8307_s9 + $0x388] sm:$0xff]   ;;  %v7004_v39 = vld [vmem:[%s8307_s9 + $0x3d0] sm:$0xff]  }
 0xd76   : > { %4888 = vmatprep.mubr.bf16.mxu1 %v3693_v40  ;;  %v7006_v40 = vld [vmem:[%s8307_s9 + $0x3d8] sm:$0xff]  }
 0xd77   : > { %4889 = vmatmul.mubr.bf16.vlgmr.msra.gmra.mrb[40].mxu1 %v3692_v44  ;;  %4930 = vmatmul.mubr.bf16.vlgmr.msra.gmra.mrb[36].mxu0 %v8830_v32  ;;  %v6979_v32 = vld [vmem:[%s8307_s9 + $0x310] sm:$0xff]  }
 0xd78   : > { %6091 = vmatpush3.bf16.msra.mxu1 %v6970_v43  ;;  %6113 = vmatpush3.bf16.msra.mxu0 %v6971_v46  ;;  %v7005_v44 = vld [vmem:[%s8307_s9 + $0x390] sm:$0xff]   ;;  %v7008_v43 = vld [vmem:[%s8307_s9 + $0x3e0] sm:$0xff]  }
 0xd79   : > { %5011 = vmatprep.mubr.bf16.mxu0 %v3699_v42  ;;  %6092 = vmatprep.subr.bf16.mxu1 %v6972_v55  ;;  %v7007_v42 = vld [vmem:[%s8307_s9 + $0x398] sm:$0xff]   ;;  %v7009_v46 = vld [vmem:[%s8307_s9 + $0x3a0] sm:$0xff]   ;;  %v7011_v55 = vld [vmem:[%s8307_s9 + $0x3a8] sm:$0xff]  }
 0xd7a   : > { %6114 = vmatprep.subr.bf16.mxu0 %v6973_v48  ;;  %v2649_v48 = vrot.slane %v8814_v47, %v2616_v50  ;;  %v7015_v50 = vld [vmem:[%s8307_s9 + $0x3b8] sm:$0xff]  }
 0xd7c   : > { %6093 = vmatpush3.bf16.msra.mxu1 %v6974_v62  ;;  %6115 = vmatpush3.bf16.msra.mxu0 %v6975_v22  ;;  %v7012_v62 = vld [vmem:[%s8307_s9 + $0x3f0] sm:$0xff]   ;;  %v2653_v22 = vrot.slane %v8814_v47, %v2620_v52 }
 0xd7d   : > { %6094 = vmatprep.subr.bf16.mxu1 %v6976_v60  ;;  %6116 = vmatprep.subr.bf16.mxu0 %v6977_v49  ;;  %v7013_v49 = vld [vmem:[%s8307_s9 + $0x3b0] sm:$0xff]  }
 0xd80   : > { %6095 = vmatpush3.bf16.msra.mxu1 %v6978_v53  ;;  %6117 = vmatpush3.bf16.msra.mxu0 %v6979_v32 }
 0xd81   : > { %6096 = vmatprep.subr.bf16.mxu1 %v6980_v54  ;;  %6118 = vmatprep.subr.bf16.mxu0 %v6981_v61  ;;  %v7014_v54 = vld [vmem:[%s8307_s9 + $0x3f8] sm:$0xff]  }
 0xd84   : > { %6097 = vmatpush3.bf16.msra.mxu1 %v6982_v63  ;;  %6119 = vmatpush3.bf16.msra.mxu0 %v6983_v2 }
 0xd85   : > { %6098 = vmatprep.subr.bf16.mxu1 %v6984_v0  ;;  %6120 = vmatprep.subr.bf16.mxu0 %v6985_v1 }
 0xd88   : > { %6099 = vmatpush3.bf16.msra.mxu1 %v6986_v3  ;;  %6121 = vmatpush3.bf16.msra.mxu0 %v6987_v4 }
 0xd89   : > { %6100 = vmatprep.subr.bf16.mxu1 %v6988_v5  ;;  %6122 = vmatprep.subr.bf16.mxu0 %v6989_v14 }
 0xd8c   : > { %v3559_v57 = vpop.f32.mrb[28].mxu1  ;;  %6101 = vmatpush3.bf16.msra.mxu1 %v6990_v6  ;;  %6123 = vmatpush3.bf16.msra.mxu0 %v6991_v41 }
 0xd8d   : > { %v3560_v13 = vadd.f32 %v3559_v57, %v2633_v56  ;;  %v3561_v18 = vpop.f32.mrb[29].mxu1  ;;  %6102 = vmatprep.subr.bf16.mxu1 %v6992_v7  ;;  %6124 = vmatprep.subr.bf16.mxu0 %v6993_v8 }
 0xd8e   : > { %v3562_v45 = vadd.f32 %v3561_v18, %v2637_v9  ;;  %v3563_v23 = vpop.f32.mrb[30].mxu1 }
 0xd8f   : > { %v3564_v24 = vadd.f32 %v3563_v23, %v2633_v56  ;;  %v3565_v26 = vpop.f32.mrb[31].mxu1  ;;  %v3664_v19 = vmax.f32 %v3560_v13, 0.0 }
 0xd90   : > { %v3566_v27 = vadd.f32 %v3565_v26, %v2637_v9  ;;  %6103 = vmatpush3.bf16.msra.mxu1 %v6994_v11  ;;  %6125 = vmatpush3.bf16.msra.mxu0 %v6995_v12  ;;  %v3665_v30 = vmax.f32 %v3562_v45, 0.0  ;;  %v5679_v9 = vld [vmem:[%s831_s19] ss:$0 sm:$0xff] }
 0xd91   : > { %v3680_v28 = vmax.f32 %v3564_v24, 0.0  ;;  %6104 = vmatprep.subr.bf16.mxu1 %v6996_v17  ;;  %6126 = vmatprep.subr.bf16.mxu0 %v6997_v20 }
 0xd92   : > { %v3681_v33 = vmax.f32 %v3566_v27, 0.0 }
 0xd93   : > { %v3696_v34 = vpack.c.bf16 %v3680_v28, %v3664_v19 }
 0xd94   : > { %v3697_v10 = vpack.c.bf16 %v3681_v33, %v3665_v30  ;;  %6105 = vmatpush3.bf16.msra.mxu1 %v6998_v16  ;;  %6127 = vmatpush3.bf16.msra.mxu0 %v6999_v21 }
 0xd95   : > { %6134 = vmatprep.subr.bf16.mxu1 %v7000_v29 }
 0xd96   : > { %4970 = vmatprep.mubr.bf16.mxu1 %v3697_v10 }
 0xd97   : > { %4971 = vmatmul.mubr.bf16.vlgmr.msra.gmra.mrb[44].mxu1 %v3696_v34  ;;  %5012 = vmatmul.mubr.bf16.vlgmr.msra.gmra.mrb[40].mxu0 %v8879_v51  ;;  %v7010_v51 = vld [vmem:[%s8307_s9 + $0x3e8] sm:$0xff]  }
 0xd98   : > { %6135 = vmatpush3.bf16.msra.mxu1 %v7001_v36 }
 0xd99   : > { %6136 = vmatprep.subr.bf16.mxu1 %v7002_v37 }
 0xd9c   : > { %6137 = vmatpush3.bf16.msra.mxu1 %v7003_v38 }
 0xd9d   : > { %6138 = vmatprep.subr.bf16.mxu1 %v7004_v39 }
 0xda0   : > { %6139 = vmatpush3.bf16.msra.mxu1 %v7005_v44 }
 0xda1   : > { %6140 = vmatprep.subr.bf16.mxu1 %v7006_v40 }
 0xda4   : > { %6141 = vmatpush3.bf16.msra.mxu1 %v7007_v42 }
 0xda5   : > { %6142 = vmatprep.subr.bf16.mxu1 %v7008_v43 }
 0xda8   : > { %6143 = vmatpush3.bf16.msra.mxu1 %v7009_v46 }
 0xda9   : > { %6144 = vmatprep.subr.bf16.mxu1 %v7010_v51 }
 0xdac   : > { %v3645_v60 = vpop.f32.mrb[32].mxu1  ;;  %6145 = vmatpush3.bf16.msra.mxu1 %v7011_v55 }
 0xdad   : > { %v3646_v53 = vadd.f32 %v3645_v60, %v2649_v48  ;;  %v3647_v32 = vpop.f32.mrb[33].mxu1  ;;  %6146 = vmatprep.subr.bf16.mxu1 %v7012_v62 }
 0xdae   : > { %v3648_v61 = vadd.f32 %v3647_v32, %v2653_v22  ;;  %v3649_v63 = vpop.f32.mrb[34].mxu1 }
 0xdaf   : > { %v3650_v2 = vadd.f32 %v3649_v63, %v2649_v48  ;;  %v3651_v0 = vpop.f32.mrb[35].mxu1  ;;  %v3668_v3 = vmax.f32 %v3646_v53, 0.0 }
 0xdb0   : > { %v3652_v1 = vadd.f32 %v3651_v0, %v2653_v22  ;;  %6147 = vmatpush3.bf16.msra.mxu1 %v7013_v49  ;;  %v3669_v25 = vmax.f32 %v3648_v61, 0.0 }
 0xdb1   : > { %v3684_v4 = vmax.f32 %v3650_v2, 0.0  ;;  %6148 = vmatprep.subr.bf16.mxu1 %v7014_v54 }
 0xdb2   : > { %v3685_v47 = vmax.f32 %v3652_v1, 0.0 }
 0xdb3   : > { %v3700_v52 = vpack.c.bf16 %v3684_v4, %v3668_v3 }
 0xdb4   : > { %v3701_v5 = vpack.c.bf16 %v3685_v47, %v3669_v25  ;;  %6149 = vmatpush3.bf16.msra.mxu1 %v7015_v50 }
 0xdb6   : > { %5052 = vmatprep.mubr.bf16.mxu1 %v3701_v5 }
 0xdb7   : > { %5053 = vmatmul.mubr.bf16.vlgmr.msra.gmra.mrb[48].mxu1 %v3700_v52 }
 0xe0a   : > { %v5996_v14 = vpop.f32.mrb[28].mxu0 }
 0xe0b   : > { %v5997_v6 = vpop.f32.mrb[29].mxu0 }
 0xe0c   : > { %v5998_v41 = vadd.f32 %v5997_v6, %v5996_v14  ;;  %v5999_v56 = vpop.f32.mrb[30].mxu0 }
 0xe0d   : > { %v6000_v7 = vpop.f32.mrb[31].mxu0 }
 0xe0e   : > { %v6001_v8 = vadd.f32 %v6000_v7, %v5999_v56  ;;  %v4768_v18 = vadd.f32 %v5998_v41, %v5679_v9 }
 0xe10   : > { %v4771_v27 = vadd.f32 %v6001_v8, %v5679_v9 }
 0xe2a   : > { %v6018_v57 = vpop.f32.mrb[36].mxu1  ;;  %v6040_v11 = vpop.f32.mrb[32].mxu0 }
 0xe2b   : > { %v6019_v12 = vpop.f32.mrb[37].mxu1  ;;  %v6041_v13 = vpop.f32.mrb[33].mxu0 }
 0xe2c   : > { %v6020_v17 = vadd.f32 %v6019_v12, %v6018_v57  ;;  %v6042_v20 = vadd.f32 %v6041_v13, %v6040_v11  ;;  %v6021_v45 = vpop.f32.mrb[38].mxu1  ;;  %v6043_v23 = vpop.f32.mrb[34].mxu0 }
 0xe2d   : > { %v6022_v24 = vpop.f32.mrb[39].mxu1  ;;  %v6044_v26 = vpop.f32.mrb[35].mxu0 }
 0xe2e   : > { %v4809_v16 = vadd.f32 %v6020_v17, %v4768_v18  ;;  %v6023_v21 = vadd.f32 %v6022_v24, %v6021_v45  ;;  %v6045_v19 = vadd.f32 %v6044_v26, %v6043_v23 }
 0xe30   : > { %v4850_v28 = vadd.f32 %v6042_v20, %v4809_v16  ;;  %v4812_v29 = vadd.f32 %v6023_v21, %v4771_v27 }
 0xe32   : > { %v4853_v30 = vadd.f32 %v6045_v19, %v4812_v29 }
 0xe4a   : > { %v6062_v33 = vpop.f32.mrb[40].mxu1  ;;  %v6084_v34 = vpop.f32.mrb[36].mxu0 }
 0xe4b   : > { %v6063_v10 = vpop.f32.mrb[41].mxu1  ;;  %v6085_v36 = vpop.f32.mrb[37].mxu0 }
 0xe4c   : > { %v6064_v37 = vadd.f32 %v6063_v10, %v6062_v33  ;;  %v6086_v38 = vadd.f32 %v6085_v36, %v6084_v34  ;;  %v6065_v39 = vpop.f32.mrb[42].mxu1  ;;  %v6087_v44 = vpop.f32.mrb[38].mxu0 }
 0xe4d   : > { %v6066_v40 = vpop.f32.mrb[43].mxu1  ;;  %v6088_v42 = vpop.f32.mrb[39].mxu0 }
 0xe4e   : > { %v4891_v43 = vadd.f32 %v6064_v37, %v4850_v28  ;;  %v6067_v46 = vadd.f32 %v6066_v40, %v6065_v39  ;;  %v6089_v51 = vadd.f32 %v6088_v42, %v6087_v44 }
 0xe50   : > { %v4932_v55 = vadd.f32 %v6086_v38, %v4891_v43  ;;  %v4894_v48 = vadd.f32 %v6067_v46, %v4853_v30  ;;  %v5071_v38 = vld [vmem:[#allocation26] sm:$0x3] (!%p5808_p11) }
 0xe51   : > { %v5111_v44 = vrot.slane (!%p5808_p11), %v5071_v38, %v8374_v31  ;;  %v5119_v42 = vrot.slane (!%p5808_p11), %v5071_v38, %v8379_v35 }
 0xe52   : > { %v4935_v62 = vadd.f32 %v6089_v51, %v4894_v48 }
 0xe6a   : > { %v6106_v22 = vpop.f32.mrb[44].mxu1  ;;  %v6128_v60 = vpop.f32.mrb[40].mxu0 }
 0xe6b   : > { %v6107_v49 = vpop.f32.mrb[45].mxu1  ;;  %v6129_v53 = vpop.f32.mrb[41].mxu0 }
 0xe6c   : > { %v6108_v32 = vadd.f32 %v6107_v49, %v6106_v22  ;;  %v6130_v54 = vadd.f32 %v6129_v53, %v6128_v60  ;;  %v6109_v61 = vpop.f32.mrb[46].mxu1  ;;  %v6131_v63 = vpop.f32.mrb[42].mxu0 }
 0xe6d   : > { %v6110_v2 = vpop.f32.mrb[47].mxu1  ;;  %v6132_v0 = vpop.f32.mrb[43].mxu0 }
 0xe6e   : > { %v4973_v1 = vadd.f32 %v6108_v32, %v4932_v55  ;;  %v6111_v50 = vadd.f32 %v6110_v2, %v6109_v61  ;;  %v6133_v3 = vadd.f32 %v6132_v0, %v6131_v63 }
 0xe70   : > { %v5014_v4 = vadd.f32 %v6130_v54, %v4973_v1  ;;  %v4976_v25 = vadd.f32 %v6111_v50, %v4935_v62 }
 0xe72   : > { %v5017_v47 = vadd.f32 %v6133_v3, %v4976_v25 }
 0xe8a   : > { %v6150_v52 = vpop.f32.mrb[48].mxu1 }
 0xe8b   : > { %v6151_v5 = vpop.f32.mrb[49].mxu1 }
 0xe8c   : > { %v6152_v14 = vadd.f32 %v6151_v5, %v6150_v52  ;;  %v6153_v6 = vpop.f32.mrb[50].mxu1 }
 0xe8d   : > { %v6154_v41 = vpop.f32.mrb[51].mxu1 }
 0xe8e   : > { %v5055_v56 = vadd.f32 %v6152_v14, %v5014_v4  ;;  %v6155_v7 = vadd.f32 %v6154_v41, %v6153_v6  ;;  %5070 = sbr.rel (%p5808_p11) target bundleno = 4061 (0xfdd), region = 148 }
 0xe90   : > { %v5061_v8 = vadd.f32 %v5055_v56, %v8567_v59  ;;  %v5058_v9 = vadd.f32 %v6155_v7, %v5017_v47 }
 0xe92   : > { %5063 = vst [vmem:[#allocation2] sm:$0xff] %v5061_v8  ;;  %5065 = vst [vmem:[#allocation27] sm:$0xff] %v5061_v8  ;;  %v5062_v57 = vadd.f32 %v5058_v9, %v8565_v58  ;;  %5072 = vadd.xlane.f32.xlu0 (!%p5808_p11), %v5061_v8 }
 0xe94   : > { %5064 = vst [vmem:[#allocation2 + $0x8] sm:$0xff] %v5062_v57  ;;  %5066 = vst [vmem:[#allocation27 + $0x8] sm:$0xff] %v5062_v57 }
 0xe96   : > { %5074 = vadd.xlane.f32.xlu0 %v5062_v57 }
 0xf1f   : > { %v5073_v11 = vpop.xlane.xlu0 %5072 }
 0xf20   : > { %v5076_v12 = vmul.f32 0.02, %v5073_v11 }
 0xf22   : > { %v5078_v13 = vsub.f32 %v5061_v8, %v5076_v12 }
 0xf23   : > { %v5075_v18 = vpop.xlane.xlu0 %5074 }
 0xf24   : > { %v5080_v17 = vmul.f32 %v8323_v15, %v5078_v13  ;;  %v5077_v20 = vmul.f32 0.02, %v5075_v18 }
 0xf26   : > { %v5079_v59 = vsub.f32 %v5062_v57, %v5077_v20  ;;  %v5082_v45 = vmul.f32 %v5080_v17, %v5080_v17  ;;  %v5112_v40 = vmul.f32 %v5111_v44, %v5080_v17 }
 0xf28   : > { %v5081_v23 = vmul.f32 %v8323_v15, %v5079_v59  ;;  %5084 = vadd.xlane.f32.xlu1 %v5082_v45 }
 0xf2a   : > { %v5083_v58 = vmul.f32 %v5081_v23, %v5081_v23  ;;  %v5113_v51 = vmul.f32 %v5111_v44, %v5081_v23 }
 0xf2c   : > { %5086 = vadd.xlane.f32.xlu1 %v5083_v58 }
 0xfb5   : > { %v5085_v24 = vpop.xlane.xlu1 %5084 }
 0xfb6   : > { %v5088_v26 = vmul.f32 0.020408163, %v5085_v24 }
 0xfb8   : > { %7051 = vrsqrt.f32 %v5088_v26  ;;  %vm5092_vm11 = vcmp.eq.f32.partialorder %v5088_v26, inf  ;;  %v5095_v28 = vand.u32 2147483648, %v5088_v26  ;;  %vm5094_vm12 = vcmp.eq.f32.partialorder %v5088_v26, 0.0 }
 0xfb9   : > { %v5087_v27 = vpop.xlane.xlu1 %5086 }
 0xfba   : > { %v5089_v16 = vmul.f32 0.020408163, %v5087_v27 }
 0xfbc   : > { %7053 = vrsqrt.f32 %v5089_v16  ;;  %vm5099_vm13 = vcmp.eq.f32.partialorder %v5089_v16, inf  ;;  %v5102_v15 = vand.u32 2147483648, %v5089_v16  ;;  %vm5101_vm14 = vcmp.eq.f32.partialorder %v5089_v16, 0.0 }
 0xfc2   : > { %v7052_v21 = vpop.eup %7051 }
 0xfc3   : > { %v5091_v19 = vmul.f32 %v7052_v21, %v5088_v26 }
 0xfc5   : > { %v5093_v29 = vsel %vm5092_vm11, %v5088_v26, %v5091_v19 }
 0xfc6   : > { %v7054_v30 = vpop.eup %7053  ;;  %v5096_v33 = vsel %vm5094_vm12, %v5095_v28, %v5093_v29 }
 0xfc7   : > { %v5104_v34 = vadd.f32 1e-06, %v5096_v33  ;;  %v5098_v10 = vmul.f32 %v7054_v30, %v5089_v16 }
 0xfc9   : > { %7055 = vrcp.f32 %v5104_v34  ;;  %v5100_v36 = vsel %vm5099_vm13, %v5089_v16, %v5098_v10 }
 0xfca   : > { %v5103_v37 = vsel %vm5101_vm14, %v5102_v15, %v5100_v36 }
 0xfcb   : > { %v5105_v39 = vadd.f32 1e-06, %v5103_v37 }
 0xfcd   : > { %7057 = vrcp.f32 %v5105_v39 }
 0xfd3   : > { %v7056_v43 = vpop.eup %7055 }
 0xfd4   : > { %v5114_v46 = vmul.f32 %v7056_v43, %v5112_v40 }
 0xfd6   : > { %v5120_v55 = vadd.f32 %v5119_v42, %v5114_v46 }
 0xfd7   : > { %v7058_v48 = vpop.eup %7057 }
 0xfd8   : > { %5122 = vst [vmem:[#allocation27] sm:$0xff] %v5120_v55  ;;  %v5115_v62 = vmul.f32 %v7058_v48, %v5113_v51 }
 0xfda   : > { %v5121_v22 = vadd.f32 %v5119_v42, %v5115_v62 }
 0xfdc   : > { %5123 = vst [vmem:[#allocation27 + $0x8] sm:$0xff] %v5121_v22 }
 0xfdd PF: > { %s9097_s24 = sld [smem:[#allocation40_spill]]  ;;  %s7626_s30 = smov [#allocation27]  }
 0xfde   : > { %s5130_s7 = sshll.u32 %s7626_s30, 4  ;;  %s5131_s7 = int_to_ptr.vmem [resolvable:$true] %s5130_s7 }
 0xfdf   : > { %s7501_s16 = scalar_lea.vmem %s5131_s7, 256  ;;  %p7508_p2 = scmp.lt.s32.totalorder %s5131_s7, %s5131_s7 }
 0xfe0   : > { %p7502_p12 = scmp.ne.s32.totalorder %s5131_s7, %s7501_s16  ;;  %p7509_p9 = scmp.lt.s32.totalorder %s7501_s16, %s7501_s16 }
 0xfe2   : > { %p7510_p4 = por %p7509_p9, %p7508_p2 }
 0xfe3   : > { %p6835_p10 = scmp.eq.s32.totalorder %s9097_s24, 5 }
 0xfe5   : > { %p7503_p0 = pnand %p7502_p12, %p6835_p10 }
 0xfe7   : > { %p7504_p1 = pneg %p7503_p0 }
 0xfe9   : > { %p7511_p8 = pnand %p7510_p4, %p7504_p1 }
 0xfeb   : > { %7514 = shalt.err (!%p7511_p8)
}
 0xfec   : > { %s9098_s17 = sld [smem:[#allocation55_spill]] }
 0xff2   : > { %s7515_s1 = scalar_lea.hbm %s9098_s17, 256 }
 0xff3   : > { %p7516_p13 = scmp.ne.s32.totalorder %s9098_s17, %s7515_s1  ;;  %p7521_p5 = scmp.lt.u32.totalorder %s7515_s1, %s9098_s17 }
 0xff5   : > { %p7517_p6 = pnand %p7516_p13, %p6835_p10 }
 0xff7   : > { %p7518_p7 = pneg %p7517_p6 }
 0xff9   : > { %p7523_p3 = pnand %p7521_p5, %p7518_p7 }
 0xffb   : > { %7526 = shalt.err (!%p7523_p3)
}
 0xffc   : > { %s7627_s6 = smov 128   ;;  %s7628_s3 = smov 8  }
 0xffd   : > { %6776 = dma.vmem_to_hbm [thread:$0]  (%p6835_p10), %s5131_s7, 256, %s9098_s17, [#allocation5], %s7627_s6, %s7627_s6, %s7628_s3  }
 0xffe   : > { %7580 = dma.done.wait (%p6835_p10), [#allocation5], 256  }
 0xfff   : > { %7582 = vsyncadd (%p6835_p10), [#allocation5], 4294967040 }
0x1000 PF: > { %s9099_s21 = sld [smem:[#allocation41_spill]]  ;;  %s9100_s18 = sld [smem:[#allocation38_spill]] }
0x1001   : > { %s9101_s19 = sld [smem:[#allocation39_spill]]  ;;  %s9102_s20 = sld [smem:[#allocation42_spill]] }
0x1006   : > { %p43_p11 = scmp.ge.s32.totalorder %s9099_s21, 8  }
0x1008   :  { %45 = sbr.rel (!%p43_p11) target bundleno = 28 (0x1c), region = 266 }
0x100f   :  { %5146 = vsyncpa [#allocation4], 1 }
0x1010   :  { %5148 = vsyncpa [#allocation4 + $0x1], 1 }
0x1011   :  { %5149 = vsyncpa [#allocation7], 1 }
0x1012   :  { %5150 = vsyncpa [#allocation10], 1 }
0x1013   :  { %5152 = vsyncpa [#allocation10 + $0x1], 1 }
0x1014   :  { %5153 = vsyncpa [#allocation13], 1 }
0x1015   :  { %5155 = vsyncpa [#allocation13 + $0x1], 1 }
0x1016   :  { %5156 = vsyncpa [#allocation16], 1 }
0x1017   :  { %5158 = vsyncpa [#allocation16 + $0x1], 1 }
0x1018   :  { %5159 = vsyncpa [#allocation19], 1 }
0x1019   :  { %5161 = vsyncpa [#allocation19 + $0x1], 1 }
0x101a   :  { %5162 = vsyncpa [#allocation22], 1 }
0x101b   :  { %5164 = vsyncpa [#allocation22 + $0x1], 1 }
0x101c   :  { %5165 = vsyncpa [#allocation25], 1 }
0x101d   :  { %5167 = vsyncpa [#allocation25 + $0x1], 1 }
0x101e   :  { %5168 = vsyncpa [#allocation5], 1 }
0x101f   :  { %5170 = vsyncpa [#allocation5 + $0x1], 1 }

</bundles_post_ra>
